<compile_context>
chip_gen: v6e
topology: v6e:2x2x1
jax: 0.10.0
libtpu: 0.0.40
codegen_flags: <defaults>
</compile_context>

<pallas_src>
import math
from functools import partial

import jax
import jax.numpy as jnp
from jax.experimental import pallas as pl
from jax.experimental.pallas import tpu as pltpu

# ----------------------------- model config ---------------------------------
D_MODEL = 32
NHEAD = 4
HEAD_DIM = D_MODEL // NHEAD
DIM_FF = 64
NUM_LAYERS = 2
LN_EPS = 1e-5


def _layernorm(x, w, b, eps=LN_EPS):
    mu = jnp.mean(x, axis=-1, keepdims=True)
    var = jnp.mean((x - mu) ** 2, axis=-1, keepdims=True)
    return (x - mu) * jax.lax.rsqrt(var + eps) * w + b


# ------------------------------ Pallas kernel --------------------------------
def fused_encoder_kernel(xp_ref, mask_ref, wqkv_ref, wo_ref, bqk_ref,
                         w1_ref, w2_ref, vec_ref, out_ref,
                         *, batch, seq, num_layers):
    """Single invocation: whole (B*S, D) activation resident in VMEM, all layers."""
    BS = batch * seq
    x = xp_ref[0]            # (B*S, D) current activation (src)
    p = xp_ref[1]            # (B*S, D) positional encoding
    neg = mask_ref[...]      # (B*S, B*S) additive block-diagonal mask, hoisted

    for l in range(num_layers):                       # static unroll over layers
        vec = vec_ref[l]                              # (7, F) packed small vectors
        bo = vec[0:1, :D_MODEL]                       # out-proj bias (+ folded value bias)
        ln1w = vec[1:2, :D_MODEL]
        ln1b = vec[2:3, :D_MODEL]
        b2 = vec[3:4, :D_MODEL]
        ln2w = vec[4:5, :D_MODEL]
        ln2b = vec[5:6, :D_MODEL]
        b1 = vec[6:7, :]                              # (1, F)

        # ---- self-attention: q = k = x + pos, value = x ----
        qk_in = x + p                                 # (B*S, D)
        attn = jnp.zeros((BS, D_MODEL), jnp.float32)

        for h in range(NHEAD):                        # static unroll over heads
            b2h = bqk_ref[l, h]                       # (2, hd): [bq*scale, bk]
            # q / k / v projections issued back-to-back (MXU pushes pipeline);
            # 1/sqrt(hd) pre-folded into wq, value-bias folded into bo.
            qh = jnp.dot(qk_in, wqkv_ref[l, 3 * h + 0],
                         preferred_element_type=jnp.float32) + b2h[0:1]   # (BS, hd)
            kh = jnp.dot(qk_in, wqkv_ref[l, 3 * h + 1],
                         preferred_element_type=jnp.float32) + b2h[1:2]   # (BS, hd)
            vh = jnp.dot(x, wqkv_ref[l, 3 * h + 2],
                         preferred_element_type=jnp.float32)              # (BS, hd)

            # Flattened-batch scores: one (BS, BS) matmul, cross-batch blocks masked.
            s = jax.lax.dot_general(qh, kh, (((1,), (1,)), ((), ())),
                                    preferred_element_type=jnp.float32) + neg
            m = jnp.max(s, axis=-1, keepdims=True)
            e = jnp.exp(s - m)
            inv = pl.reciprocal(jnp.sum(e, axis=-1, keepdims=True), approx=True)
            oh = jnp.dot(e * inv, vh, preferred_element_type=jnp.float32)  # (BS, hd)
            # Out-projection accumulated per head (no concatenate relayout).
            attn = attn + jnp.dot(oh, wo_ref[l, h],
                                  preferred_element_type=jnp.float32)      # (BS, D)
        attn = attn + bo

        # ---- residual + LayerNorm1 ----
        x = _layernorm(x + attn, ln1w, ln1b)

        # ---- feed-forward (ReLU) ----
        h1 = jnp.maximum(
            jnp.dot(x, w1_ref[l], preferred_element_type=jnp.float32) + b1, 0.0)
        ffn = jnp.dot(h1, w2_ref[l], preferred_element_type=jnp.float32) + b2

        # ---- residual + LayerNorm2 ----
        x = _layernorm(x + ffn, ln2w, ln2b)

    out_ref[...] = x.astype(out_ref.dtype)


# --------------------------- parameter packing --------------------------------
def pack_params(layer_params_list):
    """Pack per-layer params into a few stacked slabs (few DMAs, per-head split,
    scale folded into wq/bq, value bias folded into the output bias)."""
    scale = 1.0 / math.sqrt(HEAD_DIM)
    wqkv, wo, bqk, w1, w2, vecs = [], [], [], [], [], []
    for prm in layer_params_list:
        per_head_w, per_head_b, per_head_wo = [], [], []
        for h in range(NHEAD):
            sl = slice(h * HEAD_DIM, (h + 1) * HEAD_DIM)
            per_head_w.append(prm["wq"][:, sl] * scale)   # (D, hd)
            per_head_w.append(prm["wk"][:, sl])
            per_head_w.append(prm["wv"][:, sl])
            per_head_b.append(jnp.stack(
                [prm["bq"][0, sl] * scale, prm["bk"][0, sl]], axis=0))  # (2, hd)
            per_head_wo.append(prm["wo"][sl, :])           # (hd, D)
        wqkv.append(jnp.stack(per_head_w, axis=0))         # (3H, D, hd)
        bqk.append(jnp.stack(per_head_b, axis=0))          # (H, 2, hd)
        wo.append(jnp.stack(per_head_wo, axis=0))          # (H, hd, D)
        w1.append(prm["w1"])                               # (D, F)
        w2.append(prm["w2"])                               # (F, D)
        # value bias folded into output bias: softmax rows sum to 1.
        bo_eff = prm["bo"] + prm["bv"] @ prm["wo"]         # (1, D)
        dvec = jnp.concatenate(
            [bo_eff, prm["ln1w"], prm["ln1b"], prm["b2"], prm["ln2w"], prm["ln2b"]],
            axis=0)                                        # (6, D)
        dvec = jnp.pad(dvec, ((0, 0), (0, DIM_FF - D_MODEL)))
        vecs.append(jnp.concatenate([dvec, prm["b1"]], axis=0))  # (7, F)
    return dict(wqkv=jnp.stack(wqkv), wo=jnp.stack(wo), bqk=jnp.stack(bqk),
                w1=jnp.stack(w1), w2=jnp.stack(w2), vecs=jnp.stack(vecs))


# ------------------------------ JAX wrapper ----------------------------------
def transformer_encoder(src, pos, layer_params_list, norm_params=None):
    """src, pos: (B, S, D) float32. Returns (B, S, D)."""
    B, S, D = src.shape
    L = len(layer_params_list)
    BS = B * S
    packed = pack_params(layer_params_list)
    F = packed["w1"].shape[-1]

    # Stack src|pos into one slab (fewer DMA descriptors in the prologue).
    xp = jnp.stack([src.reshape(BS, D), pos.reshape(BS, D)], axis=0)  # (2, BS, D)

    # Block-diagonal additive mask for flattened-batch attention (hoisted; free
    # inside the kernel). Large-negative, not -inf, so exp()/max stay finite.
    bid = jnp.arange(BS, dtype=jnp.int32) // S
    neg_mask = jnp.where(bid[:, None] == bid[None, :],
                         jnp.float32(0.0), jnp.float32(-1e30))        # (BS, BS)

    def full_spec(shape):
        nd = len(shape)

        def imap(i):
            return (0,) * nd

        return pl.BlockSpec(shape, imap)

    kernel = partial(fused_encoder_kernel, batch=B, seq=S, num_layers=L)

    inputs = (xp, neg_mask, packed["wqkv"], packed["wo"], packed["bqk"],
              packed["w1"], packed["w2"], packed["vecs"])

    flops_layer = (
        2 * BS * D * HEAD_DIM * 3 * NHEAD       # q/k/v projections
        + 2 * BS * BS * HEAD_DIM * 2 * NHEAD    # scores + probs @ V
        + 2 * BS * HEAD_DIM * D * NHEAD         # out-projection
        + 2 * BS * D * F + 2 * BS * F * D       # FFN
    )
    cost = pl.CostEstimate(
        flops=int(L * flops_layer),
        transcendentals=int(L * (NHEAD * BS * (BS + 1) + 2 * BS)),
        bytes_accessed=int(sum(int(a.size) * 4 for a in inputs) + BS * D * 4),
    )

    # TODO(synk): on v7x add a leading "parallel" grid axis over batch to use
    # both TensorCores; kept grid=(1,) for v5e/v6e portability at this toy size.
    # TODO(synk): for real DETR shapes (D=256, F=2048, S~600+, 6 layers) move the
    # layer index onto a grid axis (per-layer weight streaming) and tile the
    # sequence instead of keeping everything VMEM-resident.
    out2d = pl.pallas_call(
        kernel,
        out_shape=jax.ShapeDtypeStruct((BS, D), src.dtype),
        grid_spec=pltpu.PrefetchScalarGridSpec(
            num_scalar_prefetch=0,
            grid=(1,),                                   # single step, no per-batch loop
            in_specs=[
                full_spec((2, BS, D)),                   # src | pos
                full_spec((BS, BS)),                     # block-diagonal mask
                full_spec((L, 3 * NHEAD, D, HEAD_DIM)),  # per-head wq*scale / wk / wv
                full_spec((L, NHEAD, HEAD_DIM, D)),      # per-head wo
                full_spec((L, NHEAD, 2, HEAD_DIM)),      # per-head bq*scale / bk
                full_spec((L, D, F)),                    # w1
                full_spec((L, F, D)),                    # w2
                full_spec((L, 7, F)),                    # packed biases / LN vectors / b1
            ],
            out_specs=full_spec((BS, D)),
        ),
        compiler_params=pltpu.CompilerParams(
            dimension_semantics=("arbitrary",)),
        cost_estimate=cost,
    )(*inputs)

    out = out2d.reshape(B, S, D)
    if norm_params is not None:
        # TODO(synk): final norm kept in plain JAX (only used if norm is not None).
        w, b = norm_params
        out = _layernorm(out, w, b)
    return out


# --------------------------- parameter construction --------------------------
def init_layer_params(key, d_model=D_MODEL, dim_ff=DIM_FF):
    ks = jax.random.split(key, 12)
    s_attn = 1.0 / math.sqrt(d_model)
    s_ff1 = 1.0 / math.sqrt(d_model)
    s_ff2 = 1.0 / math.sqrt(dim_ff)
    bs = 0.02  # small nonzero biases so all bias paths are exercised
    return {
        "wq": jax.random.normal(ks[0], (d_model, d_model), jnp.float32) * s_attn,
        "bq": jax.random.normal(ks[6], (1, d_model), jnp.float32) * bs,
        "wk": jax.random.normal(ks[1], (d_model, d_model), jnp.float32) * s_attn,
        "bk": jax.random.normal(ks[7], (1, d_model), jnp.float32) * bs,
        "wv": jax.random.normal(ks[2], (d_model, d_model), jnp.float32) * s_attn,
        "bv": jax.random.normal(ks[8], (1, d_model), jnp.float32) * bs,
        "wo": jax.random.normal(ks[3], (d_model, d_model), jnp.float32) * s_attn,
        "bo": jax.random.normal(ks[9], (1, d_model), jnp.float32) * bs,
        "ln1w": jnp.ones((1, d_model), jnp.float32),
        "ln1b": jnp.zeros((1, d_model), jnp.float32),
        "w1": jax.random.normal(ks[4], (d_model, dim_ff), jnp.float32) * s_ff1,
        "b1": jax.random.normal(ks[10], (1, dim_ff), jnp.float32) * bs,
        "w2": jax.random.normal(ks[5], (dim_ff, d_model), jnp.float32) * s_ff2,
        "b2": jax.random.normal(ks[11], (1, d_model), jnp.float32) * bs,
        "ln2w": jnp.ones((1, d_model), jnp.float32),
        "ln2b": jnp.zeros((1, d_model), jnp.float32),
    }


# ----------------------------- pure-JAX reference ----------------------------
def reference_encoder(src, pos, layer_params_list):
    scale = 1.0 / math.sqrt(HEAD_DIM)
    B, S, D = src.shape
    x = src
    for prm in layer_params_list:
        q = (x + pos) @ prm["wq"] + prm["bq"]
        k = (x + pos) @ prm["wk"] + prm["bk"]
        v = x @ prm["wv"] + prm["bv"]
        qh = q.reshape(B, S, NHEAD, HEAD_DIM).transpose(0, 2, 1, 3)
        kh = k.reshape(B, S, NHEAD, HEAD_DIM).transpose(0, 2, 1, 3)
        vh = v.reshape(B, S, NHEAD, HEAD_DIM).transpose(0, 2, 1, 3)
        s = jnp.einsum("bhqd,bhkd->bhqk", qh, kh) * scale
        pr = jax.nn.softmax(s, axis=-1)
        o = jnp.einsum("bhqk,bhkd->bhqd", pr, vh).transpose(0, 2, 1, 3).reshape(B, S, D)
        attn = o @ prm["wo"] + prm["bo"]
        x = _layernorm(x + attn, prm["ln1w"], prm["ln1b"])
        ffn = jnp.maximum(x @ prm["w1"] + prm["b1"], 0.0) @ prm["w2"] + prm["b2"]
        x = _layernorm(x + ffn, prm["ln2w"], prm["ln2b"])
    return x


# --------------------------------- main --------------------------------------
if __name__ == "__main__":
    B, S = 2, 8
    root = jax.random.PRNGKey(0)
    k_src, k_pos, k_layers = jax.random.split(root, 3)

    src = jax.random.normal(k_src, (B, S, D_MODEL), jnp.float32)
    pos = jax.random.normal(k_pos, (B, S, D_MODEL), jnp.float32)

    layer_keys = jax.random.split(k_layers, NUM_LAYERS)
    layer_params = [init_layer_params(k) for k in layer_keys]

    out = transformer_encoder(src, pos, layer_params, norm_params=None)
    out = jax.block_until_ready(out)
    assert out.shape == (B, S, D_MODEL)
    assert bool(jnp.all(jnp.isfinite(out)))

    ref = reference_encoder(src, pos, layer_params)
    err = float(jnp.max(jnp.abs(out - ref)))
    assert err < 1e-2, f"mismatch vs reference: max abs err {err}"
    print("KERNEL_OK")
</pallas_src>

<mosaic_0001>
module attributes {stable_mosaic.version = 11 : i64} {
  func.func @fused_encoder_kernel(%arg0: i32, %arg1: memref<2x16x32xf32, #tpu.memory_space<vmem>>, %arg2: memref<16x16xf32, #tpu.memory_space<vmem>>, %arg3: memref<2x12x32x8xf32, #tpu.memory_space<vmem>>, %arg4: memref<2x4x8x32xf32, #tpu.memory_space<vmem>>, %arg5: memref<2x4x2x8xf32, #tpu.memory_space<vmem>>, %arg6: memref<2x32x64xf32, #tpu.memory_space<vmem>>, %arg7: memref<2x64x32xf32, #tpu.memory_space<vmem>>, %arg8: memref<2x7x64xf32, #tpu.memory_space<vmem>>, %arg9: memref<16x32xf32, #tpu.memory_space<vmem>>) attributes {dimension_semantics = [#tpu.dimension_semantics<arbitrary>], iteration_bounds = array<i64: 1>, scalar_prefetch = 0 : i64, scratch_operands = 0 : i64, tpu.core_type = #tpu.core_type<tc>, window_params = [{pipeline_mode = #tpu.pipeline_mode<synchronous>, transform_indices = @transform_0, window_bounds = array<i64: 2, 16, 32>}, {pipeline_mode = #tpu.pipeline_mode<synchronous>, transform_indices = @transform_1, window_bounds = array<i64: 16, 16>}, {pipeline_mode = #tpu.pipeline_mode<synchronous>, transform_indices = @transform_2, window_bounds = array<i64: 2, 12, 32, 8>}, {pipeline_mode = #tpu.pipeline_mode<synchronous>, transform_indices = @transform_3, window_bounds = array<i64: 2, 4, 8, 32>}, {pipeline_mode = #tpu.pipeline_mode<synchronous>, transform_indices = @transform_4, window_bounds = array<i64: 2, 4, 2, 8>}, {pipeline_mode = #tpu.pipeline_mode<synchronous>, transform_indices = @transform_5, window_bounds = array<i64: 2, 32, 64>}, {pipeline_mode = #tpu.pipeline_mode<synchronous>, transform_indices = @transform_6, window_bounds = array<i64: 2, 64, 32>}, {pipeline_mode = #tpu.pipeline_mode<synchronous>, transform_indices = @transform_7, window_bounds = array<i64: 2, 7, 64>}, {pipeline_mode = #tpu.pipeline_mode<synchronous>, transform_indices = @transform_8, window_bounds = array<i64: 16, 32>}]} {
    %c0 = arith.constant 0 : index
    %c0_0 = arith.constant 0 : index
    %c0_1 = arith.constant 0 : index
    %0 = vector.load %arg1[%c0, %c0_0, %c0_1] : memref<2x16x32xf32, #tpu.memory_space<vmem>>, vector<1x16x32xf32>
    %1 = vector.shape_cast %0 : vector<1x16x32xf32> to vector<16x32xf32>
    %c1 = arith.constant 1 : index
    %c0_2 = arith.constant 0 : index
    %c0_3 = arith.constant 0 : index
    %2 = vector.load %arg1[%c1, %c0_2, %c0_3] : memref<2x16x32xf32, #tpu.memory_space<vmem>>, vector<1x16x32xf32>
    %3 = vector.shape_cast %2 : vector<1x16x32xf32> to vector<16x32xf32>
    %c0_4 = arith.constant 0 : index
    %c0_5 = arith.constant 0 : index
    %4 = vector.load %arg2[%c0_4, %c0_5] : memref<16x16xf32, #tpu.memory_space<vmem>>, vector<16x16xf32>
    %c0_6 = arith.constant 0 : index
    %c0_7 = arith.constant 0 : index
    %c0_8 = arith.constant 0 : index
    %5 = vector.load %arg8[%c0_6, %c0_7, %c0_8] : memref<2x7x64xf32, #tpu.memory_space<vmem>>, vector<1x7x64xf32>
    %6 = vector.shape_cast %5 : vector<1x7x64xf32> to vector<7x64xf32>
    %7 = vector.extract_strided_slice %6 {offsets = [0, 0], sizes = [1, 32], strides = [1, 1]} : vector<7x64xf32> to vector<1x32xf32>
    %8 = vector.extract_strided_slice %6 {offsets = [1, 0], sizes = [1, 32], strides = [1, 1]} : vector<7x64xf32> to vector<1x32xf32>
    %9 = vector.extract_strided_slice %6 {offsets = [2, 0], sizes = [1, 32], strides = [1, 1]} : vector<7x64xf32> to vector<1x32xf32>
    %10 = vector.extract_strided_slice %6 {offsets = [3, 0], sizes = [1, 32], strides = [1, 1]} : vector<7x64xf32> to vector<1x32xf32>
    %11 = vector.extract_strided_slice %6 {offsets = [4, 0], sizes = [1, 32], strides = [1, 1]} : vector<7x64xf32> to vector<1x32xf32>
    %12 = vector.extract_strided_slice %6 {offsets = [5, 0], sizes = [1, 32], strides = [1, 1]} : vector<7x64xf32> to vector<1x32xf32>
    %13 = vector.extract_strided_slice %6 {offsets = [6, 0], sizes = [1, 64], strides = [1, 1]} : vector<7x64xf32> to vector<1x64xf32>
    %14 = arith.addf %1, %3 : vector<16x32xf32>
    %cst = arith.constant 0.000000e+00 : f32
    %15 = vector.broadcast %cst : f32 to vector<16x32xf32>
    %c0_9 = arith.constant 0 : index
    %c0_10 = arith.constant 0 : index
    %c0_11 = arith.constant 0 : index
    %c0_12 = arith.constant 0 : index
    %16 = vector.load %arg5[%c0_9, %c0_10, %c0_11, %c0_12] : memref<2x4x2x8xf32, #tpu.memory_space<vmem>>, vector<1x1x2x8xf32>
    %17 = vector.shape_cast %16 : vector<1x1x2x8xf32> to vector<2x8xf32>
    %c0_13 = arith.constant 0 : index
    %c0_14 = arith.constant 0 : index
    %c0_15 = arith.constant 0 : index
    %c0_16 = arith.constant 0 : index
    %18 = vector.load %arg3[%c0_13, %c0_14, %c0_15, %c0_16] : memref<2x12x32x8xf32, #tpu.memory_space<vmem>>, vector<1x1x32x8xf32>
    %19 = vector.shape_cast %18 : vector<1x1x32x8xf32> to vector<32x8xf32>
    %cst_17 = arith.constant dense<0.000000e+00> : vector<16x8xf32>
    %20 = tpu.matmul %14, %19, %cst_17 {dimension_numbers = #tpu.dot_dimension_numbers<[1], [0], [0], [1], [0, 0, 1, 1], [], []>} : vector<16x32xf32>, vector<32x8xf32>, vector<16x8xf32> -> vector<16x8xf32>
    %21 = vector.extract_strided_slice %17 {offsets = [0, 0], sizes = [1, 8], strides = [1, 1]} : vector<2x8xf32> to vector<1x8xf32>
    %22 = vector.broadcast %21 : vector<1x8xf32> to vector<16x8xf32>
    %23 = arith.addf %20, %22 : vector<16x8xf32>
    %c0_18 = arith.constant 0 : index
    %c1_19 = arith.constant 1 : index
    %c0_20 = arith.constant 0 : index
    %c0_21 = arith.constant 0 : index
    %24 = vector.load %arg3[%c0_18, %c1_19, %c0_20, %c0_21] : memref<2x12x32x8xf32, #tpu.memory_space<vmem>>, vector<1x1x32x8xf32>
    %25 = vector.shape_cast %24 : vector<1x1x32x8xf32> to vector<32x8xf32>
    %cst_22 = arith.constant dense<0.000000e+00> : vector<16x8xf32>
    %26 = tpu.matmul %14, %25, %cst_22 {dimension_numbers = #tpu.dot_dimension_numbers<[1], [0], [0], [1], [0, 0, 1, 1], [], []>} : vector<16x32xf32>, vector<32x8xf32>, vector<16x8xf32> -> vector<16x8xf32>
    %27 = vector.extract_strided_slice %17 {offsets = [1, 0], sizes = [1, 8], strides = [1, 1]} : vector<2x8xf32> to vector<1x8xf32>
    %28 = vector.broadcast %27 : vector<1x8xf32> to vector<16x8xf32>
    %29 = arith.addf %26, %28 : vector<16x8xf32>
    %c0_23 = arith.constant 0 : index
    %c2 = arith.constant 2 : index
    %c0_24 = arith.constant 0 : index
    %c0_25 = arith.constant 0 : index
    %30 = vector.load %arg3[%c0_23, %c2, %c0_24, %c0_25] : memref<2x12x32x8xf32, #tpu.memory_space<vmem>>, vector<1x1x32x8xf32>
    %31 = vector.shape_cast %30 : vector<1x1x32x8xf32> to vector<32x8xf32>
    %cst_26 = arith.constant dense<0.000000e+00> : vector<16x8xf32>
    %32 = tpu.matmul %1, %31, %cst_26 {dimension_numbers = #tpu.dot_dimension_numbers<[1], [0], [0], [1], [0, 0, 1, 1], [], []>} : vector<16x32xf32>, vector<32x8xf32>, vector<16x8xf32> -> vector<16x8xf32>
    %cst_27 = arith.constant dense<0.000000e+00> : vector<16x16xf32>
    %33 = tpu.matmul %23, %29, %cst_27 {dimension_numbers = #tpu.dot_dimension_numbers<[1], [1], [0], [0], [0, 0, 1, 0], [], []>} : vector<16x8xf32>, vector<16x8xf32>, vector<16x16xf32> -> vector<16x16xf32>
    %34 = arith.addf %33, %4 : vector<16x16xf32>
    %cst_28 = arith.constant dense<0xFF800000> : vector<16xf32>
    %35 = vector.multi_reduction <maximumf>, %34, %cst_28 [1] : vector<16x16xf32> to vector<16xf32>
    %36 = vector.shape_cast %35 : vector<16xf32> to vector<16x1xf32>
    %37 = vector.broadcast %36 : vector<16x1xf32> to vector<16x16xf32>
    %38 = arith.subf %34, %37 : vector<16x16xf32>
    %39 = math.exp %38 : vector<16x16xf32>
    %cst_29 = arith.constant dense<0.000000e+00> : vector<16xf32>
    %40 = vector.multi_reduction <add>, %39, %cst_29 [1] : vector<16x16xf32> to vector<16xf32>
    %41 = vector.shape_cast %40 : vector<16xf32> to vector<16x1xf32>
    %42 = tpu.reciprocal %41 {approx = true} : vector<16x1xf32> -> vector<16x1xf32>
    %43 = vector.broadcast %42 : vector<16x1xf32> to vector<16x16xf32>
    %44 = arith.mulf %39, %43 : vector<16x16xf32>
    %cst_30 = arith.constant dense<0.000000e+00> : vector<16x8xf32>
    %45 = tpu.matmul %44, %32, %cst_30 {dimension_numbers = #tpu.dot_dimension_numbers<[1], [0], [0], [1], [0, 0, 1, 1], [], []>} : vector<16x16xf32>, vector<16x8xf32>, vector<16x8xf32> -> vector<16x8xf32>
    %c0_31 = arith.constant 0 : index
    %c0_32 = arith.constant 0 : index
    %c0_33 = arith.constant 0 : index
    %c0_34 = arith.constant 0 : index
    %46 = vector.load %arg4[%c0_31, %c0_32, %c0_33, %c0_34] : memref<2x4x8x32xf32, #tpu.memory_space<vmem>>, vector<1x1x8x32xf32>
    %47 = vector.shape_cast %46 : vector<1x1x8x32xf32> to vector<8x32xf32>
    %cst_35 = arith.constant dense<0.000000e+00> : vector<16x32xf32>
    %48 = tpu.matmul %45, %47, %cst_35 {dimension_numbers = #tpu.dot_dimension_numbers<[1], [0], [0], [1], [0, 0, 1, 1], [], []>} : vector<16x8xf32>, vector<8x32xf32>, vector<16x32xf32> -> vector<16x32xf32>
    %49 = arith.addf %15, %48 : vector<16x32xf32>
    %c0_36 = arith.constant 0 : index
    %c1_37 = arith.constant 1 : index
    %c0_38 = arith.constant 0 : index
    %c0_39 = arith.constant 0 : index
    %50 = vector.load %arg5[%c0_36, %c1_37, %c0_38, %c0_39] : memref<2x4x2x8xf32, #tpu.memory_space<vmem>>, vector<1x1x2x8xf32>
    %51 = vector.shape_cast %50 : vector<1x1x2x8xf32> to vector<2x8xf32>
    %c0_40 = arith.constant 0 : index
    %c3 = arith.constant 3 : index
    %c0_41 = arith.constant 0 : index
    %c0_42 = arith.constant 0 : index
    %52 = vector.load %arg3[%c0_40, %c3, %c0_41, %c0_42] : memref<2x12x32x8xf32, #tpu.memory_space<vmem>>, vector<1x1x32x8xf32>
    %53 = vector.shape_cast %52 : vector<1x1x32x8xf32> to vector<32x8xf32>
    %cst_43 = arith.constant dense<0.000000e+00> : vector<16x8xf32>
    %54 = tpu.matmul %14, %53, %cst_43 {dimension_numbers = #tpu.dot_dimension_numbers<[1], [0], [0], [1], [0, 0, 1, 1], [], []>} : vector<16x32xf32>, vector<32x8xf32>, vector<16x8xf32> -> vector<16x8xf32>
    %55 = vector.extract_strided_slice %51 {offsets = [0, 0], sizes = [1, 8], strides = [1, 1]} : vector<2x8xf32> to vector<1x8xf32>
    %56 = vector.broadcast %55 : vector<1x8xf32> to vector<16x8xf32>
    %57 = arith.addf %54, %56 : vector<16x8xf32>
    %c0_44 = arith.constant 0 : index
    %c4 = arith.constant 4 : index
    %c0_45 = arith.constant 0 : index
    %c0_46 = arith.constant 0 : index
    %58 = vector.load %arg3[%c0_44, %c4, %c0_45, %c0_46] : memref<2x12x32x8xf32, #tpu.memory_space<vmem>>, vector<1x1x32x8xf32>
    %59 = vector.shape_cast %58 : vector<1x1x32x8xf32> to vector<32x8xf32>
    %cst_47 = arith.constant dense<0.000000e+00> : vector<16x8xf32>
    %60 = tpu.matmul %14, %59, %cst_47 {dimension_numbers = #tpu.dot_dimension_numbers<[1], [0], [0], [1], [0, 0, 1, 1], [], []>} : vector<16x32xf32>, vector<32x8xf32>, vector<16x8xf32> -> vector<16x8xf32>
    %61 = vector.extract_strided_slice %51 {offsets = [1, 0], sizes = [1, 8], strides = [1, 1]} : vector<2x8xf32> to vector<1x8xf32>
    %62 = vector.broadcast %61 : vector<1x8xf32> to vector<16x8xf32>
    %63 = arith.addf %60, %62 : vector<16x8xf32>
    %c0_48 = arith.constant 0 : index
    %c5 = arith.constant 5 : index
    %c0_49 = arith.constant 0 : index
    %c0_50 = arith.constant 0 : index
    %64 = vector.load %arg3[%c0_48, %c5, %c0_49, %c0_50] : memref<2x12x32x8xf32, #tpu.memory_space<vmem>>, vector<1x1x32x8xf32>
    %65 = vector.shape_cast %64 : vector<1x1x32x8xf32> to vector<32x8xf32>
    %cst_51 = arith.constant dense<0.000000e+00> : vector<16x8xf32>
    %66 = tpu.matmul %1, %65, %cst_51 {dimension_numbers = #tpu.dot_dimension_numbers<[1], [0], [0], [1], [0, 0, 1, 1], [], []>} : vector<16x32xf32>, vector<32x8xf32>, vector<16x8xf32> -> vector<16x8xf32>
    %cst_52 = arith.constant dense<0.000000e+00> : vector<16x16xf32>
    %67 = tpu.matmul %57, %63, %cst_52 {dimension_numbers = #tpu.dot_dimension_numbers<[1], [1], [0], [0], [0, 0, 1, 0], [], []>} : vector<16x8xf32>, vector<16x8xf32>, vector<16x16xf32> -> vector<16x16xf32>
    %68 = arith.addf %67, %4 : vector<16x16xf32>
    %cst_53 = arith.constant dense<0xFF800000> : vector<16xf32>
    %69 = vector.multi_reduction <maximumf>, %68, %cst_53 [1] : vector<16x16xf32> to vector<16xf32>
    %70 = vector.shape_cast %69 : vector<16xf32> to vector<16x1xf32>
    %71 = vector.broadcast %70 : vector<16x1xf32> to vector<16x16xf32>
    %72 = arith.subf %68, %71 : vector<16x16xf32>
    %73 = math.exp %72 : vector<16x16xf32>
    %cst_54 = arith.constant dense<0.000000e+00> : vector<16xf32>
    %74 = vector.multi_reduction <add>, %73, %cst_54 [1] : vector<16x16xf32> to vector<16xf32>
    %75 = vector.shape_cast %74 : vector<16xf32> to vector<16x1xf32>
    %76 = tpu.reciprocal %75 {approx = true} : vector<16x1xf32> -> vector<16x1xf32>
    %77 = vector.broadcast %76 : vector<16x1xf32> to vector<16x16xf32>
    %78 = arith.mulf %73, %77 : vector<16x16xf32>
    %cst_55 = arith.constant dense<0.000000e+00> : vector<16x8xf32>
    %79 = tpu.matmul %78, %66, %cst_55 {dimension_numbers = #tpu.dot_dimension_numbers<[1], [0], [0], [1], [0, 0, 1, 1], [], []>} : vector<16x16xf32>, vector<16x8xf32>, vector<16x8xf32> -> vector<16x8xf32>
    %c0_56 = arith.constant 0 : index
    %c1_57 = arith.constant 1 : index
    %c0_58 = arith.constant 0 : index
    %c0_59 = arith.constant 0 : index
    %80 = vector.load %arg4[%c0_56, %c1_57, %c0_58, %c0_59] : memref<2x4x8x32xf32, #tpu.memory_space<vmem>>, vector<1x1x8x32xf32>
    %81 = vector.shape_cast %80 : vector<1x1x8x32xf32> to vector<8x32xf32>
    %cst_60 = arith.constant dense<0.000000e+00> : vector<16x32xf32>
    %82 = tpu.matmul %79, %81, %cst_60 {dimension_numbers = #tpu.dot_dimension_numbers<[1], [0], [0], [1], [0, 0, 1, 1], [], []>} : vector<16x8xf32>, vector<8x32xf32>, vector<16x32xf32> -> vector<16x32xf32>
    %83 = arith.addf %49, %82 : vector<16x32xf32>
    %c0_61 = arith.constant 0 : index
    %c2_62 = arith.constant 2 : index
    %c0_63 = arith.constant 0 : index
    %c0_64 = arith.constant 0 : index
    %84 = vector.load %arg5[%c0_61, %c2_62, %c0_63, %c0_64] : memref<2x4x2x8xf32, #tpu.memory_space<vmem>>, vector<1x1x2x8xf32>
    %85 = vector.shape_cast %84 : vector<1x1x2x8xf32> to vector<2x8xf32>
    %c0_65 = arith.constant 0 : index
    %c6 = arith.constant 6 : index
    %c0_66 = arith.constant 0 : index
    %c0_67 = arith.constant 0 : index
    %86 = vector.load %arg3[%c0_65, %c6, %c0_66, %c0_67] : memref<2x12x32x8xf32, #tpu.memory_space<vmem>>, vector<1x1x32x8xf32>
    %87 = vector.shape_cast %86 : vector<1x1x32x8xf32> to vector<32x8xf32>
    %cst_68 = arith.constant dense<0.000000e+00> : vector<16x8xf32>
    %88 = tpu.matmul %14, %87, %cst_68 {dimension_numbers = #tpu.dot_dimension_numbers<[1], [0], [0], [1], [0, 0, 1, 1], [], []>} : vector<16x32xf32>, vector<32x8xf32>, vector<16x8xf32> -> vector<16x8xf32>
    %89 = vector.extract_strided_slice %85 {offsets = [0, 0], sizes = [1, 8], strides = [1, 1]} : vector<2x8xf32> to vector<1x8xf32>
    %90 = vector.broadcast %89 : vector<1x8xf32> to vector<16x8xf32>
    %91 = arith.addf %88, %90 : vector<16x8xf32>
    %c0_69 = arith.constant 0 : index
    %c7 = arith.constant 7 : index
    %c0_70 = arith.constant 0 : index
    %c0_71 = arith.constant 0 : index
    %92 = vector.load %arg3[%c0_69, %c7, %c0_70, %c0_71] : memref<2x12x32x8xf32, #tpu.memory_space<vmem>>, vector<1x1x32x8xf32>
    %93 = vector.shape_cast %92 : vector<1x1x32x8xf32> to vector<32x8xf32>
    %cst_72 = arith.constant dense<0.000000e+00> : vector<16x8xf32>
    %94 = tpu.matmul %14, %93, %cst_72 {dimension_numbers = #tpu.dot_dimension_numbers<[1], [0], [0], [1], [0, 0, 1, 1], [], []>} : vector<16x32xf32>, vector<32x8xf32>, vector<16x8xf32> -> vector<16x8xf32>
    %95 = vector.extract_strided_slice %85 {offsets = [1, 0], sizes = [1, 8], strides = [1, 1]} : vector<2x8xf32> to vector<1x8xf32>
    %96 = vector.broadcast %95 : vector<1x8xf32> to vector<16x8xf32>
    %97 = arith.addf %94, %96 : vector<16x8xf32>
    %c0_73 = arith.constant 0 : index
    %c8 = arith.constant 8 : index
    %c0_74 = arith.constant 0 : index
    %c0_75 = arith.constant 0 : index
    %98 = vector.load %arg3[%c0_73, %c8, %c0_74, %c0_75] : memref<2x12x32x8xf32, #tpu.memory_space<vmem>>, vector<1x1x32x8xf32>
    %99 = vector.shape_cast %98 : vector<1x1x32x8xf32> to vector<32x8xf32>
    %cst_76 = arith.constant dense<0.000000e+00> : vector<16x8xf32>
    %100 = tpu.matmul %1, %99, %cst_76 {dimension_numbers = #tpu.dot_dimension_numbers<[1], [0], [0], [1], [0, 0, 1, 1], [], []>} : vector<16x32xf32>, vector<32x8xf32>, vector<16x8xf32> -> vector<16x8xf32>
    %cst_77 = arith.constant dense<0.000000e+00> : vector<16x16xf32>
    %101 = tpu.matmul %91, %97, %cst_77 {dimension_numbers = #tpu.dot_dimension_numbers<[1], [1], [0], [0], [0, 0, 1, 0], [], []>} : vector<16x8xf32>, vector<16x8xf32>, vector<16x16xf32> -> vector<16x16xf32>
    %102 = arith.addf %101, %4 : vector<16x16xf32>
    %cst_78 = arith.constant dense<0xFF800000> : vector<16xf32>
    %103 = vector.multi_reduction <maximumf>, %102, %cst_78 [1] : vector<16x16xf32> to vector<16xf32>
    %104 = vector.shape_cast %103 : vector<16xf32> to vector<16x1xf32>
    %105 = vector.broadcast %104 : vector<16x1xf32> to vector<16x16xf32>
    %106 = arith.subf %102, %105 : vector<16x16xf32>
    %107 = math.exp %106 : vector<16x16xf32>
    %cst_79 = arith.constant dense<0.000000e+00> : vector<16xf32>
    %108 = vector.multi_reduction <add>, %107, %cst_79 [1] : vector<16x16xf32> to vector<16xf32>
    %109 = vector.shape_cast %108 : vector<16xf32> to vector<16x1xf32>
    %110 = tpu.reciprocal %109 {approx = true} : vector<16x1xf32> -> vector<16x1xf32>
    %111 = vector.broadcast %110 : vector<16x1xf32> to vector<16x16xf32>
    %112 = arith.mulf %107, %111 : vector<16x16xf32>
    %cst_80 = arith.constant dense<0.000000e+00> : vector<16x8xf32>
    %113 = tpu.matmul %112, %100, %cst_80 {dimension_numbers = #tpu.dot_dimension_numbers<[1], [0], [0], [1], [0, 0, 1, 1], [], []>} : vector<16x16xf32>, vector<16x8xf32>, vector<16x8xf32> -> vector<16x8xf32>
    %c0_81 = arith.constant 0 : index
    %c2_82 = arith.constant 2 : index
    %c0_83 = arith.constant 0 : index
    %c0_84 = arith.constant 0 : index
    %114 = vector.load %arg4[%c0_81, %c2_82, %c0_83, %c0_84] : memref<2x4x8x32xf32, #tpu.memory_space<vmem>>, vector<1x1x8x32xf32>
    %115 = vector.shape_cast %114 : vector<1x1x8x32xf32> to vector<8x32xf32>
    %cst_85 = arith.constant dense<0.000000e+00> : vector<16x32xf32>
    %116 = tpu.matmul %113, %115, %cst_85 {dimension_numbers = #tpu.dot_dimension_numbers<[1], [0], [0], [1], [0, 0, 1, 1], [], []>} : vector<16x8xf32>, vector<8x32xf32>, vector<16x32xf32> -> vector<16x32xf32>
    %117 = arith.addf %83, %116 : vector<16x32xf32>
    %c0_86 = arith.constant 0 : index
    %c3_87 = arith.constant 3 : index
    %c0_88 = arith.constant 0 : index
    %c0_89 = arith.constant 0 : index
    %118 = vector.load %arg5[%c0_86, %c3_87, %c0_88, %c0_89] : memref<2x4x2x8xf32, #tpu.memory_space<vmem>>, vector<1x1x2x8xf32>
    %119 = vector.shape_cast %118 : vector<1x1x2x8xf32> to vector<2x8xf32>
    %c0_90 = arith.constant 0 : index
    %c9 = arith.constant 9 : index
    %c0_91 = arith.constant 0 : index
    %c0_92 = arith.constant 0 : index
    %120 = vector.load %arg3[%c0_90, %c9, %c0_91, %c0_92] : memref<2x12x32x8xf32, #tpu.memory_space<vmem>>, vector<1x1x32x8xf32>
    %121 = vector.shape_cast %120 : vector<1x1x32x8xf32> to vector<32x8xf32>
    %cst_93 = arith.constant dense<0.000000e+00> : vector<16x8xf32>
    %122 = tpu.matmul %14, %121, %cst_93 {dimension_numbers = #tpu.dot_dimension_numbers<[1], [0], [0], [1], [0, 0, 1, 1], [], []>} : vector<16x32xf32>, vector<32x8xf32>, vector<16x8xf32> -> vector<16x8xf32>
    %123 = vector.extract_strided_slice %119 {offsets = [0, 0], sizes = [1, 8], strides = [1, 1]} : vector<2x8xf32> to vector<1x8xf32>
    %124 = vector.broadcast %123 : vector<1x8xf32> to vector<16x8xf32>
    %125 = arith.addf %122, %124 : vector<16x8xf32>
    %c0_94 = arith.constant 0 : index
    %c10 = arith.constant 10 : index
    %c0_95 = arith.constant 0 : index
    %c0_96 = arith.constant 0 : index
    %126 = vector.load %arg3[%c0_94, %c10, %c0_95, %c0_96] : memref<2x12x32x8xf32, #tpu.memory_space<vmem>>, vector<1x1x32x8xf32>
    %127 = vector.shape_cast %126 : vector<1x1x32x8xf32> to vector<32x8xf32>
    %cst_97 = arith.constant dense<0.000000e+00> : vector<16x8xf32>
    %128 = tpu.matmul %14, %127, %cst_97 {dimension_numbers = #tpu.dot_dimension_numbers<[1], [0], [0], [1], [0, 0, 1, 1], [], []>} : vector<16x32xf32>, vector<32x8xf32>, vector<16x8xf32> -> vector<16x8xf32>
    %129 = vector.extract_strided_slice %119 {offsets = [1, 0], sizes = [1, 8], strides = [1, 1]} : vector<2x8xf32> to vector<1x8xf32>
    %130 = vector.broadcast %129 : vector<1x8xf32> to vector<16x8xf32>
    %131 = arith.addf %128, %130 : vector<16x8xf32>
    %c0_98 = arith.constant 0 : index
    %c11 = arith.constant 11 : index
    %c0_99 = arith.constant 0 : index
    %c0_100 = arith.constant 0 : index
    %132 = vector.load %arg3[%c0_98, %c11, %c0_99, %c0_100] : memref<2x12x32x8xf32, #tpu.memory_space<vmem>>, vector<1x1x32x8xf32>
    %133 = vector.shape_cast %132 : vector<1x1x32x8xf32> to vector<32x8xf32>
    %cst_101 = arith.constant dense<0.000000e+00> : vector<16x8xf32>
    %134 = tpu.matmul %1, %133, %cst_101 {dimension_numbers = #tpu.dot_dimension_numbers<[1], [0], [0], [1], [0, 0, 1, 1], [], []>} : vector<16x32xf32>, vector<32x8xf32>, vector<16x8xf32> -> vector<16x8xf32>
    %cst_102 = arith.constant dense<0.000000e+00> : vector<16x16xf32>
    %135 = tpu.matmul %125, %131, %cst_102 {dimension_numbers = #tpu.dot_dimension_numbers<[1], [1], [0], [0], [0, 0, 1, 0], [], []>} : vector<16x8xf32>, vector<16x8xf32>, vector<16x16xf32> -> vector<16x16xf32>
    %136 = arith.addf %135, %4 : vector<16x16xf32>
    %cst_103 = arith.constant dense<0xFF800000> : vector<16xf32>
    %137 = vector.multi_reduction <maximumf>, %136, %cst_103 [1] : vector<16x16xf32> to vector<16xf32>
    %138 = vector.shape_cast %137 : vector<16xf32> to vector<16x1xf32>
    %139 = vector.broadcast %138 : vector<16x1xf32> to vector<16x16xf32>
    %140 = arith.subf %136, %139 : vector<16x16xf32>
    %141 = math.exp %140 : vector<16x16xf32>
    %cst_104 = arith.constant dense<0.000000e+00> : vector<16xf32>
    %142 = vector.multi_reduction <add>, %141, %cst_104 [1] : vector<16x16xf32> to vector<16xf32>
    %143 = vector.shape_cast %142 : vector<16xf32> to vector<16x1xf32>
    %144 = tpu.reciprocal %143 {approx = true} : vector<16x1xf32> -> vector<16x1xf32>
    %145 = vector.broadcast %144 : vector<16x1xf32> to vector<16x16xf32>
    %146 = arith.mulf %141, %145 : vector<16x16xf32>
    %cst_105 = arith.constant dense<0.000000e+00> : vector<16x8xf32>
    %147 = tpu.matmul %146, %134, %cst_105 {dimension_numbers = #tpu.dot_dimension_numbers<[1], [0], [0], [1], [0, 0, 1, 1], [], []>} : vector<16x16xf32>, vector<16x8xf32>, vector<16x8xf32> -> vector<16x8xf32>
    %c0_106 = arith.constant 0 : index
    %c3_107 = arith.constant 3 : index
    %c0_108 = arith.constant 0 : index
    %c0_109 = arith.constant 0 : index
    %148 = vector.load %arg4[%c0_106, %c3_107, %c0_108, %c0_109] : memref<2x4x8x32xf32, #tpu.memory_space<vmem>>, vector<1x1x8x32xf32>
    %149 = vector.shape_cast %148 : vector<1x1x8x32xf32> to vector<8x32xf32>
    %cst_110 = arith.constant dense<0.000000e+00> : vector<16x32xf32>
    %150 = tpu.matmul %147, %149, %cst_110 {dimension_numbers = #tpu.dot_dimension_numbers<[1], [0], [0], [1], [0, 0, 1, 1], [], []>} : vector<16x8xf32>, vector<8x32xf32>, vector<16x32xf32> -> vector<16x32xf32>
    %151 = arith.addf %117, %150 : vector<16x32xf32>
    %152 = vector.broadcast %7 : vector<1x32xf32> to vector<16x32xf32>
    %153 = arith.addf %151, %152 : vector<16x32xf32>
    %154 = arith.addf %1, %153 : vector<16x32xf32>
    %cst_111 = arith.constant dense<0.000000e+00> : vector<16xf32>
    %155 = vector.multi_reduction <add>, %154, %cst_111 [1] : vector<16x32xf32> to vector<16xf32>
    %156 = vector.shape_cast %155 : vector<16xf32> to vector<16x1xf32>
    %cst_112 = arith.constant 3.200000e+01 : f32
    %157 = vector.broadcast %cst_112 : f32 to vector<16x1xf32>
    %158 = arith.divf %156, %157 : vector<16x1xf32>
    %159 = vector.broadcast %158 : vector<16x1xf32> to vector<16x32xf32>
    %160 = arith.subf %154, %159 : vector<16x32xf32>
    %161 = arith.mulf %160, %160 : vector<16x32xf32>
    %cst_113 = arith.constant dense<0.000000e+00> : vector<16xf32>
    %162 = vector.multi_reduction <add>, %161, %cst_113 [1] : vector<16x32xf32> to vector<16xf32>
    %163 = vector.shape_cast %162 : vector<16xf32> to vector<16x1xf32>
    %cst_114 = arith.constant 3.200000e+01 : f32
    %164 = vector.broadcast %cst_114 : f32 to vector<16x1xf32>
    %165 = arith.divf %163, %164 : vector<16x1xf32>
    %166 = vector.broadcast %158 : vector<16x1xf32> to vector<16x32xf32>
    %167 = arith.subf %154, %166 : vector<16x32xf32>
    %cst_115 = arith.constant 9.99999974E-6 : f32
    %168 = vector.broadcast %cst_115 : f32 to vector<16x1xf32>
    %169 = arith.addf %165, %168 : vector<16x1xf32>
    %170 = math.rsqrt %169 : vector<16x1xf32>
    %171 = vector.broadcast %170 : vector<16x1xf32> to vector<16x32xf32>
    %172 = arith.mulf %167, %171 : vector<16x32xf32>
    %173 = vector.broadcast %8 : vector<1x32xf32> to vector<16x32xf32>
    %174 = arith.mulf %172, %173 : vector<16x32xf32>
    %175 = vector.broadcast %9 : vector<1x32xf32> to vector<16x32xf32>
    %176 = arith.addf %174, %175 : vector<16x32xf32>
    %c0_116 = arith.constant 0 : index
    %c0_117 = arith.constant 0 : index
    %c0_118 = arith.constant 0 : index
    %177 = vector.load %arg6[%c0_116, %c0_117, %c0_118] : memref<2x32x64xf32, #tpu.memory_space<vmem>>, vector<1x32x64xf32>
    %178 = vector.shape_cast %177 : vector<1x32x64xf32> to vector<32x64xf32>
    %cst_119 = arith.constant dense<0.000000e+00> : vector<16x64xf32>
    %179 = tpu.matmul %176, %178, %cst_119 {dimension_numbers = #tpu.dot_dimension_numbers<[1], [0], [0], [1], [0, 0, 1, 1], [], []>} : vector<16x32xf32>, vector<32x64xf32>, vector<16x64xf32> -> vector<16x64xf32>
    %180 = vector.broadcast %13 : vector<1x64xf32> to vector<16x64xf32>
    %181 = arith.addf %179, %180 : vector<16x64xf32>
    %cst_120 = arith.constant 0.000000e+00 : f32
    %182 = vector.broadcast %cst_120 : f32 to vector<16x64xf32>
    %183 = arith.maximumf %181, %182 : vector<16x64xf32>
    %c0_121 = arith.constant 0 : index
    %c0_122 = arith.constant 0 : index
    %c0_123 = arith.constant 0 : index
    %184 = vector.load %arg7[%c0_121, %c0_122, %c0_123] : memref<2x64x32xf32, #tpu.memory_space<vmem>>, vector<1x64x32xf32>
    %185 = vector.shape_cast %184 : vector<1x64x32xf32> to vector<64x32xf32>
    %cst_124 = arith.constant dense<0.000000e+00> : vector<16x32xf32>
    %186 = tpu.matmul %183, %185, %cst_124 {dimension_numbers = #tpu.dot_dimension_numbers<[1], [0], [0], [1], [0, 0, 1, 1], [], []>} : vector<16x64xf32>, vector<64x32xf32>, vector<16x32xf32> -> vector<16x32xf32>
    %187 = vector.broadcast %10 : vector<1x32xf32> to vector<16x32xf32>
    %188 = arith.addf %186, %187 : vector<16x32xf32>
    %189 = arith.addf %176, %188 : vector<16x32xf32>
    %cst_125 = arith.constant dense<0.000000e+00> : vector<16xf32>
    %190 = vector.multi_reduction <add>, %189, %cst_125 [1] : vector<16x32xf32> to vector<16xf32>
    %191 = vector.shape_cast %190 : vector<16xf32> to vector<16x1xf32>
    %cst_126 = arith.constant 3.200000e+01 : f32
    %192 = vector.broadcast %cst_126 : f32 to vector<16x1xf32>
    %193 = arith.divf %191, %192 : vector<16x1xf32>
    %194 = vector.broadcast %193 : vector<16x1xf32> to vector<16x32xf32>
    %195 = arith.subf %189, %194 : vector<16x32xf32>
    %196 = arith.mulf %195, %195 : vector<16x32xf32>
    %cst_127 = arith.constant dense<0.000000e+00> : vector<16xf32>
    %197 = vector.multi_reduction <add>, %196, %cst_127 [1] : vector<16x32xf32> to vector<16xf32>
    %198 = vector.shape_cast %197 : vector<16xf32> to vector<16x1xf32>
    %cst_128 = arith.constant 3.200000e+01 : f32
    %199 = vector.broadcast %cst_128 : f32 to vector<16x1xf32>
    %200 = arith.divf %198, %199 : vector<16x1xf32>
    %201 = vector.broadcast %193 : vector<16x1xf32> to vector<16x32xf32>
    %202 = arith.subf %189, %201 : vector<16x32xf32>
    %cst_129 = arith.constant 9.99999974E-6 : f32
    %203 = vector.broadcast %cst_129 : f32 to vector<16x1xf32>
    %204 = arith.addf %200, %203 : vector<16x1xf32>
    %205 = math.rsqrt %204 : vector<16x1xf32>
    %206 = vector.broadcast %205 : vector<16x1xf32> to vector<16x32xf32>
    %207 = arith.mulf %202, %206 : vector<16x32xf32>
    %208 = vector.broadcast %11 : vector<1x32xf32> to vector<16x32xf32>
    %209 = arith.mulf %207, %208 : vector<16x32xf32>
    %210 = vector.broadcast %12 : vector<1x32xf32> to vector<16x32xf32>
    %211 = arith.addf %209, %210 : vector<16x32xf32>
    %c1_130 = arith.constant 1 : index
    %c0_131 = arith.constant 0 : index
    %c0_132 = arith.constant 0 : index
    %212 = vector.load %arg8[%c1_130, %c0_131, %c0_132] : memref<2x7x64xf32, #tpu.memory_space<vmem>>, vector<1x7x64xf32>
    %213 = vector.shape_cast %212 : vector<1x7x64xf32> to vector<7x64xf32>
    %214 = vector.extract_strided_slice %213 {offsets = [0, 0], sizes = [1, 32], strides = [1, 1]} : vector<7x64xf32> to vector<1x32xf32>
    %215 = vector.extract_strided_slice %213 {offsets = [1, 0], sizes = [1, 32], strides = [1, 1]} : vector<7x64xf32> to vector<1x32xf32>
    %216 = vector.extract_strided_slice %213 {offsets = [2, 0], sizes = [1, 32], strides = [1, 1]} : vector<7x64xf32> to vector<1x32xf32>
    %217 = vector.extract_strided_slice %213 {offsets = [3, 0], sizes = [1, 32], strides = [1, 1]} : vector<7x64xf32> to vector<1x32xf32>
    %218 = vector.extract_strided_slice %213 {offsets = [4, 0], sizes = [1, 32], strides = [1, 1]} : vector<7x64xf32> to vector<1x32xf32>
    %219 = vector.extract_strided_slice %213 {offsets = [5, 0], sizes = [1, 32], strides = [1, 1]} : vector<7x64xf32> to vector<1x32xf32>
    %220 = vector.extract_strided_slice %213 {offsets = [6, 0], sizes = [1, 64], strides = [1, 1]} : vector<7x64xf32> to vector<1x64xf32>
    %221 = arith.addf %211, %3 : vector<16x32xf32>
    %cst_133 = arith.constant 0.000000e+00 : f32
    %222 = vector.broadcast %cst_133 : f32 to vector<16x32xf32>
    %c1_134 = arith.constant 1 : index
    %c0_135 = arith.constant 0 : index
    %c0_136 = arith.constant 0 : index
    %c0_137 = arith.constant 0 : index
    %223 = vector.load %arg5[%c1_134, %c0_135, %c0_136, %c0_137] : memref<2x4x2x8xf32, #tpu.memory_space<vmem>>, vector<1x1x2x8xf32>
    %224 = vector.shape_cast %223 : vector<1x1x2x8xf32> to vector<2x8xf32>
    %c1_138 = arith.constant 1 : index
    %c0_139 = arith.constant 0 : index
    %c0_140 = arith.constant 0 : index
    %c0_141 = arith.constant 0 : index
    %225 = vector.load %arg3[%c1_138, %c0_139, %c0_140, %c0_141] : memref<2x12x32x8xf32, #tpu.memory_space<vmem>>, vector<1x1x32x8xf32>
    %226 = vector.shape_cast %225 : vector<1x1x32x8xf32> to vector<32x8xf32>
    %cst_142 = arith.constant dense<0.000000e+00> : vector<16x8xf32>
    %227 = tpu.matmul %221, %226, %cst_142 {dimension_numbers = #tpu.dot_dimension_numbers<[1], [0], [0], [1], [0, 0, 1, 1], [], []>} : vector<16x32xf32>, vector<32x8xf32>, vector<16x8xf32> -> vector<16x8xf32>
    %228 = vector.extract_strided_slice %224 {offsets = [0, 0], sizes = [1, 8], strides = [1, 1]} : vector<2x8xf32> to vector<1x8xf32>
    %229 = vector.broadcast %228 : vector<1x8xf32> to vector<16x8xf32>
    %230 = arith.addf %227, %229 : vector<16x8xf32>
    %c1_143 = arith.constant 1 : index
    %c1_144 = arith.constant 1 : index
    %c0_145 = arith.constant 0 : index
    %c0_146 = arith.constant 0 : index
    %231 = vector.load %arg3[%c1_143, %c1_144, %c0_145, %c0_146] : memref<2x12x32x8xf32, #tpu.memory_space<vmem>>, vector<1x1x32x8xf32>
    %232 = vector.shape_cast %231 : vector<1x1x32x8xf32> to vector<32x8xf32>
    %cst_147 = arith.constant dense<0.000000e+00> : vector<16x8xf32>
    %233 = tpu.matmul %221, %232, %cst_147 {dimension_numbers = #tpu.dot_dimension_numbers<[1], [0], [0], [1], [0, 0, 1, 1], [], []>} : vector<16x32xf32>, vector<32x8xf32>, vector<16x8xf32> -> vector<16x8xf32>
    %234 = vector.extract_strided_slice %224 {offsets = [1, 0], sizes = [1, 8], strides = [1, 1]} : vector<2x8xf32> to vector<1x8xf32>
    %235 = vector.broadcast %234 : vector<1x8xf32> to vector<16x8xf32>
    %236 = arith.addf %233, %235 : vector<16x8xf32>
    %c1_148 = arith.constant 1 : index
    %c2_149 = arith.constant 2 : index
    %c0_150 = arith.constant 0 : index
    %c0_151 = arith.constant 0 : index
    %237 = vector.load %arg3[%c1_148, %c2_149, %c0_150, %c0_151] : memref<2x12x32x8xf32, #tpu.memory_space<vmem>>, vector<1x1x32x8xf32>
    %238 = vector.shape_cast %237 : vector<1x1x32x8xf32> to vector<32x8xf32>
    %cst_152 = arith.constant dense<0.000000e+00> : vector<16x8xf32>
    %239 = tpu.matmul %211, %238, %cst_152 {dimension_numbers = #tpu.dot_dimension_numbers<[1], [0], [0], [1], [0, 0, 1, 1], [], []>} : vector<16x32xf32>, vector<32x8xf32>, vector<16x8xf32> -> vector<16x8xf32>
    %cst_153 = arith.constant dense<0.000000e+00> : vector<16x16xf32>
    %240 = tpu.matmul %230, %236, %cst_153 {dimension_numbers = #tpu.dot_dimension_numbers<[1], [1], [0], [0], [0, 0, 1, 0], [], []>} : vector<16x8xf32>, vector<16x8xf32>, vector<16x16xf32> -> vector<16x16xf32>
    %241 = arith.addf %240, %4 : vector<16x16xf32>
    %cst_154 = arith.constant dense<0xFF800000> : vector<16xf32>
    %242 = vector.multi_reduction <maximumf>, %241, %cst_154 [1] : vector<16x16xf32> to vector<16xf32>
    %243 = vector.shape_cast %242 : vector<16xf32> to vector<16x1xf32>
    %244 = vector.broadcast %243 : vector<16x1xf32> to vector<16x16xf32>
    %245 = arith.subf %241, %244 : vector<16x16xf32>
    %246 = math.exp %245 : vector<16x16xf32>
    %cst_155 = arith.constant dense<0.000000e+00> : vector<16xf32>
    %247 = vector.multi_reduction <add>, %246, %cst_155 [1] : vector<16x16xf32> to vector<16xf32>
    %248 = vector.shape_cast %247 : vector<16xf32> to vector<16x1xf32>
    %249 = tpu.reciprocal %248 {approx = true} : vector<16x1xf32> -> vector<16x1xf32>
    %250 = vector.broadcast %249 : vector<16x1xf32> to vector<16x16xf32>
    %251 = arith.mulf %246, %250 : vector<16x16xf32>
    %cst_156 = arith.constant dense<0.000000e+00> : vector<16x8xf32>
    %252 = tpu.matmul %251, %239, %cst_156 {dimension_numbers = #tpu.dot_dimension_numbers<[1], [0], [0], [1], [0, 0, 1, 1], [], []>} : vector<16x16xf32>, vector<16x8xf32>, vector<16x8xf32> -> vector<16x8xf32>
    %c1_157 = arith.constant 1 : index
    %c0_158 = arith.constant 0 : index
    %c0_159 = arith.constant 0 : index
    %c0_160 = arith.constant 0 : index
    %253 = vector.load %arg4[%c1_157, %c0_158, %c0_159, %c0_160] : memref<2x4x8x32xf32, #tpu.memory_space<vmem>>, vector<1x1x8x32xf32>
    %254 = vector.shape_cast %253 : vector<1x1x8x32xf32> to vector<8x32xf32>
    %cst_161 = arith.constant dense<0.000000e+00> : vector<16x32xf32>
    %255 = tpu.matmul %252, %254, %cst_161 {dimension_numbers = #tpu.dot_dimension_numbers<[1], [0], [0], [1], [0, 0, 1, 1], [], []>} : vector<16x8xf32>, vector<8x32xf32>, vector<16x32xf32> -> vector<16x32xf32>
    %256 = arith.addf %222, %255 : vector<16x32xf32>
    %c1_162 = arith.constant 1 : index
    %c1_163 = arith.constant 1 : index
    %c0_164 = arith.constant 0 : index
    %c0_165 = arith.constant 0 : index
    %257 = vector.load %arg5[%c1_162, %c1_163, %c0_164, %c0_165] : memref<2x4x2x8xf32, #tpu.memory_space<vmem>>, vector<1x1x2x8xf32>
    %258 = vector.shape_cast %257 : vector<1x1x2x8xf32> to vector<2x8xf32>
    %c1_166 = arith.constant 1 : index
    %c3_167 = arith.constant 3 : index
    %c0_168 = arith.constant 0 : index
    %c0_169 = arith.constant 0 : index
    %259 = vector.load %arg3[%c1_166, %c3_167, %c0_168, %c0_169] : memref<2x12x32x8xf32, #tpu.memory_space<vmem>>, vector<1x1x32x8xf32>
    %260 = vector.shape_cast %259 : vector<1x1x32x8xf32> to vector<32x8xf32>
    %cst_170 = arith.constant dense<0.000000e+00> : vector<16x8xf32>
    %261 = tpu.matmul %221, %260, %cst_170 {dimension_numbers = #tpu.dot_dimension_numbers<[1], [0], [0], [1], [0, 0, 1, 1], [], []>} : vector<16x32xf32>, vector<32x8xf32>, vector<16x8xf32> -> vector<16x8xf32>
    %262 = vector.extract_strided_slice %258 {offsets = [0, 0], sizes = [1, 8], strides = [1, 1]} : vector<2x8xf32> to vector<1x8xf32>
    %263 = vector.broadcast %262 : vector<1x8xf32> to vector<16x8xf32>
    %264 = arith.addf %261, %263 : vector<16x8xf32>
    %c1_171 = arith.constant 1 : index
    %c4_172 = arith.constant 4 : index
    %c0_173 = arith.constant 0 : index
    %c0_174 = arith.constant 0 : index
    %265 = vector.load %arg3[%c1_171, %c4_172, %c0_173, %c0_174] : memref<2x12x32x8xf32, #tpu.memory_space<vmem>>, vector<1x1x32x8xf32>
    %266 = vector.shape_cast %265 : vector<1x1x32x8xf32> to vector<32x8xf32>
    %cst_175 = arith.constant dense<0.000000e+00> : vector<16x8xf32>
    %267 = tpu.matmul %221, %266, %cst_175 {dimension_numbers = #tpu.dot_dimension_numbers<[1], [0], [0], [1], [0, 0, 1, 1], [], []>} : vector<16x32xf32>, vector<32x8xf32>, vector<16x8xf32> -> vector<16x8xf32>
    %268 = vector.extract_strided_slice %258 {offsets = [1, 0], sizes = [1, 8], strides = [1, 1]} : vector<2x8xf32> to vector<1x8xf32>
    %269 = vector.broadcast %268 : vector<1x8xf32> to vector<16x8xf32>
    %270 = arith.addf %267, %269 : vector<16x8xf32>
    %c1_176 = arith.constant 1 : index
    %c5_177 = arith.constant 5 : index
    %c0_178 = arith.constant 0 : index
    %c0_179 = arith.constant 0 : index
    %271 = vector.load %arg3[%c1_176, %c5_177, %c0_178, %c0_179] : memref<2x12x32x8xf32, #tpu.memory_space<vmem>>, vector<1x1x32x8xf32>
    %272 = vector.shape_cast %271 : vector<1x1x32x8xf32> to vector<32x8xf32>
    %cst_180 = arith.constant dense<0.000000e+00> : vector<16x8xf32>
    %273 = tpu.matmul %211, %272, %cst_180 {dimension_numbers = #tpu.dot_dimension_numbers<[1], [0], [0], [1], [0, 0, 1, 1], [], []>} : vector<16x32xf32>, vector<32x8xf32>, vector<16x8xf32> -> vector<16x8xf32>
    %cst_181 = arith.constant dense<0.000000e+00> : vector<16x16xf32>
    %274 = tpu.matmul %264, %270, %cst_181 {dimension_numbers = #tpu.dot_dimension_numbers<[1], [1], [0], [0], [0, 0, 1, 0], [], []>} : vector<16x8xf32>, vector<16x8xf32>, vector<16x16xf32> -> vector<16x16xf32>
    %275 = arith.addf %274, %4 : vector<16x16xf32>
    %cst_182 = arith.constant dense<0xFF800000> : vector<16xf32>
    %276 = vector.multi_reduction <maximumf>, %275, %cst_182 [1] : vector<16x16xf32> to vector<16xf32>
    %277 = vector.shape_cast %276 : vector<16xf32> to vector<16x1xf32>
    %278 = vector.broadcast %277 : vector<16x1xf32> to vector<16x16xf32>
    %279 = arith.subf %275, %278 : vector<16x16xf32>
    %280 = math.exp %279 : vector<16x16xf32>
    %cst_183 = arith.constant dense<0.000000e+00> : vector<16xf32>
    %281 = vector.multi_reduction <add>, %280, %cst_183 [1] : vector<16x16xf32> to vector<16xf32>
    %282 = vector.shape_cast %281 : vector<16xf32> to vector<16x1xf32>
    %283 = tpu.reciprocal %282 {approx = true} : vector<16x1xf32> -> vector<16x1xf32>
    %284 = vector.broadcast %283 : vector<16x1xf32> to vector<16x16xf32>
    %285 = arith.mulf %280, %284 : vector<16x16xf32>
    %cst_184 = arith.constant dense<0.000000e+00> : vector<16x8xf32>
    %286 = tpu.matmul %285, %273, %cst_184 {dimension_numbers = #tpu.dot_dimension_numbers<[1], [0], [0], [1], [0, 0, 1, 1], [], []>} : vector<16x16xf32>, vector<16x8xf32>, vector<16x8xf32> -> vector<16x8xf32>
    %c1_185 = arith.constant 1 : index
    %c1_186 = arith.constant 1 : index
    %c0_187 = arith.constant 0 : index
    %c0_188 = arith.constant 0 : index
    %287 = vector.load %arg4[%c1_185, %c1_186, %c0_187, %c0_188] : memref<2x4x8x32xf32, #tpu.memory_space<vmem>>, vector<1x1x8x32xf32>
    %288 = vector.shape_cast %287 : vector<1x1x8x32xf32> to vector<8x32xf32>
    %cst_189 = arith.constant dense<0.000000e+00> : vector<16x32xf32>
    %289 = tpu.matmul %286, %288, %cst_189 {dimension_numbers = #tpu.dot_dimension_numbers<[1], [0], [0], [1], [0, 0, 1, 1], [], []>} : vector<16x8xf32>, vector<8x32xf32>, vector<16x32xf32> -> vector<16x32xf32>
    %290 = arith.addf %256, %289 : vector<16x32xf32>
    %c1_190 = arith.constant 1 : index
    %c2_191 = arith.constant 2 : index
    %c0_192 = arith.constant 0 : index
    %c0_193 = arith.constant 0 : index
    %291 = vector.load %arg5[%c1_190, %c2_191, %c0_192, %c0_193] : memref<2x4x2x8xf32, #tpu.memory_space<vmem>>, vector<1x1x2x8xf32>
    %292 = vector.shape_cast %291 : vector<1x1x2x8xf32> to vector<2x8xf32>
    %c1_194 = arith.constant 1 : index
    %c6_195 = arith.constant 6 : index
    %c0_196 = arith.constant 0 : index
    %c0_197 = arith.constant 0 : index
    %293 = vector.load %arg3[%c1_194, %c6_195, %c0_196, %c0_197] : memref<2x12x32x8xf32, #tpu.memory_space<vmem>>, vector<1x1x32x8xf32>
    %294 = vector.shape_cast %293 : vector<1x1x32x8xf32> to vector<32x8xf32>
    %cst_198 = arith.constant dense<0.000000e+00> : vector<16x8xf32>
    %295 = tpu.matmul %221, %294, %cst_198 {dimension_numbers = #tpu.dot_dimension_numbers<[1], [0], [0], [1], [0, 0, 1, 1], [], []>} : vector<16x32xf32>, vector<32x8xf32>, vector<16x8xf32> -> vector<16x8xf32>
    %296 = vector.extract_strided_slice %292 {offsets = [0, 0], sizes = [1, 8], strides = [1, 1]} : vector<2x8xf32> to vector<1x8xf32>
    %297 = vector.broadcast %296 : vector<1x8xf32> to vector<16x8xf32>
    %298 = arith.addf %295, %297 : vector<16x8xf32>
    %c1_199 = arith.constant 1 : index
    %c7_200 = arith.constant 7 : index
    %c0_201 = arith.constant 0 : index
    %c0_202 = arith.constant 0 : index
    %299 = vector.load %arg3[%c1_199, %c7_200, %c0_201, %c0_202] : memref<2x12x32x8xf32, #tpu.memory_space<vmem>>, vector<1x1x32x8xf32>
    %300 = vector.shape_cast %299 : vector<1x1x32x8xf32> to vector<32x8xf32>
    %cst_203 = arith.constant dense<0.000000e+00> : vector<16x8xf32>
    %301 = tpu.matmul %221, %300, %cst_203 {dimension_numbers = #tpu.dot_dimension_numbers<[1], [0], [0], [1], [0, 0, 1, 1], [], []>} : vector<16x32xf32>, vector<32x8xf32>, vector<16x8xf32> -> vector<16x8xf32>
    %302 = vector.extract_strided_slice %292 {offsets = [1, 0], sizes = [1, 8], strides = [1, 1]} : vector<2x8xf32> to vector<1x8xf32>
    %303 = vector.broadcast %302 : vector<1x8xf32> to vector<16x8xf32>
    %304 = arith.addf %301, %303 : vector<16x8xf32>
    %c1_204 = arith.constant 1 : index
    %c8_205 = arith.constant 8 : index
    %c0_206 = arith.constant 0 : index
    %c0_207 = arith.constant 0 : index
    %305 = vector.load %arg3[%c1_204, %c8_205, %c0_206, %c0_207] : memref<2x12x32x8xf32, #tpu.memory_space<vmem>>, vector<1x1x32x8xf32>
    %306 = vector.shape_cast %305 : vector<1x1x32x8xf32> to vector<32x8xf32>
    %cst_208 = arith.constant dense<0.000000e+00> : vector<16x8xf32>
    %307 = tpu.matmul %211, %306, %cst_208 {dimension_numbers = #tpu.dot_dimension_numbers<[1], [0], [0], [1], [0, 0, 1, 1], [], []>} : vector<16x32xf32>, vector<32x8xf32>, vector<16x8xf32> -> vector<16x8xf32>
    %cst_209 = arith.constant dense<0.000000e+00> : vector<16x16xf32>
    %308 = tpu.matmul %298, %304, %cst_209 {dimension_numbers = #tpu.dot_dimension_numbers<[1], [1], [0], [0], [0, 0, 1, 0], [], []>} : vector<16x8xf32>, vector<16x8xf32>, vector<16x16xf32> -> vector<16x16xf32>
    %309 = arith.addf %308, %4 : vector<16x16xf32>
    %cst_210 = arith.constant dense<0xFF800000> : vector<16xf32>
    %310 = vector.multi_reduction <maximumf>, %309, %cst_210 [1] : vector<16x16xf32> to vector<16xf32>
    %311 = vector.shape_cast %310 : vector<16xf32> to vector<16x1xf32>
    %312 = vector.broadcast %311 : vector<16x1xf32> to vector<16x16xf32>
    %313 = arith.subf %309, %312 : vector<16x16xf32>
    %314 = math.exp %313 : vector<16x16xf32>
    %cst_211 = arith.constant dense<0.000000e+00> : vector<16xf32>
    %315 = vector.multi_reduction <add>, %314, %cst_211 [1] : vector<16x16xf32> to vector<16xf32>
    %316 = vector.shape_cast %315 : vector<16xf32> to vector<16x1xf32>
    %317 = tpu.reciprocal %316 {approx = true} : vector<16x1xf32> -> vector<16x1xf32>
    %318 = vector.broadcast %317 : vector<16x1xf32> to vector<16x16xf32>
    %319 = arith.mulf %314, %318 : vector<16x16xf32>
    %cst_212 = arith.constant dense<0.000000e+00> : vector<16x8xf32>
    %320 = tpu.matmul %319, %307, %cst_212 {dimension_numbers = #tpu.dot_dimension_numbers<[1], [0], [0], [1], [0, 0, 1, 1], [], []>} : vector<16x16xf32>, vector<16x8xf32>, vector<16x8xf32> -> vector<16x8xf32>
    %c1_213 = arith.constant 1 : index
    %c2_214 = arith.constant 2 : index
    %c0_215 = arith.constant 0 : index
    %c0_216 = arith.constant 0 : index
    %321 = vector.load %arg4[%c1_213, %c2_214, %c0_215, %c0_216] : memref<2x4x8x32xf32, #tpu.memory_space<vmem>>, vector<1x1x8x32xf32>
    %322 = vector.shape_cast %321 : vector<1x1x8x32xf32> to vector<8x32xf32>
    %cst_217 = arith.constant dense<0.000000e+00> : vector<16x32xf32>
    %323 = tpu.matmul %320, %322, %cst_217 {dimension_numbers = #tpu.dot_dimension_numbers<[1], [0], [0], [1], [0, 0, 1, 1], [], []>} : vector<16x8xf32>, vector<8x32xf32>, vector<16x32xf32> -> vector<16x32xf32>
    %324 = arith.addf %290, %323 : vector<16x32xf32>
    %c1_218 = arith.constant 1 : index
    %c3_219 = arith.constant 3 : index
    %c0_220 = arith.constant 0 : index
    %c0_221 = arith.constant 0 : index
    %325 = vector.load %arg5[%c1_218, %c3_219, %c0_220, %c0_221] : memref<2x4x2x8xf32, #tpu.memory_space<vmem>>, vector<1x1x2x8xf32>
    %326 = vector.shape_cast %325 : vector<1x1x2x8xf32> to vector<2x8xf32>
    %c1_222 = arith.constant 1 : index
    %c9_223 = arith.constant 9 : index
    %c0_224 = arith.constant 0 : index
    %c0_225 = arith.constant 0 : index
    %327 = vector.load %arg3[%c1_222, %c9_223, %c0_224, %c0_225] : memref<2x12x32x8xf32, #tpu.memory_space<vmem>>, vector<1x1x32x8xf32>
    %328 = vector.shape_cast %327 : vector<1x1x32x8xf32> to vector<32x8xf32>
    %cst_226 = arith.constant dense<0.000000e+00> : vector<16x8xf32>
    %329 = tpu.matmul %221, %328, %cst_226 {dimension_numbers = #tpu.dot_dimension_numbers<[1], [0], [0], [1], [0, 0, 1, 1], [], []>} : vector<16x32xf32>, vector<32x8xf32>, vector<16x8xf32> -> vector<16x8xf32>
    %330 = vector.extract_strided_slice %326 {offsets = [0, 0], sizes = [1, 8], strides = [1, 1]} : vector<2x8xf32> to vector<1x8xf32>
    %331 = vector.broadcast %330 : vector<1x8xf32> to vector<16x8xf32>
    %332 = arith.addf %329, %331 : vector<16x8xf32>
    %c1_227 = arith.constant 1 : index
    %c10_228 = arith.constant 10 : index
    %c0_229 = arith.constant 0 : index
    %c0_230 = arith.constant 0 : index
    %333 = vector.load %arg3[%c1_227, %c10_228, %c0_229, %c0_230] : memref<2x12x32x8xf32, #tpu.memory_space<vmem>>, vector<1x1x32x8xf32>
    %334 = vector.shape_cast %333 : vector<1x1x32x8xf32> to vector<32x8xf32>
    %cst_231 = arith.constant dense<0.000000e+00> : vector<16x8xf32>
    %335 = tpu.matmul %221, %334, %cst_231 {dimension_numbers = #tpu.dot_dimension_numbers<[1], [0], [0], [1], [0, 0, 1, 1], [], []>} : vector<16x32xf32>, vector<32x8xf32>, vector<16x8xf32> -> vector<16x8xf32>
    %336 = vector.extract_strided_slice %326 {offsets = [1, 0], sizes = [1, 8], strides = [1, 1]} : vector<2x8xf32> to vector<1x8xf32>
    %337 = vector.broadcast %336 : vector<1x8xf32> to vector<16x8xf32>
    %338 = arith.addf %335, %337 : vector<16x8xf32>
    %c1_232 = arith.constant 1 : index
    %c11_233 = arith.constant 11 : index
    %c0_234 = arith.constant 0 : index
    %c0_235 = arith.constant 0 : index
    %339 = vector.load %arg3[%c1_232, %c11_233, %c0_234, %c0_235] : memref<2x12x32x8xf32, #tpu.memory_space<vmem>>, vector<1x1x32x8xf32>
    %340 = vector.shape_cast %339 : vector<1x1x32x8xf32> to vector<32x8xf32>
    %cst_236 = arith.constant dense<0.000000e+00> : vector<16x8xf32>
    %341 = tpu.matmul %211, %340, %cst_236 {dimension_numbers = #tpu.dot_dimension_numbers<[1], [0], [0], [1], [0, 0, 1, 1], [], []>} : vector<16x32xf32>, vector<32x8xf32>, vector<16x8xf32> -> vector<16x8xf32>
    %cst_237 = arith.constant dense<0.000000e+00> : vector<16x16xf32>
    %342 = tpu.matmul %332, %338, %cst_237 {dimension_numbers = #tpu.dot_dimension_numbers<[1], [1], [0], [0], [0, 0, 1, 0], [], []>} : vector<16x8xf32>, vector<16x8xf32>, vector<16x16xf32> -> vector<16x16xf32>
    %343 = arith.addf %342, %4 : vector<16x16xf32>
    %cst_238 = arith.constant dense<0xFF800000> : vector<16xf32>
    %344 = vector.multi_reduction <maximumf>, %343, %cst_238 [1] : vector<16x16xf32> to vector<16xf32>
    %345 = vector.shape_cast %344 : vector<16xf32> to vector<16x1xf32>
    %346 = vector.broadcast %345 : vector<16x1xf32> to vector<16x16xf32>
    %347 = arith.subf %343, %346 : vector<16x16xf32>
    %348 = math.exp %347 : vector<16x16xf32>
    %cst_239 = arith.constant dense<0.000000e+00> : vector<16xf32>
    %349 = vector.multi_reduction <add>, %348, %cst_239 [1] : vector<16x16xf32> to vector<16xf32>
    %350 = vector.shape_cast %349 : vector<16xf32> to vector<16x1xf32>
    %351 = tpu.reciprocal %350 {approx = true} : vector<16x1xf32> -> vector<16x1xf32>
    %352 = vector.broadcast %351 : vector<16x1xf32> to vector<16x16xf32>
    %353 = arith.mulf %348, %352 : vector<16x16xf32>
    %cst_240 = arith.constant dense<0.000000e+00> : vector<16x8xf32>
    %354 = tpu.matmul %353, %341, %cst_240 {dimension_numbers = #tpu.dot_dimension_numbers<[1], [0], [0], [1], [0, 0, 1, 1], [], []>} : vector<16x16xf32>, vector<16x8xf32>, vector<16x8xf32> -> vector<16x8xf32>
    %c1_241 = arith.constant 1 : index
    %c3_242 = arith.constant 3 : index
    %c0_243 = arith.constant 0 : index
    %c0_244 = arith.constant 0 : index
    %355 = vector.load %arg4[%c1_241, %c3_242, %c0_243, %c0_244] : memref<2x4x8x32xf32, #tpu.memory_space<vmem>>, vector<1x1x8x32xf32>
    %356 = vector.shape_cast %355 : vector<1x1x8x32xf32> to vector<8x32xf32>
    %cst_245 = arith.constant dense<0.000000e+00> : vector<16x32xf32>
    %357 = tpu.matmul %354, %356, %cst_245 {dimension_numbers = #tpu.dot_dimension_numbers<[1], [0], [0], [1], [0, 0, 1, 1], [], []>} : vector<16x8xf32>, vector<8x32xf32>, vector<16x32xf32> -> vector<16x32xf32>
    %358 = arith.addf %324, %357 : vector<16x32xf32>
    %359 = vector.broadcast %214 : vector<1x32xf32> to vector<16x32xf32>
    %360 = arith.addf %358, %359 : vector<16x32xf32>
    %361 = arith.addf %211, %360 : vector<16x32xf32>
    %cst_246 = arith.constant dense<0.000000e+00> : vector<16xf32>
    %362 = vector.multi_reduction <add>, %361, %cst_246 [1] : vector<16x32xf32> to vector<16xf32>
    %363 = vector.shape_cast %362 : vector<16xf32> to vector<16x1xf32>
    %cst_247 = arith.constant 3.200000e+01 : f32
    %364 = vector.broadcast %cst_247 : f32 to vector<16x1xf32>
    %365 = arith.divf %363, %364 : vector<16x1xf32>
    %366 = vector.broadcast %365 : vector<16x1xf32> to vector<16x32xf32>
    %367 = arith.subf %361, %366 : vector<16x32xf32>
    %368 = arith.mulf %367, %367 : vector<16x32xf32>
    %cst_248 = arith.constant dense<0.000000e+00> : vector<16xf32>
    %369 = vector.multi_reduction <add>, %368, %cst_248 [1] : vector<16x32xf32> to vector<16xf32>
    %370 = vector.shape_cast %369 : vector<16xf32> to vector<16x1xf32>
    %cst_249 = arith.constant 3.200000e+01 : f32
    %371 = vector.broadcast %cst_249 : f32 to vector<16x1xf32>
    %372 = arith.divf %370, %371 : vector<16x1xf32>
    %373 = vector.broadcast %365 : vector<16x1xf32> to vector<16x32xf32>
    %374 = arith.subf %361, %373 : vector<16x32xf32>
    %cst_250 = arith.constant 9.99999974E-6 : f32
    %375 = vector.broadcast %cst_250 : f32 to vector<16x1xf32>
    %376 = arith.addf %372, %375 : vector<16x1xf32>
    %377 = math.rsqrt %376 : vector<16x1xf32>
    %378 = vector.broadcast %377 : vector<16x1xf32> to vector<16x32xf32>
    %379 = arith.mulf %374, %378 : vector<16x32xf32>
    %380 = vector.broadcast %215 : vector<1x32xf32> to vector<16x32xf32>
    %381 = arith.mulf %379, %380 : vector<16x32xf32>
    %382 = vector.broadcast %216 : vector<1x32xf32> to vector<16x32xf32>
    %383 = arith.addf %381, %382 : vector<16x32xf32>
    %c1_251 = arith.constant 1 : index
    %c0_252 = arith.constant 0 : index
    %c0_253 = arith.constant 0 : index
    %384 = vector.load %arg6[%c1_251, %c0_252, %c0_253] : memref<2x32x64xf32, #tpu.memory_space<vmem>>, vector<1x32x64xf32>
    %385 = vector.shape_cast %384 : vector<1x32x64xf32> to vector<32x64xf32>
    %cst_254 = arith.constant dense<0.000000e+00> : vector<16x64xf32>
    %386 = tpu.matmul %383, %385, %cst_254 {dimension_numbers = #tpu.dot_dimension_numbers<[1], [0], [0], [1], [0, 0, 1, 1], [], []>} : vector<16x32xf32>, vector<32x64xf32>, vector<16x64xf32> -> vector<16x64xf32>
    %387 = vector.broadcast %220 : vector<1x64xf32> to vector<16x64xf32>
    %388 = arith.addf %386, %387 : vector<16x64xf32>
    %cst_255 = arith.constant 0.000000e+00 : f32
    %389 = vector.broadcast %cst_255 : f32 to vector<16x64xf32>
    %390 = arith.maximumf %388, %389 : vector<16x64xf32>
    %c1_256 = arith.constant 1 : index
    %c0_257 = arith.constant 0 : index
    %c0_258 = arith.constant 0 : index
    %391 = vector.load %arg7[%c1_256, %c0_257, %c0_258] : memref<2x64x32xf32, #tpu.memory_space<vmem>>, vector<1x64x32xf32>
    %392 = vector.shape_cast %391 : vector<1x64x32xf32> to vector<64x32xf32>
    %cst_259 = arith.constant dense<0.000000e+00> : vector<16x32xf32>
    %393 = tpu.matmul %390, %392, %cst_259 {dimension_numbers = #tpu.dot_dimension_numbers<[1], [0], [0], [1], [0, 0, 1, 1], [], []>} : vector<16x64xf32>, vector<64x32xf32>, vector<16x32xf32> -> vector<16x32xf32>
    %394 = vector.broadcast %217 : vector<1x32xf32> to vector<16x32xf32>
    %395 = arith.addf %393, %394 : vector<16x32xf32>
    %396 = arith.addf %383, %395 : vector<16x32xf32>
    %cst_260 = arith.constant dense<0.000000e+00> : vector<16xf32>
    %397 = vector.multi_reduction <add>, %396, %cst_260 [1] : vector<16x32xf32> to vector<16xf32>
    %398 = vector.shape_cast %397 : vector<16xf32> to vector<16x1xf32>
    %cst_261 = arith.constant 3.200000e+01 : f32
    %399 = vector.broadcast %cst_261 : f32 to vector<16x1xf32>
    %400 = arith.divf %398, %399 : vector<16x1xf32>
    %401 = vector.broadcast %400 : vector<16x1xf32> to vector<16x32xf32>
    %402 = arith.subf %396, %401 : vector<16x32xf32>
    %403 = arith.mulf %402, %402 : vector<16x32xf32>
    %cst_262 = arith.constant dense<0.000000e+00> : vector<16xf32>
    %404 = vector.multi_reduction <add>, %403, %cst_262 [1] : vector<16x32xf32> to vector<16xf32>
    %405 = vector.shape_cast %404 : vector<16xf32> to vector<16x1xf32>
    %cst_263 = arith.constant 3.200000e+01 : f32
    %406 = vector.broadcast %cst_263 : f32 to vector<16x1xf32>
    %407 = arith.divf %405, %406 : vector<16x1xf32>
    %408 = vector.broadcast %400 : vector<16x1xf32> to vector<16x32xf32>
    %409 = arith.subf %396, %408 : vector<16x32xf32>
    %cst_264 = arith.constant 9.99999974E-6 : f32
    %410 = vector.broadcast %cst_264 : f32 to vector<16x1xf32>
    %411 = arith.addf %407, %410 : vector<16x1xf32>
    %412 = math.rsqrt %411 : vector<16x1xf32>
    %413 = vector.broadcast %412 : vector<16x1xf32> to vector<16x32xf32>
    %414 = arith.mulf %409, %413 : vector<16x32xf32>
    %415 = vector.broadcast %218 : vector<1x32xf32> to vector<16x32xf32>
    %416 = arith.mulf %414, %415 : vector<16x32xf32>
    %417 = vector.broadcast %219 : vector<1x32xf32> to vector<16x32xf32>
    %418 = arith.addf %416, %417 : vector<16x32xf32>
    %c0_265 = arith.constant 0 : index
    %c0_266 = arith.constant 0 : index
    %419 = vector.load %arg9[%c0_265, %c0_266] : memref<16x32xf32, #tpu.memory_space<vmem>>, vector<16x32xf32>
    tpu.vector_store %arg9[%c0_265, %c0_266], %418 {strides = array<i32>} : memref<16x32xf32, #tpu.memory_space<vmem>>, vector<16x32xf32>,
    return
  }
  func.func @transform_0(%arg0: i32) -> (i32, i32, i32) {
    %c0_i32 = arith.constant 0 : i32
    %c0_i32_0 = arith.constant 0 : i32
    %c0_i32_1 = arith.constant 0 : i32
    %c0_i32_2 = arith.constant 0 : i32
    return %c0_i32, %c0_i32_0, %c0_i32_1 : i32, i32, i32
  }
  func.func @transform_1(%arg0: i32) -> (i32, i32) {
    %c0_i32 = arith.constant 0 : i32
    %c0_i32_0 = arith.constant 0 : i32
    %c0_i32_1 = arith.constant 0 : i32
    return %c0_i32, %c0_i32_0 : i32, i32
  }
  func.func @transform_2(%arg0: i32) -> (i32, i32, i32, i32) {
    %c0_i32 = arith.constant 0 : i32
    %c0_i32_0 = arith.constant 0 : i32
    %c0_i32_1 = arith.constant 0 : i32
    %c0_i32_2 = arith.constant 0 : i32
    %c0_i32_3 = arith.constant 0 : i32
    return %c0_i32, %c0_i32_0, %c0_i32_1, %c0_i32_2 : i32, i32, i32, i32
  }
  func.func @transform_3(%arg0: i32) -> (i32, i32, i32, i32) {
    %c0_i32 = arith.constant 0 : i32
    %c0_i32_0 = arith.constant 0 : i32
    %c0_i32_1 = arith.constant 0 : i32
    %c0_i32_2 = arith.constant 0 : i32
    %c0_i32_3 = arith.constant 0 : i32
    return %c0_i32, %c0_i32_0, %c0_i32_1, %c0_i32_2 : i32, i32, i32, i32
  }
  func.func @transform_4(%arg0: i32) -> (i32, i32, i32, i32) {
    %c0_i32 = arith.constant 0 : i32
    %c0_i32_0 = arith.constant 0 : i32
    %c0_i32_1 = arith.constant 0 : i32
    %c0_i32_2 = arith.constant 0 : i32
    %c0_i32_3 = arith.constant 0 : i32
    return %c0_i32, %c0_i32_0, %c0_i32_1, %c0_i32_2 : i32, i32, i32, i32
  }
  func.func @transform_5(%arg0: i32) -> (i32, i32, i32) {
    %c0_i32 = arith.constant 0 : i32
    %c0_i32_0 = arith.constant 0 : i32
    %c0_i32_1 = arith.constant 0 : i32
    %c0_i32_2 = arith.constant 0 : i32
    return %c0_i32, %c0_i32_0, %c0_i32_1 : i32, i32, i32
  }
  func.func @transform_6(%arg0: i32) -> (i32, i32, i32) {
    %c0_i32 = arith.constant 0 : i32
    %c0_i32_0 = arith.constant 0 : i32
    %c0_i32_1 = arith.constant 0 : i32
    %c0_i32_2 = arith.constant 0 : i32
    return %c0_i32, %c0_i32_0, %c0_i32_1 : i32, i32, i32
  }
  func.func @transform_7(%arg0: i32) -> (i32, i32, i32) {
    %c0_i32 = arith.constant 0 : i32
    %c0_i32_0 = arith.constant 0 : i32
    %c0_i32_1 = arith.constant 0 : i32
    %c0_i32_2 = arith.constant 0 : i32
    return %c0_i32, %c0_i32_0, %c0_i32_1 : i32, i32, i32
  }
  func.func @transform_8(%arg0: i32) -> (i32, i32) {
    %c0_i32 = arith.constant 0 : i32
    %c0_i32_0 = arith.constant 0 : i32
    %c0_i32_1 = arith.constant 0 : i32
    return %c0_i32, %c0_i32_0 : i32, i32
  }
}

</mosaic_0001>

<bundles_post_ra>
// kernel: tpu_custom_call.1
= control target key start
LH: loop header
LB: loop body
LE: loop exit
PB: predicated region body
PF: predicated region fallthrough
CT: control target
= control target key end

     0   :  { %vm49_vm0 = vcmask 261120   ;;  %s6794_s0 = inlined_call_operand.vmem [shape: f32[2,16,32], index: 0, kind: input, shape index: {}]   ;;  %s6795_s1 = inlined_call_operand.vmem [shape: f32[16,16], index: 1, kind: input, shape index: {}]   ;;  %s6796_s2 = inlined_call_operand.vmem [shape: f32[2,12,32,8], index: 2, kind: input, shape index: {}]   ;;  %s6797_s3 = inlined_call_operand.vmem [shape: f32[2,4,8,32], index: 3, kind: input, shape index: {}]   ;;  %s6798_s4 = inlined_call_operand.vmem [shape: f32[2,4,2,8], index: 4, kind: input, shape index: {}]   ;;  %s6799_s5 = inlined_call_operand.vmem [shape: f32[2,32,64], index: 5, kind: input, shape index: {}]   ;;  %s6800_s6 = inlined_call_operand.vmem [shape: f32[2,64,32], index: 6, kind: input, shape index: {}]   ;;  %s6801_s7 = inlined_call_operand.vmem [shape: f32[2,7,64], index: 7, kind: input, shape index: {}]   ;;  %s6802_s8 = inlined_call_operand.hbm [shape: f32[16,32], index: 8, kind: output, shape index: {}]  }
   0x1   :  { %v4829_v0 = vld [vmem:[%s6796_s2 + $0x38] sm:$0xff]  ;;  %v4828_v1 = vld [vmem:[%s6796_s2 + $0x30] sm:$0xff]  ;;  %v4827_v3 = vld [vmem:[%s6796_s2 + $0x28] sm:$0xff] }
   0x2   :  { %v44_v2 = vld [vmem:[%s6796_s2 + $0x18] sm:$0xff]  ;;  %5338 = vmatprep.subr.mxu1 %v4829_v0  ;;  %v43_v4 = vld [vmem:[%s6796_s2 + $0x10] sm:$0xff]  ;;  %v42_v5 = vld [vmem:[%s6796_s2 + $0x8] sm:$0xff] }
   0x3   :  { %5327 = vmatprep.subr.mxu0 %v44_v2  ;;  %5339 = vmatpush3.msra.mxu1 %v4829_v0  ;;  %v5981_v6 = vld [vmem:[%s6794_s0] sm:$0xff]  ;;  %v4822_v7 = vld [vmem:[%s6794_s0 + $0x10] sm:$0xff]  ;;  %v5992_v9 = vld [vmem:[%s6794_s0 + $0x8] sm:$0xff] }
   0x4   :  { %5328 = vmatpush3.msra.mxu0 %v44_v2  ;;  %5340 = vmatprep.subr.mxu1 %v4828_v1  ;;  %v5987_v8 = vadd.f32 %v4822_v7, %v5981_v6  ;;  %v4823_v10 = vld [vmem:[%s6794_s0 + $0x18] sm:$0xff]  ;;  %v4826_v11 = vld [vmem:[%s6796_s2 + $0x20] sm:$0xff] }
   0x5   :  { %5329 = vmatprep.subr.mxu0 %v43_v4  ;;  %5341 = vmatpush3.msra.mxu1 %v4828_v1 }
   0x6   :  { %5330 = vmatpush3.msra.mxu0 %v43_v4 }
   0x7   :  { %13 = vsyncpa [#allocation3], 0  ;;  %5342 = vmatprep.subr.mxu1 %v4827_v3  ;;  %5331 = vmatprep.subr.mxu0 %v42_v5  ;;  %v6001_v12 = vadd.f32 %v4823_v10, %v5992_v9  ;;  %v41_v13 = vld [vmem:[%s6796_s2] sm:$0xff]  ;;  %v45_v14 = vlaneseq  ;;  %vm301_vm1 = vcmask 64512   ;;  %v4835_v29 = vld [vmem:[%s6796_s2 + $0x58] sm:$0xff]  ;;  %vm389_vm2 = vcmask 130048  }
   0x8   :  { %5343 = vmatpush3.msra.mxu1 %v4827_v3  ;;  %5346 = vmatprep.mubr.msk.f32.mxu1 %vm49_vm0, %v5987_v8  ;;  %v40_v17 = vld [vmem:[%s6798_s4] sm:$0x3]  ;;  %v4834_v30 = vld [vmem:[%s6796_s2 + $0x50] sm:$0xff]  ;;  %v4833_v31 = vld [vmem:[%s6796_s2 + $0x48] sm:$0xff]  ;;  %vm2298_vm3 = vcmask 523264  }
   0x9   :  { %5344 = vmatprep.subr.mxu1 %v4826_v11  ;;  %5332 = vmatpush3.msra.mxu0 %v42_v5  ;;  %v6016_v15 = vshrl.u32 %v45_v14, 7  ;;  %v4832_v32 = vld [vmem:[%s6796_s2 + $0x40] sm:$0xff]  ;;  %v6059_v35 = vld [vmem:[%s6795_s1 + $0x8] sm:$0xff]  ;;  %v4854_v53 = vld [vmem:[%s6796_s2 + $0x98] sm:$0xff] }
   0xa   :  { %5345 = vmatpush3.msra.mxu1 %v4826_v11  ;;  %5333 = vmatprep.subr.mxu0 %v41_v13  ;;  %v6054_v34 = vld [vmem:[%s6795_s1] sm:$0xff]  ;;  %v4848_v54 = vld [vmem:[%s6796_s2 + $0x78] sm:$0xff]  ;;  %v4847_v55 = vld [vmem:[%s6796_s2 + $0x70] sm:$0xff] }
   0xb   :  { %5347 = vmatmul.mubr.msk.f32.vlgmr.msra.gmra.mxu1 %vm49_vm0, %v6001_v12  ;;  %5334 = vmatpush3.msra.mxu0 %v41_v13  ;;  %v6019_v16 = vsub.s32 1, %v6016_v15  ;;  %v6026_v19 = vsub.s32 0, %v6016_v15  ;;  %v4846_v56 = vld [vmem:[%s6796_s2 + $0x68] sm:$0xff]  ;;  %v4845_v57 = vld [vmem:[%s6796_s2 + $0x60] sm:$0xff]  ;;  %v4860_v58 = vld [vmem:[%s6796_s2 + $0xb8] sm:$0xff] }
   0xc   :  { %5335 = vmatprep.mubr.msk.f32.mxu0 %vm49_vm0, %v5987_v8  ;;  %5349 = vmatprep.subr.mxu0 %v4835_v29  ;;  %v4859_v59 = vld [vmem:[%s6796_s2 + $0xb0] sm:$0xff]  ;;  %v4858_v60 = vld [vmem:[%s6796_s2 + $0xa8] sm:$0xff]  ;;  %v4857_v61 = vld [vmem:[%s6796_s2 + $0xa0] sm:$0xff] }
   0xd   :  { %5336 = vmatmul.mubr.msk.f32.vlgmr.msra.gmra.mxu0 %vm49_vm0, %v6001_v12  ;;  %v139_v18 = vrot.slane %v40_v17, %v6019_v16  ;;  %v48_v22 = vrot.slane %v40_v17, %v6026_v19  ;;  %v4853_v4 = vld [vmem:[%s6796_s2 + $0x90] sm:$0xff]  ;;  %v4852_v5 = vld [vmem:[%s6796_s2 + $0x88] sm:$0xff]  ;;  %v4851_v7 = vld [vmem:[%s6796_s2 + $0x80] sm:$0xff] }
   0xe   :  { %5357 = vmatprep.mubr.msk.f32.mxu0 %vm49_vm0, %v5981_v6  ;;  %5350 = vmatpush3.msra.mxu0 %v4835_v29  ;;  %v493_v10 = vld [vmem:[%s6797_s3] sm:$0xff] }
   0xf   :  { %5351 = vmatprep.subr.mxu0 %v4834_v30  ;;  %v4844_v11 = vld [vmem:[%s6798_s4 + $0x2] sm:$0x3] }
  0x10   :  { %5352 = vmatpush3.msra.mxu0 %v4834_v30  ;;  %v504_v13 = vrot.slane %v4844_v11, %v6026_v19 }
  0x11   :  { %5353 = vmatprep.subr.mxu0 %v4833_v31 }
  0x12   :  { %5354 = vmatpush3.msra.mxu0 %v4833_v31 }
  0x13   :  { %5355 = vmatprep.subr.mxu0 %v4832_v32 }
  0x14   :  { %5356 = vmatpush3.msra.mxu0 %v4832_v32 }
  0x15   :  { %5358 = vmatmul.mubr.msk.f32.vlgmr.msra.gmra.mxu0 %vm49_vm0, %v5992_v9 }
  0xcb   :  { %v5348_v20 = vpop.f32.mrf.mxu1 }
  0xcc   :  { %v212_v21 = vadd.f32 %v5348_v20, %v139_v18 }
  0xcd   :  { %v206_v23 = vpop.f32.mrf.mxu1  ;;  %v5337_v24 = vpop.f32.mrf.mxu0 }
  0xce   :  { %v207_v25 = vadd.f32 %v206_v23, %v139_v18  ;;  %5360 = vmatprep.subr.msk.mxu1 %vm301_vm1, %v212_v21  ;;  %v128_v28 = vadd.f32 %v5337_v24, %v48_v22  ;;  %v588_v23 = vrot.slane %v4844_v11, %v6019_v16 }
  0xcf   :  { %5361 = vmatpush3.xpose.msk.msra.mxu1 %vm301_vm1, %v212_v21  ;;  %v122_v26 = vpop.f32.mrf.mxu0 }
  0xd0   :  { %v123_v27 = vadd.f32 %v122_v26, %v48_v22  ;;  %5362 = vmatprep.subr.msk.mxu1 %vm301_vm1, %v207_v25 }
  0xd2   :  { %5364 = vmatprep.mubr.msk.f32.mxu1 %vm301_vm1, %v123_v27 }
  0xd3   :  { %5363 = vmatpush3.xpose.msk.msra.mxu1 %vm301_vm1, %v207_v25 }
  0xd4   :  { %5374 = vmatprep.subr.mxu1 %v4848_v54 }
  0xd5   :  { %v5359_v51 = vpop.f32.mrf.mxu0 }
  0xd6   :  { %5365 = vmatmul.mubr.msk.f32.vlgmr.msra.gmra.mxu1 %vm301_vm1, %v128_v28  ;;  %5367 = vmatprep.subr.mxu0 %v5359_v51 }
  0xd7   :  { %5382 = vmatprep.mubr.msk.f32.mxu1 %vm49_vm0, %v5987_v8  ;;  %v292_v52 = vpop.f32.mrf.mxu0  ;;  %5368 = vmatpush3.msra.mxu0 %v5359_v51  ;;  %v4882_v51 = vld [vmem:[%s6796_s2 + $0xe8] sm:$0xff] }
  0xd8   :  { %5369 = vmatprep.subr.mxu0 %v292_v52  ;;  %5375 = vmatpush3.msra.mxu1 %v4848_v54 }
  0xd9   :  { %5370 = vmatpush3.msra.mxu0 %v292_v52  ;;  %5376 = vmatprep.subr.mxu1 %v4847_v55  ;;  %v4881_v52 = vld [vmem:[%s6796_s2 + $0xe0] sm:$0xff] }
  0xda   :  { %5385 = vmatprep.subr.mxu0 %v4854_v53  ;;  %5377 = vmatpush3.msra.mxu1 %v4847_v55 }
  0xdb   :  { %5378 = vmatprep.subr.mxu1 %v4846_v56 }
  0xdc   :  { %5379 = vmatpush3.msra.mxu1 %v4846_v56 }
  0xdd   :  { %5380 = vmatprep.subr.mxu1 %v4845_v57 }
  0xde   :  { %5381 = vmatpush3.msra.mxu1 %v4845_v57 }
  0xdf   :  { %5383 = vmatmul.mubr.msk.f32.vlgmr.msra.gmra.mxu1 %vm49_vm0, %v6001_v12  ;;  %5396 = vmatprep.subr.mxu1 %v4860_v58 }
  0xe0   :  { %5397 = vmatpush3.msra.mxu1 %v4860_v58  ;;  %5404 = vmatprep.mubr.msk.f32.mxu1 %vm49_vm0, %v5981_v6 }
  0xe1   :  { %5398 = vmatprep.subr.mxu1 %v4859_v59 }
  0xe2   :  { %5399 = vmatpush3.msra.mxu1 %v4859_v59  ;;  %v4878_v59 = vld [vmem:[%s6796_s2 + $0xd8] sm:$0xff] }
  0xe3   :  { %5400 = vmatprep.subr.mxu1 %v4858_v60 }
  0xe4   :  { %5401 = vmatpush3.msra.mxu1 %v4858_v60 }
  0xe5   :  { %5402 = vmatprep.subr.mxu1 %v4857_v61 }
  0xe6   :  { %5403 = vmatpush3.msra.mxu1 %v4857_v61 }
  0xe7   :  { %5405 = vmatmul.mubr.msk.f32.vlgmr.msra.gmra.mxu1 %vm49_vm0, %v5992_v9  ;;  %5426 = vmatprep.subr.mxu1 %v493_v10 }
  0xe8   :  { %5427 = vmatpush3.msra.mxu1 %v493_v10 }
 0x196   :  { %v5366_v33 = vpop.f32.mrf.mxu1 }
 0x197   :  { %v386_v38 = vadd.f32 %v5366_v33, %v6059_v35 }
 0x198   :  { %v380_v36 = vpop.f32.mrf.mxu1 }
 0x199   :  { %v381_v37 = vadd.f32 %v380_v36, %v6054_v34  ;;  %v393_v40 = vsel %vm389_vm2, %v386_v38, -inf }
 0x19b   :  { %v390_v39 = vsel %vm389_vm2, %v381_v37, -inf }
 0x19c   :  { %391 = vmax.xlane.f32.xlu0 %v390_v39 }
 0x19f   :  { %v5384_v14 = vpop.f32.mrf.mxu1 }
 0x1a0   :  { %394 = vmax.xlane.f32.xlu0 %v393_v40  ;;  %v577_v17 = vadd.f32 %v5384_v14, %v504_v13 }
 0x1a1   :  { %v571_v18 = vpop.f32.mrf.mxu1 }
 0x1a2   :  { %v572_v20 = vadd.f32 %v571_v18, %v504_v13 }
 0x1a7   :  { %v5406_v28 = vpop.f32.mrf.mxu1 }
 0x1a9   :  { %v735_v29 = vpop.f32.mrf.mxu1 }
 0x225   :  { %v392_v41 = vpop.xlane.xlu0 %391 }
 0x226   :  { %v396_v42 = vsub.f32 %v381_v37, %v392_v41 }
 0x228   :  { %v398_v43 = vmul.f32 1.442695, %v396_v42 }
 0x229   :  { %v395_v44 = vpop.xlane.xlu0 %394 }
 0x22a   :  { %5806 = vpow2.f32 %v398_v43  ;;  %v397_v45 = vsub.f32 %v386_v38, %v395_v44 }
 0x22c   :  { %v400_v46 = vmul.f32 1.442695, %v397_v45 }
 0x22e   :  { %5808 = vpow2.f32 %v400_v46 }
 0x237   :  { %v5807_v47 = vpop.eup %5806 }
 0x238   :  { %v402_v48 = vsel %vm389_vm2, %v5807_v47, 0.0 }
 0x239   :  { %403 = vadd.xlane.f32.xlu1 %v402_v48  ;;  %v4884_v48 = vld [vmem:[%s6796_s2 + $0xf8] sm:$0xff] }
 0x23a   :  { %5442 = vmatprep.subr.mxu1 %v4884_v48 }
 0x23b   :  { %v5809_v49 = vpop.eup %5808 }
 0x23c   :  { %v405_v50 = vsel %vm389_vm2, %v5809_v49, 0.0 }
 0x23d   :  { %406 = vadd.xlane.f32.xlu1 %v405_v50  ;;  %v4869_v50 = vld [vmem:[%s6797_s3 + $0x8] sm:$0xff] }
 0x2c2   :  { %v404_v62 = vpop.xlane.xlu1 %403 }
 0x2c3   :  { %5810 = vrcp.f32 %v404_v62  ;;  %v4874_v62 = vld [vmem:[%s6798_s4 + $0x4] sm:$0x3] }
 0x2c6   :  { %v407_v63 = vpop.xlane.xlu1 %406 }
 0x2c7   :  { %5812 = vrcp.f32 %v407_v63 }
 0x2d0   :  { %v5811_v0 = vpop.eup %5810 }
 0x2d1   :  { %v410_v1 = vmul.f32 %v5811_v0, %v5807_v47  ;;  %v1192_v0 = vrot.slane %v4874_v62, %v6019_v16 }
 0x2d3   :  { %5371 = vmatprep.mubr.msk.f32.mxu0 %vm389_vm2, %v410_v1 }
 0x2d4   :  { %v5813_v2 = vpop.eup %5812 }
 0x2d5   :  { %v411_v3 = vmul.f32 %v5813_v2, %v5809_v49  ;;  %v4883_v49 = vld [vmem:[%s6796_s2 + $0xf0] sm:$0xff] }
 0x2d7   :  { %5372 = vmatmul.mubr.msk.f32.vlgmr.msra.gmra.mxu0 %vm389_vm2, %v411_v3 }
 0x2d8   :  { %5386 = vmatpush3.msra.mxu0 %v4854_v53  ;;  %5393 = vmatprep.mubr.msk.f32.mxu0 %vm49_vm0, %v5987_v8 }
 0x2d9   :  { %5387 = vmatprep.subr.mxu0 %v4853_v4 }
 0x2da   :  { %5388 = vmatpush3.msra.mxu0 %v4853_v4  ;;  %v4877_v4 = vld [vmem:[%s6796_s2 + $0xd0] sm:$0xff] }
 0x2db   :  { %5389 = vmatprep.subr.mxu0 %v4852_v5 }
 0x2dc   :  { %5390 = vmatpush3.msra.mxu0 %v4852_v5  ;;  %v4876_v5 = vld [vmem:[%s6796_s2 + $0xc8] sm:$0xff] }
 0x2dd   :  { %5391 = vmatprep.subr.mxu0 %v4851_v7 }
 0x2de   :  { %5392 = vmatpush3.msra.mxu0 %v4851_v7  ;;  %v4875_v7 = vld [vmem:[%s6796_s2 + $0xc0] sm:$0xff] }
 0x2df   :  { %5394 = vmatmul.mubr.msk.f32.vlgmr.msra.gmra.mxu0 %vm49_vm0, %v6001_v12 }
 0x2e0   :  { %5411 = vmatprep.mubr.msk.f32.mxu0 %vm301_vm1, %v572_v20 }
 0x397   :  { %v5373_v21 = vpop.f32.mrf.mxu0 }
 0x399   :  { %v484_v22 = vpop.f32.mrf.mxu0 }
 0x39a   :  { %5428 = vmatprep.mubr.msk.f32.mxu1 %vm301_vm1, %v484_v22 }
 0x39b   :  { %5429 = vmatmul.mubr.msk.f32.vlgmr.msra.gmra.mxu1 %vm301_vm1, %v5373_v21 }
 0x39c   :  { %5450 = vmatprep.mubr.msk.f32.mxu1 %vm49_vm0, %v5987_v8  ;;  %5443 = vmatpush3.msra.mxu1 %v4884_v48 }
 0x39d   :  { %5444 = vmatprep.subr.mxu1 %v4883_v49 }
 0x39e   :  { %5445 = vmatpush3.msra.mxu1 %v4883_v49 }
 0x39f   :  { %v5395_v24 = vpop.f32.mrf.mxu0  ;;  %5446 = vmatprep.subr.mxu1 %v4882_v51 }
 0x3a0   :  { %v661_v25 = vadd.f32 %v5395_v24, %v588_v23  ;;  %5447 = vmatpush3.msra.mxu1 %v4882_v51  ;;  %v4889_v24 = vld [vmem:[%s6796_s2 + $0x110] sm:$0xff] }
 0x3a1   :  { %v655_v26 = vpop.f32.mrf.mxu0  ;;  %5448 = vmatprep.subr.mxu1 %v4881_v52 }
 0x3a2   :  { %v656_v27 = vadd.f32 %v655_v26, %v588_v23  ;;  %5407 = vmatprep.subr.msk.mxu0 %vm301_vm1, %v661_v25  ;;  %5449 = vmatpush3.msra.mxu1 %v4881_v52  ;;  %v4890_v23 = vld [vmem:[%s6796_s2 + $0x118] sm:$0xff]  ;;  %v4887_v26 = vld [vmem:[%s6796_s2 + $0x100] sm:$0xff] }
 0x3a3   :  { %5408 = vmatpush3.xpose.msk.msra.mxu0 %vm301_vm1, %v661_v25  ;;  %5451 = vmatmul.mubr.msk.f32.vlgmr.msra.gmra.mxu1 %vm49_vm0, %v6001_v12  ;;  %v4888_v25 = vld [vmem:[%s6796_s2 + $0x108] sm:$0xff] }
 0x3a4   :  { %5409 = vmatprep.subr.msk.mxu0 %vm301_vm1, %v656_v27 }
 0x3a7   :  { %5410 = vmatpush3.xpose.msk.msra.mxu0 %vm301_vm1, %v656_v27 }
 0x3a8   :  { %5414 = vmatprep.subr.mxu0 %v5406_v28 }
 0x3aa   :  { %5412 = vmatmul.mubr.msk.f32.vlgmr.msra.gmra.mxu0 %vm301_vm1, %v577_v17  ;;  %v1108_v17 = vrot.slane %v4874_v62, %v6026_v19 }
 0x3ab   :  { %5415 = vmatpush3.msra.mxu0 %v5406_v28 }
 0x3ac   :  { %5416 = vmatprep.subr.mxu0 %v735_v29 }
 0x3ad   :  { %5417 = vmatpush3.msra.mxu0 %v735_v29 }
 0x3ae   :  { %5421 = vmatprep.subr.mxu0 %v4869_v50 }
 0x45b   :  { %v6161_v60 = vpop.f32.mrf.mxu1 }
 0x45d   :  { %v6163_v61 = vpop.f32.mrf.mxu1 }
 0x463   :  { %v5452_v63 = vpop.f32.mrf.mxu1 }
 0x464   :  { %v1265_v1 = vadd.f32 %v5452_v63, %v1192_v0  ;;  %v4911_v63 = vld [vmem:[%s6796_s2 + $0x150] sm:$0xff] }
 0x465   :  { %v1259_v10 = vpop.f32.mrf.mxu1 }
 0x466   :  { %5464 = vmatprep.subr.msk.mxu1 %vm301_vm1, %v1265_v1  ;;  %v1260_v11 = vadd.f32 %v1259_v10, %v1192_v0  ;;  %v4910_v0 = vld [vmem:[%s6796_s2 + $0x148] sm:$0xff] }
 0x467   :  { %5465 = vmatpush3.xpose.msk.msra.mxu1 %vm301_vm1, %v1265_v1  ;;  %v4909_v1 = vld [vmem:[%s6796_s2 + $0x140] sm:$0xff] }
 0x468   :  { %5466 = vmatprep.subr.msk.mxu1 %vm301_vm1, %v1260_v11 }
 0x46a   :  { %v5413_v30 = vpop.f32.mrf.mxu0 }
 0x46b   :  { %v828_v31 = vadd.f32 %v5413_v30, %v6059_v35  ;;  %5467 = vmatpush3.xpose.msk.msra.mxu1 %vm301_vm1, %v1260_v11 }
 0x46c   :  { %v822_v32 = vpop.f32.mrf.mxu0 }
 0x46d   :  { %v823_v33 = vadd.f32 %v822_v32, %v6054_v34  ;;  %v834_v36 = vsel %vm389_vm2, %v828_v31, -inf }
 0x46e   :  { %835 = vmax.xlane.f32.xlu1 %v834_v36 }
 0x46f   :  { %v831_v37 = vsel %vm389_vm2, %v823_v33, -inf }
 0x470   :  { %832 = vmax.xlane.f32.xlu0 %v831_v37 }
 0x4f7   :  { %v836_v38 = vpop.xlane.xlu1 %835 }
 0x4f8   :  { %v838_v39 = vsub.f32 %v828_v31, %v836_v38 }
 0x4f9   :  { %v833_v40 = vpop.xlane.xlu0 %832 }
 0x4fa   :  { %v841_v41 = vmul.f32 1.442695, %v838_v39  ;;  %v837_v42 = vsub.f32 %v823_v33, %v833_v40 }
 0x4fc   :  { %5814 = vpow2.f32 %v841_v41  ;;  %v839_v43 = vmul.f32 1.442695, %v837_v42 }
 0x4fe   :  { %5816 = vpow2.f32 %v839_v43 }
 0x509   :  { %v5815_v44 = vpop.eup %5814 }
 0x50a   :  { %v846_v45 = vsel %vm389_vm2, %v5815_v44, 0.0 }
 0x50b   :  { %v5817_v46 = vpop.eup %5816  ;;  %847 = vadd.xlane.f32.xlu1 %v846_v45 }
 0x50c   :  { %v843_v47 = vsel %vm389_vm2, %v5817_v46, 0.0 }
 0x50d   :  { %844 = vadd.xlane.f32.xlu0 %v843_v47  ;;  %v4899_v47 = vld [vmem:[%s6797_s3 + $0x10] sm:$0xff] }
 0x50e   :  { %5478 = vmatprep.subr.mxu1 %v4899_v47 }
 0x594   :  { %v848_v53 = vpop.xlane.xlu1 %847 }
 0x595   :  { %5818 = vrcp.f32 %v848_v53 }
 0x596   :  { %v845_v54 = vpop.xlane.xlu0 %844 }
 0x597   :  { %5820 = vrcp.f32 %v845_v54  ;;  %v4912_v54 = vld [vmem:[%s6796_s2 + $0x158] sm:$0xff] }
 0x5a2   :  { %v5819_v55 = vpop.eup %5818 }
 0x5a3   :  { %v852_v58 = vmul.f32 %v5819_v55, %v5815_v44  ;;  %v4906_v55 = vld [vmem:[%s6796_s2 + $0x138] sm:$0xff] }
 0x5a4   :  { %v5821_v56 = vpop.eup %5820 }
 0x5a5   :  { %v851_v57 = vmul.f32 %v5821_v56, %v5817_v46  ;;  %v4905_v56 = vld [vmem:[%s6796_s2 + $0x130] sm:$0xff] }
 0x5a7   :  { %5418 = vmatprep.mubr.msk.f32.mxu0 %vm389_vm2, %v851_v57  ;;  %v4904_v57 = vld [vmem:[%s6796_s2 + $0x128] sm:$0xff] }
 0x5a8   :  { %5419 = vmatmul.mubr.msk.f32.vlgmr.msra.gmra.mxu0 %vm389_vm2, %v852_v58  ;;  %v4903_v58 = vld [vmem:[%s6796_s2 + $0x120] sm:$0xff] }
 0x5a9   :  { %5422 = vmatpush3.msra.mxu0 %v4869_v50 }
 0x5aa   :  { %5431 = vmatprep.subr.mxu0 %v4878_v59 }
 0x668   :  { %v5420_v2 = vpop.f32.mrf.mxu0 }
 0x66a   :  { %v925_v3 = vpop.f32.mrf.mxu0 }
 0x66b   :  { %5423 = vmatprep.mubr.msk.f32.mxu0 %vm301_vm1, %v925_v3 }
 0x66c   :  { %5424 = vmatmul.mubr.msk.f32.vlgmr.msra.gmra.mxu0 %vm301_vm1, %v5420_v2  ;;  %v4902_v2 = vld [vmem:[%s6798_s4 + $0x6] sm:$0x3] }
 0x66d   :  { %5432 = vmatpush3.msra.mxu0 %v4878_v59  ;;  %5439 = vmatprep.mubr.msk.f32.mxu0 %vm49_vm0, %v5987_v8  ;;  %v1633_v3 = vrot.slane %v4902_v2, %v6026_v19 }
 0x66e   :  { %5433 = vmatprep.subr.mxu0 %v4877_v4 }
 0x66f   :  { %5434 = vmatpush3.msra.mxu0 %v4877_v4 }
 0x670   :  { %5435 = vmatprep.subr.mxu0 %v4876_v5 }
 0x671   :  { %5436 = vmatpush3.msra.mxu0 %v4876_v5 }
 0x672   :  { %5437 = vmatprep.subr.mxu0 %v4875_v7 }
 0x673   :  { %5438 = vmatpush3.msra.mxu0 %v4875_v7 }
 0x674   :  { %5440 = vmatmul.mubr.msk.f32.vlgmr.msra.gmra.mxu0 %vm49_vm0, %v6001_v12  ;;  %5453 = vmatprep.subr.mxu0 %v4890_v23 }
 0x675   :  { %5461 = vmatprep.mubr.msk.f32.mxu0 %vm49_vm0, %v5981_v6  ;;  %5454 = vmatpush3.msra.mxu0 %v4890_v23 }
 0x676   :  { %5455 = vmatprep.subr.mxu0 %v4889_v24 }
 0x677   :  { %5456 = vmatpush3.msra.mxu0 %v4889_v24 }
 0x678   :  { %5457 = vmatprep.subr.mxu0 %v4888_v25 }
 0x679   :  { %5458 = vmatpush3.msra.mxu0 %v4888_v25 }
 0x67a   :  { %5459 = vmatprep.subr.mxu0 %v4887_v26 }
 0x67b   :  { %5460 = vmatpush3.msra.mxu0 %v4887_v26 }
 0x67c   :  { %5462 = vmatmul.mubr.msk.f32.vlgmr.msra.gmra.mxu0 %vm49_vm0, %v5992_v9 }
 0x72c   :  { %v6190_v13 = vpop.f32.mrf.mxu0 }
 0x72d   :  { %v1095_v10 = vadd.f32 %v6161_v60, %v6190_v13  ;;  %v4918_v60 = vld [vmem:[%s6796_s2 + $0x178] sm:$0xff]  ;;  %v4916_v13 = vld [vmem:[%s6796_s2 + $0x168] sm:$0xff] }
 0x72e   :  { %v6192_v14 = vpop.f32.mrf.mxu0 }
 0x734   :  { %v5441_v18 = vpop.f32.mrf.mxu0 }
 0x735   :  { %v1181_v22 = vadd.f32 %v5441_v18, %v1108_v17 }
 0x736   :  { %v1175_v20 = vpop.f32.mrf.mxu0 }
 0x737   :  { %v1176_v21 = vadd.f32 %v1175_v20, %v1108_v17  ;;  %v1090_v17 = vadd.f32 %v6163_v61, %v6192_v14  ;;  %v4917_v61 = vld [vmem:[%s6796_s2 + $0x170] sm:$0xff]  ;;  %v4915_v14 = vld [vmem:[%s6796_s2 + $0x160] sm:$0xff] }
 0x739   :  { %5468 = vmatprep.mubr.msk.f32.mxu1 %vm301_vm1, %v1176_v21  ;;  %v1717_v21 = vrot.slane %v4902_v2, %v6019_v16 }
 0x73a   :  { %5469 = vmatmul.mubr.msk.f32.vlgmr.msra.gmra.mxu1 %vm301_vm1, %v1181_v22 }
 0x73b   :  { %5479 = vmatpush3.msra.mxu1 %v4899_v47 }
 0x73c   :  { %v5463_v45 = vpop.f32.mrf.mxu0  ;;  %5494 = vmatprep.subr.mxu1 %v4912_v54 }
 0x73d   :  { %5471 = vmatprep.subr.mxu0 %v5463_v45 }
 0x73e   :  { %v1339_v46 = vpop.f32.mrf.mxu0  ;;  %5472 = vmatpush3.msra.mxu0 %v5463_v45 }
 0x73f   :  { %5473 = vmatprep.subr.mxu0 %v1339_v46 }
 0x740   :  { %5474 = vmatpush3.msra.mxu0 %v1339_v46 }
 0x741   :  { %5483 = vmatprep.subr.mxu0 %v4906_v55 }
 0x7fa   :  { %v5470_v27 = vpop.f32.mrf.mxu1 }
 0x7fb   :  { %v1432_v28 = vadd.f32 %v5470_v27, %v6059_v35 }
 0x7fc   :  { %v1426_v29 = vpop.f32.mrf.mxu1 }
 0x7fd   :  { %v1427_v30 = vadd.f32 %v1426_v29, %v6054_v34  ;;  %v1438_v31 = vsel %vm389_vm2, %v1432_v28, -inf }
 0x7fe   :  { %1439 = vmax.xlane.f32.xlu1 %v1438_v31 }
 0x7ff   :  { %v1435_v32 = vsel %vm389_vm2, %v1427_v30, -inf }
 0x800   :  { %1436 = vmax.xlane.f32.xlu0 %v1435_v32 }
 0x887   :  { %v1440_v33 = vpop.xlane.xlu1 %1439 }
 0x888   :  { %v1442_v36 = vsub.f32 %v1432_v28, %v1440_v33 }
 0x889   :  { %v1437_v37 = vpop.xlane.xlu0 %1436 }
 0x88a   :  { %v1445_v38 = vmul.f32 1.442695, %v1442_v36  ;;  %v1441_v39 = vsub.f32 %v1427_v30, %v1437_v37 }
 0x88c   :  { %5822 = vpow2.f32 %v1445_v38  ;;  %v1443_v40 = vmul.f32 1.442695, %v1441_v39 }
 0x88e   :  { %5824 = vpow2.f32 %v1443_v40 }
 0x899   :  { %v5823_v41 = vpop.eup %5822 }
 0x89a   :  { %v1450_v42 = vsel %vm389_vm2, %v5823_v41, 0.0 }
 0x89b   :  { %v5825_v43 = vpop.eup %5824  ;;  %1451 = vadd.xlane.f32.xlu1 %v1450_v42 }
 0x89c   :  { %v1447_v44 = vsel %vm389_vm2, %v5825_v43, 0.0 }
 0x89d   :  { %1448 = vadd.xlane.f32.xlu0 %v1447_v44  ;;  %v4927_v44 = vld [vmem:[%s6797_s3 + $0x18] sm:$0xff] }
 0x924   :  { %v1452_v48 = vpop.xlane.xlu1 %1451 }
 0x925   :  { %5826 = vrcp.f32 %v1452_v48 }
 0x926   :  { %v1449_v49 = vpop.xlane.xlu0 %1448 }
 0x927   :  { %5828 = vrcp.f32 %v1449_v49 }
 0x932   :  { %v5827_v50 = vpop.eup %5826 }
 0x933   :  { %v1456_v53 = vmul.f32 %v5827_v50, %v5823_v41 }
 0x934   :  { %v5829_v51 = vpop.eup %5828 }
 0x935   :  { %v1455_v52 = vmul.f32 %v5829_v51, %v5825_v43 }
 0x937   :  { %5475 = vmatprep.mubr.msk.f32.mxu0 %vm389_vm2, %v1455_v52 }
 0x938   :  { %5476 = vmatmul.mubr.msk.f32.vlgmr.msra.gmra.mxu0 %vm389_vm2, %v1456_v53  ;;  %v6307_v53 = vld [vmem:[%s6801_s7] sm:$0x7f] }
 0x939   :  { %5491 = vmatprep.mubr.msk.f32.mxu0 %vm49_vm0, %v5987_v8  ;;  %5484 = vmatpush3.msra.mxu0 %v4906_v55 }
 0x93a   :  { %5485 = vmatprep.subr.mxu0 %v4905_v56 }
 0x93b   :  { %5486 = vmatpush3.msra.mxu0 %v4905_v56 }
 0x93c   :  { %5487 = vmatprep.subr.mxu0 %v4904_v57 }
 0x93d   :  { %5488 = vmatpush3.msra.mxu0 %v4904_v57 }
 0x93e   :  { %5489 = vmatprep.subr.mxu0 %v4903_v58 }
 0x93f   :  { %5490 = vmatpush3.msra.mxu0 %v4903_v58 }
 0x940   :  { %5492 = vmatmul.mubr.msk.f32.vlgmr.msra.gmra.mxu0 %vm49_vm0, %v6001_v12  ;;  %5505 = vmatprep.subr.mxu0 %v4918_v60 }
 0x941   :  { %5513 = vmatprep.mubr.msk.f32.mxu0 %vm49_vm0, %v5981_v6  ;;  %5506 = vmatpush3.msra.mxu0 %v4918_v60 }
 0x942   :  { %5507 = vmatprep.subr.mxu0 %v4917_v61 }
 0x943   :  { %5508 = vmatpush3.msra.mxu0 %v4917_v61 }
 0x944   :  { %5509 = vmatprep.subr.mxu0 %v4916_v13 }
 0x945   :  { %5510 = vmatpush3.msra.mxu0 %v4916_v13 }
 0x946   :  { %5511 = vmatprep.subr.mxu0 %v4915_v14 }
 0x947   :  { %5512 = vmatpush3.msra.mxu0 %v4915_v14 }
 0x948   :  { %5514 = vmatmul.mubr.msk.f32.vlgmr.msra.gmra.mxu0 %vm49_vm0, %v5992_v9 }
 0x9f8   :  { %v5477_v59 = vpop.f32.mrf.mxu0 }
 0x9fa   :  { %v1529_v62 = vpop.f32.mrf.mxu0 }
 0x9fb   :  { %5480 = vmatprep.mubr.msk.f32.mxu1 %vm301_vm1, %v1529_v62 }
 0x9fc   :  { %5481 = vmatmul.mubr.msk.f32.vlgmr.msra.gmra.mxu1 %vm301_vm1, %v5477_v59 }
 0x9fd   :  { %5495 = vmatpush3.msra.mxu1 %v4912_v54  ;;  %5502 = vmatprep.mubr.msk.f32.mxu1 %vm49_vm0, %v5987_v8  ;;  %v2151_v54 = vrot.slane %v6307_v53, %v6026_v19 }
 0x9fe   :  { %5496 = vmatprep.subr.mxu1 %v4911_v63 }
 0x9ff   :  { %5497 = vmatpush3.msra.mxu1 %v4911_v63 }
 0xa00   :  { %5498 = vmatprep.subr.mxu1 %v4910_v0  ;;  %v5493_v8 = vpop.f32.mrf.mxu0 }
 0xa01   :  { %5499 = vmatpush3.msra.mxu1 %v4910_v0  ;;  %v1706_v4 = vadd.f32 %v5493_v8, %v1633_v3 }
 0xa02   :  { %5500 = vmatprep.subr.mxu1 %v4909_v1  ;;  %v1700_v5 = vpop.f32.mrf.mxu0 }
 0xa03   :  { %5501 = vmatpush3.msra.mxu1 %v4909_v1  ;;  %v1701_v7 = vadd.f32 %v1700_v5, %v1633_v3 }
 0xa04   :  { %5503 = vmatmul.mubr.msk.f32.vlgmr.msra.gmra.mxu1 %vm49_vm0, %v6001_v12 }
 0xa05   :  { %5520 = vmatprep.mubr.msk.f32.mxu1 %vm301_vm1, %v1701_v7 }
 0xa08   :  { %v5515_v42 = vpop.f32.mrf.mxu0 }
 0xa09   :  { %5523 = vmatprep.subr.mxu0 %v5515_v42 }
 0xa0a   :  { %v1864_v43 = vpop.f32.mrf.mxu0  ;;  %5524 = vmatpush3.msra.mxu0 %v5515_v42  ;;  %v2286_v42 = vld [vmem:[%s6800_s6] sm:$0xff] }
 0xa0b   :  { %5525 = vmatprep.subr.mxu0 %v1864_v43 }
 0xa0c   :  { %5526 = vmatpush3.msra.mxu0 %v1864_v43  ;;  %v2201_v43 = vsub.s32 6, %v6016_v15 }
 0xabc   :  { %v5482_v11 = vpop.f32.mrf.mxu1 }
 0xabd   :  { %v6267_v12 = vadd.f32 %v5482_v11, %v1095_v10 }
 0xabe   :  { %v1612_v18 = vpop.f32.mrf.mxu1 }
 0xabf   :  { %v6269_v20 = vadd.f32 %v1612_v18, %v1090_v17  ;;  %v2197_v18 = vld [vmem:[%s6799_s5 + $0x10] sm:$0xff] }
 0xac4   :  { %v5504_v22 = vpop.f32.mrf.mxu1 }
 0xac5   :  { %v1790_v23 = vadd.f32 %v5504_v22, %v1717_v21  ;;  %v2293_v22 = vld [vmem:[%s6800_s6 + $0x38] sm:$0xff] }
 0xac6   :  { %v1784_v24 = vpop.f32.mrf.mxu1 }
 0xac7   :  { %v1785_v25 = vadd.f32 %v1784_v24, %v1717_v21  ;;  %5516 = vmatprep.subr.msk.mxu1 %vm301_vm1, %v1790_v23  ;;  %v2195_v21 = vld [vmem:[%s6799_s5] sm:$0xff]  ;;  %v2291_v24 = vld [vmem:[%s6800_s6 + $0x28] sm:$0xff] }
 0xac8   :  { %5517 = vmatpush3.xpose.msk.msra.mxu1 %vm301_vm1, %v1790_v23  ;;  %v2292_v23 = vld [vmem:[%s6800_s6 + $0x30] sm:$0xff] }
 0xac9   :  { %5518 = vmatprep.subr.msk.mxu1 %vm301_vm1, %v1785_v25 }
 0xacc   :  { %5519 = vmatpush3.xpose.msk.msra.mxu1 %vm301_vm1, %v1785_v25  ;;  %v2290_v25 = vld [vmem:[%s6800_s6 + $0x20] sm:$0xff] }
 0xacd   :  { %5530 = vmatprep.subr.mxu1 %v4927_v44 }
 0xacf   :  { %5521 = vmatmul.mubr.msk.f32.vlgmr.msra.gmra.mxu1 %vm301_vm1, %v1706_v4 }
 0xad0   :  { %5531 = vmatpush3.msra.mxu1 %v4927_v44  ;;  %v2202_v44 = vrot.slane %v6307_v53, %v2201_v43 }
 0xad1   :  { %5546 = vmatprep.subr.mxu1 %v2293_v22 }
 0xb8f   :  { %v5522_v26 = vpop.f32.mrf.mxu1 }
 0xb90   :  { %v1957_v27 = vadd.f32 %v5522_v26, %v6059_v35 }
 0xb91   :  { %v1951_v28 = vpop.f32.mrf.mxu1 }
 0xb92   :  { %v1952_v29 = vadd.f32 %v1951_v28, %v6054_v34  ;;  %v1963_v30 = vsel %vm389_vm2, %v1957_v27, -inf }
 0xb93   :  { %1964 = vmax.xlane.f32.xlu1 %v1963_v30  ;;  %v2191_v30 = vsub.s32 2, %v6016_v15 }
 0xb94   :  { %v1960_v31 = vsel %vm389_vm2, %v1952_v29, -inf }
 0xb95   :  { %1961 = vmax.xlane.f32.xlu0 %v1960_v31 }
 0xc1c   :  { %v1965_v32 = vpop.xlane.xlu1 %1964 }
 0xc1d   :  { %v1967_v33 = vsub.f32 %v1957_v27, %v1965_v32 }
 0xc1e   :  { %v1962_v36 = vpop.xlane.xlu0 %1961 }
 0xc1f   :  { %v1970_v37 = vmul.f32 1.442695, %v1967_v33  ;;  %v1966_v38 = vsub.f32 %v1952_v29, %v1962_v36  ;;  %v2186_v29 = vrot.slane %v6307_v53, %v6019_v16 }
 0xc21   :  { %5830 = vpow2.f32 %v1970_v37  ;;  %v1968_v39 = vmul.f32 1.442695, %v1966_v38  ;;  %v2192_v37 = vrot.slane %v6307_v53, %v2191_v30 }
 0xc23   :  { %5832 = vpow2.f32 %v1968_v39 }
 0xc2e   :  { %v5831_v40 = vpop.eup %5830 }
 0xc2f   :  { %v1975_v35 = vsel %vm389_vm2, %v5831_v40, 0.0 }
 0xc30   :  { %v5833_v41 = vpop.eup %5832  ;;  %1976 = vadd.xlane.f32.xlu1 %v1975_v35  ;;  %v2289_v35 = vld [vmem:[%s6800_s6 + $0x18] sm:$0xff] }
 0xc31   :  { %v1972_v34 = vsel %vm389_vm2, %v5833_v41, 0.0 }
 0xc32   :  { %1973 = vadd.xlane.f32.xlu0 %v1972_v34  ;;  %v2287_v34 = vld [vmem:[%s6800_s6 + $0x8] sm:$0xff] }
 0xcb9   :  { %v1977_v45 = vpop.xlane.xlu1 %1976 }
 0xcba   :  { %5834 = vrcp.f32 %v1977_v45 }
 0xcbb   :  { %v1974_v46 = vpop.xlane.xlu0 %1973 }
 0xcbc   :  { %5836 = vrcp.f32 %v1974_v46 }
 0xcc7   :  { %v5835_v47 = vpop.eup %5834 }
 0xcc8   :  { %v1981_v50 = vmul.f32 %v5835_v47, %v5831_v40 }
 0xcc9   :  { %v5837_v48 = vpop.eup %5836 }
 0xcca   :  { %v1980_v49 = vmul.f32 %v5837_v48, %v5833_v41  ;;  %v2288_v41 = vld [vmem:[%s6800_s6 + $0x10] sm:$0xff] }
 0xccc   :  { %5527 = vmatprep.mubr.msk.f32.mxu0 %vm389_vm2, %v1980_v49 }
 0xccd   :  { %5528 = vmatmul.mubr.msk.f32.vlgmr.msra.gmra.mxu0 %vm389_vm2, %v1981_v50 }
 0xd8d   :  { %v5529_v51 = vpop.f32.mrf.mxu0 }
 0xd8f   :  { %v2054_v52 = vpop.f32.mrf.mxu0 }
 0xd90   :  { %5532 = vmatprep.mubr.msk.f32.mxu1 %vm301_vm1, %v2054_v52 }
 0xd91   :  { %5533 = vmatmul.mubr.msk.f32.vlgmr.msra.gmra.mxu1 %vm301_vm1, %v5529_v51  ;;  %v2296_v51 = vsub.s32 3, %v6016_v15 }
 0xd92   :  { %5547 = vmatpush3.msra.mxu1 %v2293_v22  ;;  %v4936_v22 = vld [vmem:[%s6796_s2 + $0x180] sm:$0xff] }
 0xd93   :  { %5548 = vmatprep.subr.mxu1 %v2292_v23  ;;  %v2297_v52 = vrot.slane %v6307_v53, %v2296_v51 }
 0xd94   :  { %5549 = vmatpush3.msra.mxu1 %v2292_v23  ;;  %v4945_v23 = vld [vmem:[%s6796_s2 + $0x1b8] sm:$0xff] }
 0xd95   :  { %5550 = vmatprep.subr.mxu1 %v2291_v24 }
 0xd96   :  { %5551 = vmatpush3.msra.mxu1 %v2291_v24 }
 0xd97   :  { %5552 = vmatprep.subr.mxu1 %v2290_v25 }
 0xd98   :  { %5553 = vmatpush3.msra.mxu1 %v2290_v25 }
 0xd99   :  { %5554 = vmatprep.subr.mxu1 %v2289_v35 }
 0xd9a   :  { %5555 = vmatpush3.msra.mxu1 %v2289_v35  ;;  %v5886_v35 = vld [vmem:[%s6794_s0 + $0x10] sm:$0xff] }
 0xd9b   :  { %5556 = vmatprep.subr.mxu1 %v2288_v41 }
 0xd9c   :  { %5557 = vmatpush3.msra.mxu1 %v2288_v41 }
 0xd9d   :  { %5558 = vmatprep.subr.mxu1 %v2287_v34 }
 0xd9e   :  { %5559 = vmatpush3.msra.mxu1 %v2287_v34 }
 0xd9f   :  { %5560 = vmatprep.subr.mxu1 %v2286_v42 }
 0xda0   :  { %5561 = vmatpush3.msra.mxu1 %v2286_v42  ;;  %v4944_v42 = vld [vmem:[%s6796_s2 + $0x1b0] sm:$0xff] }
 0xe51   :  { %v5534_v55 = vpop.f32.mrf.mxu1 }
 0xe52   :  { %v2147_v56 = vadd.f32 %v5534_v55, %v6267_v12 }
 0xe53   :  { %v2137_v57 = vpop.f32.mrf.mxu1 }
 0xe54   :  { %v2153_v58 = vadd.f32 %v2151_v54, %v2147_v56  ;;  %v2146_v59 = vadd.f32 %v2137_v57, %v6269_v20  ;;  %v2196_v20 = vld [vmem:[%s6799_s5 + $0x8] sm:$0xff] }
 0xe56   :  { %v2152_v62 = vadd.f32 %v2151_v54, %v2146_v59  ;;  %v2155_v63 = vadd.f32 %v2153_v58, %v5992_v9 }
 0xe58   :  { %v2159_v0 = vsel %vm49_vm0, %v2155_v63, 0.0  ;;  %v2154_v1 = vadd.f32 %v2152_v62, %v5981_v6  ;;  %v2198_v6 = vld [vmem:[%s6799_s5 + $0x18] sm:$0xff] }
 0xe59   :  { %2160 = vadd.xlane.f32.xlu1 %v2159_v0  ;;  %5535 = vmatprep.subr.mxu0 %v2198_v6 }
 0xe5a   :  { %v2156_v2 = vsel %vm49_vm0, %v2154_v1, 0.0  ;;  %5536 = vmatpush3.msra.mxu0 %v2198_v6  ;;  %v4938_v6 = vld [vmem:[%s6796_s2 + $0x190] sm:$0xff] }
 0xe5b   :  { %2157 = vadd.xlane.f32.xlu0 %v2156_v2  ;;  %5537 = vmatprep.subr.mxu0 %v2197_v18 }
 0xe5c   :  { %5538 = vmatpush3.msra.mxu0 %v2197_v18  ;;  %v4949_v18 = vld [vmem:[%s6796_s2 + $0x1c8] sm:$0xff] }
 0xe5d   :  { %5539 = vmatprep.subr.mxu0 %v2196_v20 }
 0xe5e   :  { %5540 = vmatpush3.msra.mxu0 %v2196_v20  ;;  %v4937_v20 = vld [vmem:[%s6796_s2 + $0x188] sm:$0xff] }
 0xe5f   :  { %5541 = vmatprep.subr.mxu0 %v2195_v21 }
 0xe60   :  { %5542 = vmatpush3.msra.mxu0 %v2195_v21  ;;  %v4948_v21 = vld [vmem:[%s6796_s2 + $0x1c0] sm:$0xff] }
 0xee2   :  { %v2161_v3 = vpop.xlane.xlu1 %2160 }
 0xee3   :  { %v2164_v8 = vmul.f32 0.03125, %v2161_v3 }
 0xee4   :  { %v2158_v4 = vpop.xlane.xlu0 %2157 }
 0xee5   :  { %v2166_v5 = vsub.f32 %v2155_v63, %v2164_v8  ;;  %v2163_v7 = vmul.f32 0.03125, %v2158_v4 }
 0xee7   :  { %v2165_v10 = vsub.f32 %v2154_v1, %v2163_v7  ;;  %v2168_v11 = vmul.f32 %v2166_v5, %v2166_v5 }
 0xee9   :  { %v2172_v17 = vsel %vm49_vm0, %v2168_v11, 0.0  ;;  %v2167_v12 = vmul.f32 %v2165_v10, %v2165_v10 }
 0xeea   :  { %2173 = vadd.xlane.f32.xlu1 %v2172_v17  ;;  %v4951_v17 = vld [vmem:[%s6796_s2 + $0x1d8] sm:$0xff] }
 0xeeb   :  { %v2169_v9 = vsel %vm49_vm0, %v2167_v12, 0.0  ;;  %5587 = vmatprep.subr.mxu1 %v4951_v17  ;;  %v4939_v12 = vld [vmem:[%s6796_s2 + $0x198] sm:$0xff] }
 0xeec   :  { %2170 = vadd.xlane.f32.xlu0 %v2169_v9  ;;  %5565 = vmatprep.subr.mxu0 %v4939_v12  ;;  %v4950_v9 = vld [vmem:[%s6796_s2 + $0x1d0] sm:$0xff] }
 0xf73   :  { %v2174_v60 = vpop.xlane.xlu1 %2173 }
 0xf74   :  { %v2176_v61 = vmul.f32 0.03125, %v2174_v60 }
 0xf75   :  { %v2171_v13 = vpop.xlane.xlu0 %2170 }
 0xf76   :  { %v2178_v14 = vadd.f32 1e-05, %v2176_v61  ;;  %v2175_v26 = vmul.f32 0.03125, %v2171_v13 }
 0xf78   :  { %5838 = vrsqrt.f32 %v2178_v14  ;;  %v2177_v27 = vadd.f32 1e-05, %v2175_v26  ;;  %v2410_v26 = vsub.s32 4, %v6016_v15 }
 0xf7a   :  { %5840 = vrsqrt.f32 %v2177_v27  ;;  %v2416_v27 = vsub.s32 5, %v6016_v15 }
 0xf85   :  { %v5839_v28 = vpop.eup %5838 }
 0xf86   :  { %v2182_v31 = vmul.f32 %v5839_v28, %v2166_v5  ;;  %v2411_v28 = vrot.slane %v6307_v53, %v2410_v26 }
 0xf87   :  { %v5841_v32 = vpop.eup %5840 }
 0xf88   :  { %v2181_v33 = vmul.f32 %v5841_v32, %v2165_v10  ;;  %v2188_v36 = vmul.f32 %v2186_v29, %v2182_v31 }
 0xf8a   :  { %v2187_v38 = vmul.f32 %v2186_v29, %v2181_v33  ;;  %v2194_v40 = vadd.f32 %v2192_v37, %v2188_v36  ;;  %v2417_v33 = vrot.slane %v6307_v53, %v2416_v27  ;;  %v5887_v53 = vld [vmem:[%s6794_s0 + $0x18] sm:$0xff] }
 0xf8c   :  { %v2193_v39 = vadd.f32 %v2192_v37, %v2187_v38 }
 0xf8e   :  { %5543 = vmatprep.mubr.msk.f32.mxu0 %vm49_vm0, %v2193_v39 }
 0xf8f   :  { %5544 = vmatmul.mubr.msk.f32.vlgmr.msra.gmra.mxu0 %vm49_vm0, %v2194_v40 }
 0xf90   :  { %5566 = vmatpush3.msra.mxu0 %v4939_v12 }
 0xf91   :  { %5567 = vmatprep.subr.mxu0 %v4938_v6 }
 0xf92   :  { %5568 = vmatpush3.msra.mxu0 %v4938_v6 }
 0xf93   :  { %5569 = vmatprep.subr.mxu0 %v4937_v20 }
 0xf94   :  { %5570 = vmatpush3.msra.mxu0 %v4937_v20 }
 0xf95   :  { %5571 = vmatprep.subr.mxu0 %v4936_v22 }
 0xf96   :  { %5572 = vmatpush3.msra.mxu0 %v4936_v22 }
 0xf97   :  { %5576 = vmatprep.subr.mxu0 %v4945_v23 }
0x104f   :  { %v5545_v45 = vpop.f32.mrf.mxu0 }
0x1050   :  { %v2281_v46 = vadd.f32 %v5545_v45, %v2202_v44  ;;  %v4942_v45 = vld [vmem:[%s6796_s2 + $0x1a0] sm:$0xff] }
0x1051   :  { %v2275_v47 = vpop.f32.mrf.mxu0 }
0x1052   :  { %v2276_v48 = vadd.f32 %v2275_v47, %v2202_v44  ;;  %v2285_v50 = vmax.f32 %v2281_v46, 0.0  ;;  %v4943_v44 = vld [vmem:[%s6796_s2 + $0x1a8] sm:$0xff] }
0x1053   :  { %v4935_v47 = vld [vmem:[%s6798_s4 + $0x8] sm:$0x3] }
0x1054   :  { %v2284_v49 = vmax.f32 %v2276_v48, 0.0 }
0x1056   :  { %5562 = vmatprep.mubr.msk.f32.mxu1 %vm2298_vm3, %v2284_v49 }
0x1057   :  { %5563 = vmatmul.mubr.msk.f32.vlgmr.msra.gmra.mxu1 %vm2298_vm3, %v2285_v50  ;;  %v2434_v50 = vrot.slane %v4935_v47, %v6026_v19 }
0x1058   :  { %5588 = vmatpush3.msra.mxu1 %v4951_v17 }
0x1059   :  { %5589 = vmatprep.subr.mxu1 %v4950_v9 }
0x105a   :  { %5590 = vmatpush3.msra.mxu1 %v4950_v9 }
0x105b   :  { %5591 = vmatprep.subr.mxu1 %v4949_v18 }
0x105c   :  { %5592 = vmatpush3.msra.mxu1 %v4949_v18 }
0x105d   :  { %5593 = vmatprep.subr.mxu1 %v4948_v21 }
0x105e   :  { %5594 = vmatpush3.msra.mxu1 %v4948_v21 }
0x1117   :  { %v5564_v54 = vpop.f32.mrf.mxu1 }
0x1118   :  { %v2377_v55 = vadd.f32 %v5564_v54, %v2297_v52 }
0x1119   :  { %v2371_v56 = vpop.f32.mrf.mxu1 }
0x111a   :  { %v2372_v57 = vadd.f32 %v2371_v56, %v2297_v52  ;;  %v2381_v58 = vadd.f32 %v2377_v55, %v2194_v40  ;;  %v2524_v55 = vrot.slane %v4935_v47, %v6019_v16  ;;  %v4975_v47 = vld [vmem:[%s6796_s2 + $0x228] sm:$0xff] }
0x111c   :  { %v2385_v59 = vsel %vm49_vm0, %v2381_v58, 0.0  ;;  %v2380_v62 = vadd.f32 %v2372_v57, %v2193_v39 }
0x111d   :  { %2386 = vadd.xlane.f32.xlu1 %v2385_v59 }
0x111e   :  { %v2382_v63 = vsel %vm49_vm0, %v2380_v62, 0.0 }
0x111f   :  { %2383 = vadd.xlane.f32.xlu0 %v2382_v63 }
0x11a6   :  { %v2387_v0 = vpop.xlane.xlu1 %2386 }
0x11a7   :  { %v2389_v1 = vmul.f32 0.03125, %v2387_v0  ;;  %v4970_v0 = vld [vmem:[%s6796_s2 + $0x210] sm:$0xff] }
0x11a8   :  { %v2384_v2 = vpop.xlane.xlu0 %2383 }
0x11a9   :  { %v2391_v3 = vsub.f32 %v2381_v58, %v2389_v1  ;;  %v2388_v8 = vmul.f32 0.03125, %v2384_v2  ;;  %v4969_v1 = vld [vmem:[%s6796_s2 + $0x208] sm:$0xff]  ;;  %v4968_v2 = vld [vmem:[%s6796_s2 + $0x200] sm:$0xff] }
0x11ab   :  { %v2390_v4 = vsub.f32 %v2380_v62, %v2388_v8  ;;  %v2393_v5 = vmul.f32 %v2391_v3, %v2391_v3  ;;  %v4971_v62 = vld [vmem:[%s6796_s2 + $0x218] sm:$0xff]  ;;  %v6479_v8 = vld [vmem:[%s6795_s1 + $0x8] sm:$0xff] }
0x11ad   :  { %v2397_v7 = vsel %vm49_vm0, %v2393_v5, 0.0  ;;  %v2392_v10 = vmul.f32 %v2390_v4, %v2390_v4 }
0x11ae   :  { %2398 = vadd.xlane.f32.xlu1 %v2397_v7  ;;  %v6485_v7 = vld [vmem:[%s6798_s4 + $0xa] sm:$0x3] }
0x11af   :  { %v2394_v11 = vsel %vm49_vm0, %v2392_v10, 0.0  ;;  %v6490_v10 = vld [vmem:[%s6795_s1] sm:$0xff]  ;;  %v2972_v9 = vrot.slane %v6485_v7, %v6019_v16 }
0x11b0   :  { %2395 = vadd.xlane.f32.xlu0 %v2394_v11 }
0x1237   :  { %v2399_v24 = vpop.xlane.xlu1 %2398 }
0x1238   :  { %v2401_v25 = vmul.f32 0.03125, %v2399_v24 }
0x1239   :  { %v2396_v60 = vpop.xlane.xlu0 %2395 }
0x123a   :  { %v2403_v61 = vadd.f32 1e-05, %v2401_v25  ;;  %v2400_v13 = vmul.f32 0.03125, %v2396_v60 }
0x123c   :  { %5842 = vrsqrt.f32 %v2403_v61  ;;  %v2402_v14 = vadd.f32 1e-05, %v2400_v13 }
0x123e   :  { %5844 = vrsqrt.f32 %v2402_v14 }
0x1249   :  { %v5843_v29 = vpop.eup %5842 }
0x124a   :  { %v2407_v31 = vmul.f32 %v5843_v29, %v2391_v3 }
0x124b   :  { %v5845_v32 = vpop.eup %5844 }
0x124c   :  { %v2413_v36 = vmul.f32 %v2411_v28, %v2407_v31  ;;  %v2406_v37 = vmul.f32 %v5845_v32, %v2390_v4  ;;  %v4965_v31 = vld [vmem:[%s6796_s2 + $0x1f8] sm:$0xff] }
0x124e   :  { %v2412_v38 = vmul.f32 %v2411_v28, %v2406_v37  ;;  %v6412_v39 = vadd.f32 %v2417_v33, %v2413_v36 }
0x1250   :  { %v6414_v40 = vadd.f32 %v2417_v33, %v2412_v38  ;;  %v6430_v34 = vadd.f32 %v5887_v53, %v6412_v39  ;;  %v4964_v53 = vld [vmem:[%s6796_s2 + $0x1f0] sm:$0xff] }
0x1252   :  { %5595 = vmatprep.mubr.msk.f32.mxu1 %vm49_vm0, %v6414_v40  ;;  %v6422_v41 = vadd.f32 %v5886_v35, %v6414_v40 }
0x1253   :  { %5596 = vmatmul.mubr.msk.f32.vlgmr.msra.gmra.mxu1 %vm49_vm0, %v6412_v39 }
0x1254   :  { %5573 = vmatprep.mubr.msk.f32.mxu0 %vm49_vm0, %v6422_v41 }
0x1255   :  { %5574 = vmatmul.mubr.msk.f32.vlgmr.msra.gmra.mxu0 %vm49_vm0, %v6430_v34 }
0x1256   :  { %5577 = vmatpush3.msra.mxu0 %v4945_v23  ;;  %5584 = vmatprep.mubr.msk.f32.mxu0 %vm49_vm0, %v6422_v41 }
0x1257   :  { %5578 = vmatprep.subr.mxu0 %v4944_v42 }
0x1258   :  { %5579 = vmatpush3.msra.mxu0 %v4944_v42  ;;  %v4963_v42 = vld [vmem:[%s6796_s2 + $0x1e8] sm:$0xff] }
0x1259   :  { %5580 = vmatprep.subr.mxu0 %v4943_v44 }
0x125a   :  { %5581 = vmatpush3.msra.mxu0 %v4943_v44  ;;  %v4962_v44 = vld [vmem:[%s6796_s2 + $0x1e0] sm:$0xff] }
0x125b   :  { %5582 = vmatprep.subr.mxu0 %v4942_v45 }
0x125c   :  { %5583 = vmatpush3.msra.mxu0 %v4942_v45  ;;  %v4977_v45 = vld [vmem:[%s6796_s2 + $0x238] sm:$0xff] }
0x125d   :  { %5585 = vmatmul.mubr.msk.f32.vlgmr.msra.gmra.mxu0 %vm49_vm0, %v6430_v34 }
0x1313   :  { %v5597_v46 = vpop.f32.mrf.mxu1 }
0x1314   :  { %5605 = vmatprep.subr.mxu1 %v5597_v46 }
0x1315   :  { %v5575_v48 = vpop.f32.mrf.mxu0  ;;  %v2677_v49 = vpop.f32.mrf.mxu1  ;;  %5606 = vmatpush3.msra.mxu1 %v5597_v46  ;;  %v4976_v46 = vld [vmem:[%s6796_s2 + $0x230] sm:$0xff] }
0x1316   :  { %5607 = vmatprep.subr.mxu1 %v2677_v49  ;;  %v2513_v63 = vadd.f32 %v5575_v48, %v2434_v50  ;;  %v4974_v48 = vld [vmem:[%s6796_s2 + $0x220] sm:$0xff] }
0x1317   :  { %v2507_v52 = vpop.f32.mrf.mxu0  ;;  %5608 = vmatpush3.msra.mxu1 %v2677_v49 }
0x1318   :  { %v2508_v54 = vadd.f32 %v2507_v52, %v2434_v50  ;;  %5612 = vmatprep.subr.mxu1 %v4965_v31  ;;  %v2888_v52 = vrot.slane %v6485_v7, %v6026_v19 }
0x131a   :  { %5602 = vmatprep.mubr.msk.f32.mxu0 %vm301_vm1, %v2508_v54 }
0x131d   :  { %v5586_v56 = vpop.f32.mrf.mxu0 }
0x131e   :  { %v2597_v57 = vadd.f32 %v5586_v56, %v2524_v55 }
0x131f   :  { %v2591_v58 = vpop.f32.mrf.mxu0 }
0x1320   :  { %v2592_v59 = vadd.f32 %v2591_v58, %v2524_v55  ;;  %5598 = vmatprep.subr.msk.mxu0 %vm301_vm1, %v2597_v57 }
0x1321   :  { %5599 = vmatpush3.xpose.msk.msra.mxu0 %vm301_vm1, %v2597_v57 }
0x1322   :  { %5600 = vmatprep.subr.msk.mxu0 %vm301_vm1, %v2592_v59 }
0x1325   :  { %5601 = vmatpush3.xpose.msk.msra.mxu0 %vm301_vm1, %v2592_v59 }
0x1326   :  { %5623 = vmatprep.subr.mxu0 %v4971_v62 }
0x1328   :  { %5603 = vmatmul.mubr.msk.f32.vlgmr.msra.gmra.mxu0 %vm301_vm1, %v2513_v63 }
0x1329   :  { %5624 = vmatpush3.msra.mxu0 %v4971_v62  ;;  %5631 = vmatprep.mubr.msk.f32.mxu0 %vm49_vm0, %v6422_v41 }
0x132a   :  { %5625 = vmatprep.subr.mxu0 %v4970_v0 }
0x132b   :  { %5626 = vmatpush3.msra.mxu0 %v4970_v0 }
0x132c   :  { %5627 = vmatprep.subr.mxu0 %v4969_v1 }
0x132d   :  { %5628 = vmatpush3.msra.mxu0 %v4969_v1 }
0x132e   :  { %5629 = vmatprep.subr.mxu0 %v4968_v2 }
0x132f   :  { %5630 = vmatpush3.msra.mxu0 %v4968_v2 }
0x1330   :  { %5632 = vmatmul.mubr.msk.f32.vlgmr.msra.gmra.mxu0 %vm49_vm0, %v6430_v34 }
0x13e8   :  { %v5604_v3 = vpop.f32.mrf.mxu0 }
0x13e9   :  { %v2770_v4 = vadd.f32 %v6479_v8, %v5604_v3 }
0x13ea   :  { %v2764_v5 = vpop.f32.mrf.mxu0 }
0x13eb   :  { %v2765_v11 = vadd.f32 %v6490_v10, %v2764_v5  ;;  %v2776_v17 = vsel %vm389_vm2, %v2770_v4, -inf }
0x13ec   :  { %2777 = vmax.xlane.f32.xlu1 %v2776_v17 }
0x13ed   :  { %v2773_v12 = vsel %vm389_vm2, %v2765_v11, -inf }
0x13ee   :  { %2774 = vmax.xlane.f32.xlu0 %v2773_v12 }
0x13f0   :  { %v5633_v6 = vpop.f32.mrf.mxu0 }
0x13f1   :  { %v3045_v18 = vadd.f32 %v5633_v6, %v2972_v9 }
0x13f2   :  { %v3039_v20 = vpop.f32.mrf.mxu0 }
0x13f3   :  { %v3040_v21 = vadd.f32 %v3039_v20, %v2972_v9  ;;  %5645 = vmatprep.subr.msk.mxu0 %vm301_vm1, %v3045_v18 }
0x13f4   :  { %5646 = vmatpush3.xpose.msk.msra.mxu0 %vm301_vm1, %v3045_v18 }
0x13f5   :  { %5647 = vmatprep.subr.msk.mxu0 %vm301_vm1, %v3040_v21 }
0x13f8   :  { %5648 = vmatpush3.xpose.msk.msra.mxu0 %vm301_vm1, %v3040_v21  ;;  %v4960_v21 = vld [vmem:[%s6797_s3 + $0x20] sm:$0xff] }
0x1475   :  { %v2778_v22 = vpop.xlane.xlu1 %2777 }
0x1476   :  { %v2780_v23 = vsub.f32 %v2770_v4, %v2778_v22  ;;  %v4986_v22 = vld [vmem:[%s6797_s3 + $0x28] sm:$0xff] }
0x1477   :  { %v2775_v24 = vpop.xlane.xlu0 %2774  ;;  %5659 = vmatprep.subr.mxu0 %v4986_v22 }
0x1478   :  { %v2783_v25 = vmul.f32 1.442695, %v2780_v23  ;;  %v2779_v60 = vsub.f32 %v2765_v11, %v2775_v24 }
0x147a   :  { %5846 = vpow2.f32 %v2783_v25  ;;  %v2781_v61 = vmul.f32 1.442695, %v2779_v60 }
0x147c   :  { %5848 = vpow2.f32 %v2781_v61 }
0x1487   :  { %v5847_v13 = vpop.eup %5846 }
0x1488   :  { %v2788_v14 = vsel %vm389_vm2, %v5847_v13, 0.0 }
0x1489   :  { %v5849_v28 = vpop.eup %5848  ;;  %2789 = vadd.xlane.f32.xlu1 %v2788_v14  ;;  %v5001_v14 = vld [vmem:[%s6796_s2 + $0x278] sm:$0xff] }
0x148a   :  { %v2785_v29 = vsel %vm389_vm2, %v5849_v28, 0.0 }
0x148b   :  { %2786 = vadd.xlane.f32.xlu0 %v2785_v29  ;;  %v4999_v29 = vld [vmem:[%s6796_s2 + $0x268] sm:$0xff] }
0x1512   :  { %v2790_v32 = vpop.xlane.xlu1 %2789 }
0x1513   :  { %5850 = vrcp.f32 %v2790_v32  ;;  %v4995_v32 = vld [vmem:[%s6796_s2 + $0x258] sm:$0xff] }
0x1514   :  { %v2787_v33 = vpop.xlane.xlu0 %2786 }
0x1515   :  { %5852 = vrcp.f32 %v2787_v33 }
0x1520   :  { %v5851_v36 = vpop.eup %5850 }
0x1521   :  { %v2794_v35 = vmul.f32 %v5851_v36, %v5847_v13 }
0x1522   :  { %v5853_v37 = vpop.eup %5852 }
0x1523   :  { %v2793_v38 = vmul.f32 %v5853_v37, %v5849_v28  ;;  %v5000_v28 = vld [vmem:[%s6796_s2 + $0x270] sm:$0xff] }
0x1524   :  { %v4994_v37 = vld [vmem:[%s6796_s2 + $0x250] sm:$0xff] }
0x1525   :  { %5609 = vmatprep.mubr.msk.f32.mxu1 %vm389_vm2, %v2793_v38  ;;  %v4993_v38 = vld [vmem:[%s6796_s2 + $0x248] sm:$0xff] }
0x1526   :  { %5610 = vmatmul.mubr.msk.f32.vlgmr.msra.gmra.mxu1 %vm389_vm2, %v2794_v35 }
0x1527   :  { %5613 = vmatpush3.msra.mxu1 %v4965_v31  ;;  %5620 = vmatprep.mubr.msk.f32.mxu1 %vm49_vm0, %v6422_v41  ;;  %v4998_v31 = vld [vmem:[%s6796_s2 + $0x260] sm:$0xff] }
0x1528   :  { %5614 = vmatprep.subr.mxu1 %v4964_v53 }
0x1529   :  { %5615 = vmatpush3.msra.mxu1 %v4964_v53  ;;  %v4991_v53 = vld [vmem:[%s6798_s4 + $0xc] sm:$0x3] }
0x152a   :  { %5616 = vmatprep.subr.mxu1 %v4963_v42 }
0x152b   :  { %5617 = vmatpush3.msra.mxu1 %v4963_v42  ;;  %v4992_v42 = vld [vmem:[%s6796_s2 + $0x240] sm:$0xff] }
0x152c   :  { %5618 = vmatprep.subr.mxu1 %v4962_v44 }
0x152d   :  { %5619 = vmatpush3.msra.mxu1 %v4962_v44  ;;  %v3576_v44 = vrot.slane %v4991_v53, %v6019_v16 }
0x152e   :  { %5621 = vmatmul.mubr.msk.f32.vlgmr.msra.gmra.mxu1 %vm49_vm0, %v6430_v34  ;;  %5634 = vmatprep.subr.mxu1 %v4977_v45 }
0x152f   :  { %5635 = vmatpush3.msra.mxu1 %v4977_v45  ;;  %5642 = vmatprep.mubr.msk.f32.mxu1 %vm49_vm0, %v6414_v40  ;;  %v5007_v45 = vld [vmem:[%s6796_s2 + $0x298] sm:$0xff] }
0x1530   :  { %5636 = vmatprep.subr.mxu1 %v4976_v46 }
0x1531   :  { %5637 = vmatpush3.msra.mxu1 %v4976_v46 }
0x1532   :  { %5638 = vmatprep.subr.mxu1 %v4975_v47 }
0x1533   :  { %5639 = vmatpush3.msra.mxu1 %v4975_v47  ;;  %v5006_v47 = vld [vmem:[%s6796_s2 + $0x290] sm:$0xff] }
0x1534   :  { %5640 = vmatprep.subr.mxu1 %v4974_v48 }
0x1535   :  { %5641 = vmatpush3.msra.mxu1 %v4974_v48 }
0x1536   :  { %5643 = vmatmul.mubr.msk.f32.vlgmr.msra.gmra.mxu1 %vm49_vm0, %v6412_v39 }
0x15e6   :  { %v5611_v49 = vpop.f32.mrf.mxu1 }
0x15e8   :  { %v2867_v50 = vpop.f32.mrf.mxu1 }
0x15ee   :  { %v5622_v54 = vpop.f32.mrf.mxu1 }
0x15ef   :  { %v2961_v57 = vadd.f32 %v5622_v54, %v2888_v52 }
0x15f0   :  { %v2955_v55 = vpop.f32.mrf.mxu1 }
0x15f1   :  { %v2956_v56 = vadd.f32 %v2955_v55, %v2888_v52  ;;  %v5004_v55 = vld [vmem:[%s6796_s2 + $0x280] sm:$0xff] }
0x15f3   :  { %5649 = vmatprep.mubr.msk.f32.mxu0 %vm301_vm1, %v2956_v56 }
0x15f4   :  { %5650 = vmatmul.mubr.msk.f32.vlgmr.msra.gmra.mxu0 %vm301_vm1, %v2961_v57 }
0x15f5   :  { %5660 = vmatpush3.msra.mxu0 %v4986_v22 }
0x15f6   :  { %v5644_v58 = vpop.f32.mrf.mxu1  ;;  %5669 = vmatprep.subr.mxu0 %v4995_v32 }
0x15f7   :  { %5652 = vmatprep.subr.mxu1 %v5644_v58 }
0x15f8   :  { %v3119_v59 = vpop.f32.mrf.mxu1  ;;  %5653 = vmatpush3.msra.mxu1 %v5644_v58  ;;  %v3492_v58 = vrot.slane %v4991_v53, %v6026_v19  ;;  %v5034_v53 = vld [vmem:[%s6796_s2 + $0x2f0] sm:$0xff] }
0x15f9   :  { %5654 = vmatprep.subr.mxu1 %v3119_v59 }
0x15fa   :  { %5655 = vmatpush3.msra.mxu1 %v3119_v59 }
0x15fb   :  { %5664 = vmatprep.subr.mxu1 %v4960_v21 }
0x16b4   :  { %v5651_v62 = vpop.f32.mrf.mxu0 }
0x16b5   :  { %v3212_v63 = vadd.f32 %v6479_v8, %v5651_v62 }
0x16b6   :  { %v3206_v0 = vpop.f32.mrf.mxu0 }
0x16b7   :  { %v3207_v1 = vadd.f32 %v6490_v10, %v3206_v0  ;;  %v3218_v2 = vsel %vm389_vm2, %v3212_v63, -inf }
0x16b8   :  { %3219 = vmax.xlane.f32.xlu1 %v3218_v2 }
0x16b9   :  { %v3215_v3 = vsel %vm389_vm2, %v3207_v1, -inf }
0x16ba   :  { %3216 = vmax.xlane.f32.xlu0 %v3215_v3 }
0x1741   :  { %v3220_v4 = vpop.xlane.xlu1 %3219 }
0x1742   :  { %v3222_v5 = vsub.f32 %v3212_v63, %v3220_v4 }
0x1743   :  { %v3217_v7 = vpop.xlane.xlu0 %3216 }
0x1744   :  { %v3225_v11 = vmul.f32 1.442695, %v3222_v5  ;;  %v3221_v17 = vsub.f32 %v3207_v1, %v3217_v7 }
0x1746   :  { %5854 = vpow2.f32 %v3225_v11  ;;  %v3223_v12 = vmul.f32 1.442695, %v3221_v17 }
0x1748   :  { %5856 = vpow2.f32 %v3223_v12 }
0x1753   :  { %v5855_v9 = vpop.eup %5854 }
0x1754   :  { %v3230_v6 = vsel %vm389_vm2, %v5855_v9, 0.0 }
0x1755   :  { %v5857_v18 = vpop.eup %5856  ;;  %3231 = vadd.xlane.f32.xlu1 %v3230_v6 }
0x1756   :  { %v3227_v20 = vsel %vm389_vm2, %v5857_v18, 0.0 }
0x1757   :  { %3228 = vadd.xlane.f32.xlu0 %v3227_v20 }
0x17de   :  { %v3232_v23 = vpop.xlane.xlu1 %3231 }
0x17df   :  { %5858 = vrcp.f32 %v3232_v23 }
0x17e0   :  { %v3229_v24 = vpop.xlane.xlu0 %3228 }
0x17e1   :  { %5860 = vrcp.f32 %v3229_v24 }
0x17ec   :  { %v5859_v25 = vpop.eup %5858 }
0x17ed   :  { %v3236_v13 = vmul.f32 %v5859_v25, %v5855_v9 }
0x17ee   :  { %v5861_v60 = vpop.eup %5860 }
0x17ef   :  { %v3235_v61 = vmul.f32 %v5861_v60, %v5857_v18  ;;  %v5023_v60 = vld [vmem:[%s6796_s2 + $0x2b8] sm:$0xff] }
0x17f1   :  { %5656 = vmatprep.mubr.msk.f32.mxu1 %vm389_vm2, %v3235_v61  ;;  %v5016_v61 = vld [vmem:[%s6797_s3 + $0x30] sm:$0xff] }
0x17f2   :  { %5657 = vmatmul.mubr.msk.f32.vlgmr.msra.gmra.mxu1 %vm389_vm2, %v3236_v13 }
0x17f3   :  { %5666 = vmatprep.mubr.msk.f32.mxu1 %vm301_vm1, %v2867_v50  ;;  %5665 = vmatpush3.msra.mxu1 %v4960_v21  ;;  %v5005_v50 = vld [vmem:[%s6796_s2 + $0x288] sm:$0xff] }
0x17f4   :  { %5680 = vmatprep.subr.mxu1 %v5001_v14 }
0x17f6   :  { %5667 = vmatmul.mubr.msk.f32.vlgmr.msra.gmra.mxu1 %vm301_vm1, %v5611_v49 }
0x17f7   :  { %5681 = vmatpush3.msra.mxu1 %v5001_v14  ;;  %5688 = vmatprep.mubr.msk.f32.mxu1 %vm49_vm0, %v6422_v41 }
0x17f8   :  { %5682 = vmatprep.subr.mxu1 %v5000_v28 }
0x17f9   :  { %5683 = vmatpush3.msra.mxu1 %v5000_v28 }
0x17fa   :  { %5684 = vmatprep.subr.mxu1 %v4999_v29 }
0x17fb   :  { %5685 = vmatpush3.msra.mxu1 %v4999_v29 }
0x17fc   :  { %5686 = vmatprep.subr.mxu1 %v4998_v31 }
0x17fd   :  { %5687 = vmatpush3.msra.mxu1 %v4998_v31 }
0x17fe   :  { %5689 = vmatmul.mubr.msk.f32.vlgmr.msra.gmra.mxu1 %vm49_vm0, %v6430_v34 }
0x18b2   :  { %v5658_v33 = vpop.f32.mrf.mxu1 }
0x18b4   :  { %v3309_v36 = vpop.f32.mrf.mxu1 }
0x18b5   :  { %5661 = vmatprep.mubr.msk.f32.mxu0 %vm301_vm1, %v3309_v36  ;;  %v5021_v36 = vld [vmem:[%s6796_s2 + $0x2a8] sm:$0xff] }
0x18b6   :  { %5662 = vmatmul.mubr.msk.f32.vlgmr.msra.gmra.mxu0 %vm301_vm1, %v5658_v33  ;;  %v6586_v35 = vpop.f32.mrf.mxu1  ;;  %v5022_v33 = vld [vmem:[%s6796_s2 + $0x2b0] sm:$0xff] }
0x18b7   :  { %5670 = vmatpush3.msra.mxu0 %v4995_v32  ;;  %5677 = vmatprep.mubr.msk.f32.mxu0 %vm49_vm0, %v6422_v41 }
0x18b8   :  { %5671 = vmatprep.subr.mxu0 %v4994_v37  ;;  %v6598_v46 = vpop.f32.mrf.mxu1 }
0x18b9   :  { %5672 = vmatpush3.msra.mxu0 %v4994_v37  ;;  %v5020_v37 = vld [vmem:[%s6796_s2 + $0x2a0] sm:$0xff] }
0x18ba   :  { %5673 = vmatprep.subr.mxu0 %v4993_v38 }
0x18bb   :  { %5674 = vmatpush3.msra.mxu0 %v4993_v38  ;;  %v5035_v38 = vld [vmem:[%s6796_s2 + $0x2f8] sm:$0xff] }
0x18bc   :  { %5675 = vmatprep.subr.mxu0 %v4992_v42 }
0x18bd   :  { %5676 = vmatpush3.msra.mxu0 %v4992_v42  ;;  %v5033_v42 = vld [vmem:[%s6796_s2 + $0x2e8] sm:$0xff] }
0x18be   :  { %5678 = vmatmul.mubr.msk.f32.vlgmr.msra.gmra.mxu0 %vm49_vm0, %v6430_v34  ;;  %v5690_v48 = vpop.f32.mrf.mxu1  ;;  %5691 = vmatprep.subr.mxu0 %v5007_v45 }
0x18bf   :  { %v3649_v49 = vadd.f32 %v5690_v48, %v3576_v44  ;;  %5692 = vmatpush3.msra.mxu0 %v5007_v45  ;;  %5699 = vmatprep.mubr.msk.f32.mxu0 %vm49_vm0, %v6414_v40  ;;  %v5029_v45 = vld [vmem:[%s6796_s2 + $0x2d8] sm:$0xff] }
0x18c0   :  { %v3643_v52 = vpop.f32.mrf.mxu1  ;;  %5693 = vmatprep.subr.mxu0 %v5006_v47 }
0x18c1   :  { %v3644_v54 = vadd.f32 %v3643_v52, %v3576_v44  ;;  %5694 = vmatpush3.msra.mxu0 %v5006_v47  ;;  %5702 = vmatprep.subr.msk.mxu1 %vm301_vm1, %v3649_v49  ;;  %v5032_v44 = vld [vmem:[%s6796_s2 + $0x2e0] sm:$0xff] }
0x18c2   :  { %5695 = vmatprep.subr.mxu0 %v5005_v50  ;;  %5703 = vmatpush3.xpose.msk.msra.mxu1 %vm301_vm1, %v3649_v49  ;;  %v5019_v49 = vld [vmem:[%s6798_s4 + $0xe] sm:$0x3] }
0x18c3   :  { %5696 = vmatpush3.msra.mxu0 %v5005_v50  ;;  %5704 = vmatprep.subr.msk.mxu1 %vm301_vm1, %v3644_v54  ;;  %v5028_v50 = vld [vmem:[%s6796_s2 + $0x2d0] sm:$0xff]  ;;  %v4017_v52 = vrot.slane %v5019_v49, %v6026_v19 }
0x18c4   :  { %5697 = vmatprep.subr.mxu0 %v5004_v55 }
0x18c5   :  { %5698 = vmatpush3.msra.mxu0 %v5004_v55  ;;  %v5026_v55 = vld [vmem:[%s6796_s2 + $0x2c0] sm:$0xff] }
0x18c6   :  { %5700 = vmatmul.mubr.msk.f32.vlgmr.msra.gmra.mxu0 %vm49_vm0, %v6412_v39  ;;  %5705 = vmatpush3.xpose.msk.msra.mxu1 %vm301_vm1, %v3644_v54  ;;  %v5027_v54 = vld [vmem:[%s6796_s2 + $0x2c8] sm:$0xff] }
0x18c7   :  { %5716 = vmatprep.subr.mxu1 %v5016_v61 }
0x1976   :  { %v6619_v56 = vpop.f32.mrf.mxu0 }
0x1978   :  { %v6621_v57 = vpop.f32.mrf.mxu0 }
0x197e   :  { %v5679_v59 = vpop.f32.mrf.mxu0 }
0x197f   :  { %v3565_v0 = vadd.f32 %v5679_v59, %v3492_v58 }
0x1980   :  { %v3559_v62 = vpop.f32.mrf.mxu0 }
0x1981   :  { %v3560_v63 = vadd.f32 %v3559_v62, %v3492_v58 }
0x1983   :  { %5706 = vmatprep.mubr.msk.f32.mxu1 %vm301_vm1, %v3560_v63 }
0x1984   :  { %5707 = vmatmul.mubr.msk.f32.vlgmr.msra.gmra.mxu1 %vm301_vm1, %v3565_v0 }
0x1985   :  { %5717 = vmatpush3.msra.mxu1 %v5016_v61 }
0x1986   :  { %v5701_v1 = vpop.f32.mrf.mxu0  ;;  %5732 = vmatprep.subr.mxu1 %v5029_v45 }
0x1987   :  { %5709 = vmatprep.subr.mxu0 %v5701_v1 }
0x1988   :  { %v3723_v2 = vpop.f32.mrf.mxu0  ;;  %5710 = vmatpush3.msra.mxu0 %v5701_v1  ;;  %v3479_v1 = vadd.f32 %v6586_v35, %v6619_v56 }
0x1989   :  { %5711 = vmatprep.subr.mxu0 %v3723_v2 }
0x198a   :  { %5712 = vmatpush3.msra.mxu0 %v3723_v2 }
0x198b   :  { %5721 = vmatprep.subr.mxu0 %v5023_v60 }
0x1a44   :  { %v5708_v3 = vpop.f32.mrf.mxu1 }
0x1a45   :  { %v3816_v4 = vadd.f32 %v6479_v8, %v5708_v3  ;;  %v3474_v3 = vadd.f32 %v6598_v46, %v6621_v57 }
0x1a46   :  { %v3810_v5 = vpop.f32.mrf.mxu1 }
0x1a47   :  { %v3811_v7 = vadd.f32 %v6490_v10, %v3810_v5  ;;  %v3822_v11 = vsel %vm389_vm2, %v3816_v4, -inf }
0x1a48   :  { %3823 = vmax.xlane.f32.xlu1 %v3822_v11 }
0x1a49   :  { %v3819_v17 = vsel %vm389_vm2, %v3811_v7, -inf }
0x1a4a   :  { %3820 = vmax.xlane.f32.xlu0 %v3819_v17 }
0x1ad1   :  { %v3824_v12 = vpop.xlane.xlu1 %3823 }
0x1ad2   :  { %v3826_v9 = vsub.f32 %v3816_v4, %v3824_v12 }
0x1ad3   :  { %v3821_v6 = vpop.xlane.xlu0 %3820 }
0x1ad4   :  { %v3829_v18 = vmul.f32 1.442695, %v3826_v9  ;;  %v3825_v20 = vsub.f32 %v3811_v7, %v3821_v6 }
0x1ad6   :  { %5862 = vpow2.f32 %v3829_v18  ;;  %v3827_v21 = vmul.f32 1.442695, %v3825_v20 }
0x1ad8   :  { %5864 = vpow2.f32 %v3827_v21 }
0x1ae3   :  { %v5863_v22 = vpop.eup %5862 }
0x1ae4   :  { %v3834_v23 = vsel %vm389_vm2, %v5863_v22, 0.0 }
0x1ae5   :  { %v5865_v24 = vpop.eup %5864  ;;  %3835 = vadd.xlane.f32.xlu1 %v3834_v23 }
0x1ae6   :  { %v3831_v25 = vsel %vm389_vm2, %v5865_v24, 0.0 }
0x1ae7   :  { %3832 = vadd.xlane.f32.xlu0 %v3831_v25 }
0x1b6e   :  { %v3836_v13 = vpop.xlane.xlu1 %3835 }
0x1b6f   :  { %5866 = vrcp.f32 %v3836_v13  ;;  %v5044_v13 = vld [vmem:[%s6797_s3 + $0x38] sm:$0xff] }
0x1b70   :  { %v3833_v14 = vpop.xlane.xlu0 %3832 }
0x1b71   :  { %5868 = vrcp.f32 %v3833_v14 }
0x1b7c   :  { %v5867_v28 = vpop.eup %5866 }
0x1b7d   :  { %v3840_v32 = vmul.f32 %v5867_v28, %v5863_v22 }
0x1b7e   :  { %v5869_v29 = vpop.eup %5868 }
0x1b7f   :  { %v3839_v31 = vmul.f32 %v5869_v29, %v5865_v24 }
0x1b81   :  { %5713 = vmatprep.mubr.msk.f32.mxu0 %vm389_vm2, %v3839_v31 }
0x1b82   :  { %5714 = vmatmul.mubr.msk.f32.vlgmr.msra.gmra.mxu0 %vm389_vm2, %v3840_v32 }
0x1b83   :  { %5722 = vmatpush3.msra.mxu0 %v5023_v60  ;;  %5729 = vmatprep.mubr.msk.f32.mxu0 %vm49_vm0, %v6422_v41 }
0x1b84   :  { %5723 = vmatprep.subr.mxu0 %v5022_v33 }
0x1b85   :  { %5724 = vmatpush3.msra.mxu0 %v5022_v33 }
0x1b86   :  { %5725 = vmatprep.subr.mxu0 %v5021_v36 }
0x1b87   :  { %5726 = vmatpush3.msra.mxu0 %v5021_v36 }
0x1b88   :  { %5727 = vmatprep.subr.mxu0 %v5020_v37 }
0x1b89   :  { %5728 = vmatpush3.msra.mxu0 %v5020_v37 }
0x1b8a   :  { %5730 = vmatmul.mubr.msk.f32.vlgmr.msra.gmra.mxu0 %vm49_vm0, %v6430_v34  ;;  %5743 = vmatprep.subr.mxu0 %v5035_v38 }
0x1b8b   :  { %5744 = vmatpush3.msra.mxu0 %v5035_v38  ;;  %5751 = vmatprep.mubr.msk.f32.mxu0 %vm49_vm0, %v6414_v40  ;;  %v6718_v38 = vld [vmem:[%s6801_s7 + $0x8] sm:$0x7f] }
0x1b8c   :  { %5745 = vmatprep.subr.mxu0 %v5034_v53 }
0x1b8d   :  { %5746 = vmatpush3.msra.mxu0 %v5034_v53  ;;  %v4535_v53 = vrot.slane %v6718_v38, %v6026_v19 }
0x1b8e   :  { %5747 = vmatprep.subr.mxu0 %v5033_v42 }
0x1b8f   :  { %5748 = vmatpush3.msra.mxu0 %v5033_v42 }
0x1b90   :  { %5749 = vmatprep.subr.mxu0 %v5032_v44 }
0x1b91   :  { %5750 = vmatpush3.msra.mxu0 %v5032_v44 }
0x1b92   :  { %5752 = vmatmul.mubr.msk.f32.vlgmr.msra.gmra.mxu0 %vm49_vm0, %v6412_v39 }
0x1c42   :  { %v5715_v47 = vpop.f32.mrf.mxu0 }
0x1c44   :  { %v3913_v48 = vpop.f32.mrf.mxu0 }
0x1c45   :  { %5718 = vmatprep.mubr.msk.f32.mxu1 %vm301_vm1, %v3913_v48 }
0x1c46   :  { %5719 = vmatmul.mubr.msk.f32.vlgmr.msra.gmra.mxu1 %vm301_vm1, %v5715_v47 }
0x1c47   :  { %5733 = vmatpush3.msra.mxu1 %v5029_v45  ;;  %5740 = vmatprep.mubr.msk.f32.mxu1 %vm49_vm0, %v6422_v41 }
0x1c48   :  { %5734 = vmatprep.subr.mxu1 %v5028_v50 }
0x1c49   :  { %5735 = vmatpush3.msra.mxu1 %v5028_v50 }
0x1c4a   :  { %v5731_v58 = vpop.f32.mrf.mxu0  ;;  %5736 = vmatprep.subr.mxu1 %v5027_v54 }
0x1c4b   :  { %v4090_v59 = vadd.f32 %v5731_v58, %v4017_v52  ;;  %5737 = vmatpush3.msra.mxu1 %v5027_v54 }
0x1c4c   :  { %v4084_v62 = vpop.f32.mrf.mxu0  ;;  %5738 = vmatprep.subr.mxu1 %v5026_v55 }
0x1c4d   :  { %v4085_v63 = vadd.f32 %v4084_v62, %v4017_v52  ;;  %5739 = vmatpush3.msra.mxu1 %v5026_v55 }
0x1c4e   :  { %5741 = vmatmul.mubr.msk.f32.vlgmr.msra.gmra.mxu1 %vm49_vm0, %v6430_v34  ;;  %v4101_v34 = vrot.slane %v5019_v49, %v6019_v16 }
0x1c4f   :  { %5758 = vmatprep.mubr.msk.f32.mxu1 %vm301_vm1, %v4085_v63 }
0x1c52   :  { %v5753_v41 = vpop.f32.mrf.mxu0 }
0x1c53   :  { %5761 = vmatprep.subr.mxu0 %v5753_v41 }
0x1c54   :  { %v4248_v0 = vpop.f32.mrf.mxu0  ;;  %5762 = vmatpush3.msra.mxu0 %v5753_v41 }
0x1c55   :  { %5763 = vmatprep.subr.mxu0 %v4248_v0 }
0x1c56   :  { %5764 = vmatpush3.msra.mxu0 %v4248_v0 }
0x1d06   :  { %v5720_v2 = vpop.f32.mrf.mxu1 }
0x1d07   :  { %v4006_v4 = vadd.f32 %v5720_v2, %v3479_v1 }
0x1d08   :  { %v3996_v5 = vpop.f32.mrf.mxu1 }
0x1d09   :  { %v4005_v7 = vadd.f32 %v3996_v5, %v3474_v3  ;;  %v5049_v3 = vld [vmem:[%s6799_s5 + $0x30] sm:$0xff]  ;;  %v5047_v5 = vld [vmem:[%s6799_s5 + $0x20] sm:$0xff] }
0x1d0e   :  { %v5742_v11 = vpop.f32.mrf.mxu1 }
0x1d0f   :  { %v4174_v17 = vadd.f32 %v5742_v11, %v4101_v34  ;;  %v5058_v11 = vld [vmem:[%s6800_s6 + $0x68] sm:$0xff] }
0x1d10   :  { %v4168_v12 = vpop.f32.mrf.mxu1 }
0x1d11   :  { %v4169_v9 = vadd.f32 %v4168_v12, %v4101_v34  ;;  %5754 = vmatprep.subr.msk.mxu1 %vm301_vm1, %v4174_v17  ;;  %v5059_v34 = vld [vmem:[%s6800_s6 + $0x70] sm:$0xff] }
0x1d12   :  { %5755 = vmatpush3.xpose.msk.msra.mxu1 %vm301_vm1, %v4174_v17  ;;  %v5057_v17 = vld [vmem:[%s6800_s6 + $0x60] sm:$0xff] }
0x1d13   :  { %5756 = vmatprep.subr.msk.mxu1 %vm301_vm1, %v4169_v9 }
0x1d16   :  { %5757 = vmatpush3.xpose.msk.msra.mxu1 %vm301_vm1, %v4169_v9 }
0x1d17   :  { %5768 = vmatprep.subr.mxu1 %v5044_v13 }
0x1d19   :  { %5759 = vmatmul.mubr.msk.f32.vlgmr.msra.gmra.mxu1 %vm301_vm1, %v4090_v59 }
0x1d1a   :  { %5769 = vmatpush3.msra.mxu1 %v5044_v13  ;;  %v4586_v13 = vrot.slane %v6718_v38, %v2201_v43 }
0x1dd9   :  { %v5760_v35 = vpop.f32.mrf.mxu1 }
0x1dda   :  { %v4341_v46 = vadd.f32 %v6479_v8, %v5760_v35 }
0x1ddb   :  { %v4335_v56 = vpop.f32.mrf.mxu1 }
0x1ddc   :  { %v4336_v57 = vadd.f32 %v6490_v10, %v4335_v56  ;;  %v4347_v6 = vsel %vm389_vm2, %v4341_v46, -inf }
0x1ddd   :  { %4348 = vmax.xlane.f32.xlu1 %v4347_v6 }
0x1dde   :  { %v4344_v18 = vsel %vm389_vm2, %v4336_v57, -inf }
0x1ddf   :  { %4345 = vmax.xlane.f32.xlu0 %v4344_v18  ;;  %v4569_v18 = vrot.slane %v6718_v38, %v6019_v16  ;;  %v5055_v16 = vld [vmem:[%s6800_s6 + $0x50] sm:$0xff] }
0x1e66   :  { %v4349_v20 = vpop.xlane.xlu1 %4348 }
0x1e67   :  { %v4351_v21 = vsub.f32 %v4341_v46, %v4349_v20 }
0x1e68   :  { %v4346_v22 = vpop.xlane.xlu0 %4345 }
0x1e69   :  { %v4354_v23 = vmul.f32 1.442695, %v4351_v21  ;;  %v4350_v24 = vsub.f32 %v4336_v57, %v4346_v22 }
0x1e6b   :  { %5870 = vpow2.f32 %v4354_v23  ;;  %v4352_v25 = vmul.f32 1.442695, %v4350_v24  ;;  %v4575_v24 = vrot.slane %v6718_v38, %v2191_v30  ;;  %v5054_v30 = vld [vmem:[%s6800_s6 + $0x48] sm:$0xff] }
0x1e6d   :  { %5872 = vpow2.f32 %v4352_v25 }
0x1e78   :  { %v5871_v60 = vpop.eup %5870 }
0x1e79   :  { %v4359_v8 = vsel %vm389_vm2, %v5871_v60, 0.0 }
0x1e7a   :  { %v5873_v61 = vpop.eup %5872  ;;  %4360 = vadd.xlane.f32.xlu1 %v4359_v8 }
0x1e7b   :  { %v4356_v10 = vsel %vm389_vm2, %v5873_v61, 0.0 }
0x1e7c   :  { %4357 = vadd.xlane.f32.xlu0 %v4356_v10  ;;  %v5053_v10 = vld [vmem:[%s6800_s6 + $0x40] sm:$0xff] }
0x1f03   :  { %v4361_v14 = vpop.xlane.xlu1 %4360 }
0x1f04   :  { %5874 = vrcp.f32 %v4361_v14 }
0x1f05   :  { %v4358_v28 = vpop.xlane.xlu0 %4357 }
0x1f06   :  { %5876 = vrcp.f32 %v4358_v28 }
0x1f11   :  { %v5875_v29 = vpop.eup %5874 }
0x1f12   :  { %v4365_v33 = vmul.f32 %v5875_v29, %v5871_v60 }
0x1f13   :  { %v5877_v31 = vpop.eup %5876 }
0x1f14   :  { %v4364_v32 = vmul.f32 %v5877_v31, %v5873_v61  ;;  %v5056_v61 = vld [vmem:[%s6800_s6 + $0x58] sm:$0xff] }
0x1f16   :  { %5765 = vmatprep.mubr.msk.f32.mxu0 %vm389_vm2, %v4364_v32 }
0x1f17   :  { %5766 = vmatmul.mubr.msk.f32.vlgmr.msra.gmra.mxu0 %vm389_vm2, %v4365_v33 }
0x1fd7   :  { %v5767_v36 = vpop.f32.mrf.mxu0 }
0x1fd9   :  { %v4438_v37 = vpop.f32.mrf.mxu0 }
0x1fda   :  { %5770 = vmatprep.mubr.msk.f32.mxu1 %vm301_vm1, %v4438_v37 }
0x1fdb   :  { %5771 = vmatmul.mubr.msk.f32.vlgmr.msra.gmra.mxu1 %vm301_vm1, %v5767_v36  ;;  %v4682_v36 = vrot.slane %v6718_v38, %v2296_v51 }
0x209b   :  { %v5772_v42 = vpop.f32.mrf.mxu1 }
0x209c   :  { %v4531_v44 = vadd.f32 %v5772_v42, %v4006_v4  ;;  %v5048_v4 = vld [vmem:[%s6799_s5 + $0x28] sm:$0xff] }
0x209d   :  { %v4521_v45 = vpop.f32.mrf.mxu1 }
0x209e   :  { %v4537_v47 = vadd.f32 %v4535_v53, %v4531_v44  ;;  %v4530_v48 = vadd.f32 %v4521_v45, %v4005_v7  ;;  %v5060_v7 = vld [vmem:[%s6800_s6 + $0x78] sm:$0xff]  ;;  %s5912_s6 = smov [#allocation2]  }
0x209f   :  { %5784 = vmatprep.subr.mxu1 %v5060_v7  ;;  %s4811_s1 = sshll.u32 %s5912_s6, 4  ;;  %s4812_s1 = int_to_ptr.vmem [resolvable:$true] %s4811_s1 }
0x20a0   :  { %v4536_v49 = vadd.f32 %v4535_v53, %v4530_v48  ;;  %v4539_v50 = vadd.f32 %v4537_v47, %v6412_v39  ;;  %5785 = vmatpush3.msra.mxu1 %v5060_v7  ;;  %s5890_s2 = scalar_lea.vmem %s4812_s1, 256  ;;  %p5895_p1 = scmp.lt.s32.totalorder %s4812_s1, %s4812_s1 }
0x20a1   :  { %5786 = vmatprep.subr.mxu1 %v5059_v34  ;;  %p5891_p0 = scmp.ne.s32.totalorder %s4812_s1, %s5890_s2  ;;  %p5896_p2 = scmp.lt.s32.totalorder %s5890_s2, %s5890_s2 }
0x20a2   :  { %v4543_v52 = vsel %vm49_vm0, %v4539_v50, 0.0  ;;  %v4538_v54 = vadd.f32 %v4536_v49, %v6414_v40  ;;  %v5050_v40 = vld [vmem:[%s6799_s5 + $0x38] sm:$0xff]  ;;  %5787 = vmatpush3.msra.mxu1 %v5059_v34 }
0x20a3   :  { %4544 = vadd.xlane.f32.xlu1 %v4543_v52  ;;  %5773 = vmatprep.subr.mxu0 %v5050_v40  ;;  %p5897_p3 = por %p5896_p2, %p5895_p1 }
0x20a4   :  { %v4540_v55 = vsel %vm49_vm0, %v4538_v54, 0.0  ;;  %5774 = vmatpush3.msra.mxu0 %v5050_v40  ;;  %5788 = vmatprep.subr.mxu1 %v5058_v11  ;;  %v4795_v40 = vrot.slane %v6718_v38, %v2410_v26 }
0x20a5   :  { %4541 = vadd.xlane.f32.xlu0 %v4540_v55  ;;  %5775 = vmatprep.subr.mxu0 %v5049_v3  ;;  %p5898_p4 = pnand %p5897_p3, %p5891_p0 }
0x20a6   :  { %5776 = vmatpush3.msra.mxu0 %v5049_v3  ;;  %5789 = vmatpush3.msra.mxu1 %v5058_v11 }
0x20a7   :  { %5777 = vmatprep.subr.mxu0 %v5048_v4  ;;  %5790 = vmatprep.subr.mxu1 %v5057_v17 }
0x20a8   :  { %5778 = vmatpush3.msra.mxu0 %v5048_v4  ;;  %5791 = vmatpush3.msra.mxu1 %v5057_v17 }
0x20a9   :  { %5779 = vmatprep.subr.mxu0 %v5047_v5  ;;  %5792 = vmatprep.subr.mxu1 %v5056_v61 }
0x20aa   :  { %5780 = vmatpush3.msra.mxu0 %v5047_v5  ;;  %5793 = vmatpush3.msra.mxu1 %v5056_v61  ;;  %v4801_v5 = vrot.slane %v6718_v38, %v2416_v27 }
0x20ab   :  { %5794 = vmatprep.subr.mxu1 %v5055_v16 }
0x20ac   :  { %5795 = vmatpush3.msra.mxu1 %v5055_v16 }
0x20ad   :  { %5796 = vmatprep.subr.mxu1 %v5054_v30 }
0x20ae   :  { %5797 = vmatpush3.msra.mxu1 %v5054_v30 }
0x20af   :  { %5798 = vmatprep.subr.mxu1 %v5053_v10 }
0x20b0   :  { %5799 = vmatpush3.msra.mxu1 %v5053_v10 }
0x212c   :  { %v4545_v58 = vpop.xlane.xlu1 %4544 }
0x212d   :  { %v4547_v59 = vmul.f32 0.03125, %v4545_v58 }
0x212e   :  { %v4542_v62 = vpop.xlane.xlu0 %4541 }
0x212f   :  { %v4549_v19 = vsub.f32 %v4539_v50, %v4547_v59  ;;  %v4546_v63 = vmul.f32 0.03125, %v4542_v62 }
0x2131   :  { %v4548_v41 = vsub.f32 %v4538_v54, %v4546_v63  ;;  %v4551_v0 = vmul.f32 %v4549_v19, %v4549_v19 }
0x2133   :  { %v4555_v1 = vsel %vm49_vm0, %v4551_v0, 0.0  ;;  %v4550_v2 = vmul.f32 %v4548_v41, %v4548_v41 }
0x2134   :  { %4556 = vadd.xlane.f32.xlu1 %v4555_v1 }
0x2135   :  { %v4552_v39 = vsel %vm49_vm0, %v4550_v2, 0.0 }
0x2136   :  { %4553 = vadd.xlane.f32.xlu0 %v4552_v39 }
0x21bd   :  { %v4557_v12 = vpop.xlane.xlu1 %4556 }
0x21be   :  { %v4559_v9 = vmul.f32 0.03125, %v4557_v12 }
0x21bf   :  { %v4554_v35 = vpop.xlane.xlu0 %4553 }
0x21c0   :  { %v4561_v46 = vadd.f32 1e-05, %v4559_v9  ;;  %v4558_v56 = vmul.f32 0.03125, %v4554_v35 }
0x21c2   :  { %5878 = vrsqrt.f32 %v4561_v46  ;;  %v4560_v57 = vadd.f32 1e-05, %v4558_v56 }
0x21c4   :  { %5880 = vrsqrt.f32 %v4560_v57 }
0x21cf   :  { %v5879_v6 = vpop.eup %5878 }
0x21d0   :  { %v4565_v20 = vmul.f32 %v5879_v6, %v4549_v19 }
0x21d1   :  { %v5881_v21 = vpop.eup %5880 }
0x21d2   :  { %v4564_v22 = vmul.f32 %v5881_v21, %v4548_v41  ;;  %v4571_v23 = vmul.f32 %v4569_v18, %v4565_v20 }
0x21d4   :  { %v4570_v25 = vmul.f32 %v4569_v18, %v4564_v22  ;;  %v4577_v8 = vadd.f32 %v4575_v24, %v4571_v23 }
0x21d6   :  { %v4576_v60 = vadd.f32 %v4575_v24, %v4570_v25 }
0x21d8   :  { %5781 = vmatprep.mubr.msk.f32.mxu0 %vm49_vm0, %v4576_v60 }
0x21d9   :  { %5782 = vmatmul.mubr.msk.f32.vlgmr.msra.gmra.mxu0 %vm49_vm0, %v4577_v8 }
0x2299   :  { %v5783_v14 = vpop.f32.mrf.mxu0 }
0x229a   :  { %v4665_v28 = vadd.f32 %v5783_v14, %v4586_v13 }
0x229b   :  { %v4659_v29 = vpop.f32.mrf.mxu0 }
0x229c   :  { %v4660_v31 = vadd.f32 %v4659_v29, %v4586_v13  ;;  %v4669_v33 = vmax.f32 %v4665_v28, 0.0 }
0x229e   :  { %v4668_v32 = vmax.f32 %v4660_v31, 0.0 }
0x22a0   :  { %5800 = vmatprep.mubr.msk.f32.mxu1 %vm2298_vm3, %v4668_v32 }
0x22a1   :  { %5801 = vmatmul.mubr.msk.f32.vlgmr.msra.gmra.mxu1 %vm2298_vm3, %v4669_v33 }
0x2361   :  { %v5802_v37 = vpop.f32.mrf.mxu1 }
0x2362   :  { %v4761_v53 = vadd.f32 %v5802_v37, %v4682_v36 }
0x2363   :  { %v4755_v42 = vpop.f32.mrf.mxu1 }
0x2364   :  { %v4756_v44 = vadd.f32 %v4755_v42, %v4682_v36  ;;  %v4765_v45 = vadd.f32 %v4761_v53, %v4577_v8 }
0x2366   :  { %v4769_v43 = vsel %vm49_vm0, %v4765_v45, 0.0  ;;  %v4764_v47 = vadd.f32 %v4756_v44, %v4576_v60 }
0x2367   :  { %4770 = vadd.xlane.f32.xlu1 %v4769_v43 }
0x2368   :  { %v4766_v48 = vsel %vm49_vm0, %v4764_v47, 0.0 }
0x2369   :  { %4767 = vadd.xlane.f32.xlu0 %v4766_v48 }
0x23f0   :  { %v4771_v49 = vpop.xlane.xlu1 %4770 }
0x23f1   :  { %v4773_v50 = vmul.f32 0.03125, %v4771_v49 }
0x23f2   :  { %v4768_v52 = vpop.xlane.xlu0 %4767 }
0x23f3   :  { %v4775_v54 = vsub.f32 %v4765_v45, %v4773_v50  ;;  %v4772_v55 = vmul.f32 0.03125, %v4768_v52 }
0x23f5   :  { %v4774_v58 = vsub.f32 %v4764_v47, %v4772_v55  ;;  %v4777_v59 = vmul.f32 %v4775_v54, %v4775_v54 }
0x23f7   :  { %v4781_v51 = vsel %vm49_vm0, %v4777_v59, 0.0  ;;  %v4776_v62 = vmul.f32 %v4774_v58, %v4774_v58 }
0x23f8   :  { %4782 = vadd.xlane.f32.xlu1 %v4781_v51 }
0x23f9   :  { %v4778_v19 = vsel %vm49_vm0, %v4776_v62, 0.0 }
0x23fa   :  { %4779 = vadd.xlane.f32.xlu0 %v4778_v19 }
0x2481   :  { %v4783_v63 = vpop.xlane.xlu1 %4782 }
0x2482   :  { %v4785_v41 = vmul.f32 0.03125, %v4783_v63 }
0x2483   :  { %v4780_v0 = vpop.xlane.xlu0 %4779 }
0x2484   :  { %v4787_v1 = vadd.f32 1e-05, %v4785_v41  ;;  %v4784_v2 = vmul.f32 0.03125, %v4780_v0 }
0x2486   :  { %5882 = vrsqrt.f32 %v4787_v1  ;;  %v4786_v39 = vadd.f32 1e-05, %v4784_v2 }
0x2488   :  { %5884 = vrsqrt.f32 %v4786_v39 }
0x2493   :  { %v5883_v3 = vpop.eup %5882 }
0x2494   :  { %v4791_v4 = vmul.f32 %v5883_v3, %v4775_v54 }
0x2495   :  { %v5885_v7 = vpop.eup %5884 }
0x2496   :  { %v4790_v34 = vmul.f32 %v5885_v7, %v4774_v58  ;;  %v4797_v11 = vmul.f32 %v4795_v40, %v4791_v4 }
0x2498   :  { %v4796_v17 = vmul.f32 %v4795_v40, %v4790_v34  ;;  %v4803_v12 = vadd.f32 %v4801_v5, %v4797_v11 }
0x249a   :  { %v4802_v9 = vadd.f32 %v4801_v5, %v4796_v17  ;;  %4805 = vst.msk [vmem:[#allocation2 + $0x8] sm:$0xff] %vm49_vm0, %v4803_v12 }
0x249c   :  { %4804 = vst.msk [vmem:[#allocation2] sm:$0xff] %vm49_vm0, %v4802_v9 }
0x249d   :  { %5901 = shalt.err (!%p5898_p4)
}
0x249e   :  { %s5913_s22 = smov 128   ;;  %s5914_s3 = smov 8  }
0x249f   :  { %4817 = dma.vmem_to_hbm [thread:$0]  %s4812_s1, 256, %s6802_s8, [#allocation3], %s5913_s22, %s5913_s22, %s5914_s3  }
0x24a0   :  { %5910 = dma.done.wait [#allocation3], 256  }
0x24a1   :  { %5911 = vsyncadd [#allocation3], 4294967040 }
0x24a2   :  { %4821 = vsyncpa [#allocation3], 1 }

</bundles_post_ra>
